<compile_context>
chip_gen: v5e
topology: v5e:2x2
jax: 0.10.0
libtpu: 0.0.40
codegen_flags: <defaults>
</compile_context>

<pallas_src>
import itertools

import numpy as np
import jax
import jax.numpy as jnp
from jax.experimental import pallas as pl
from jax.experimental.pallas import tpu as pltpu


def _make_trn_kernel(*, num_clips, n_scales, max_rel, matmul_dtype):
    T = num_clips

    def kernel(meta_ref, clip_ref,
               x_ref, w1_ref, b1_ref, w2_ref, b2_ref,
               o_ref, z_ref):
        """Grid = (batch_tile, scale).  One inner step handles one relation scale.

        Scalar-prefetch (SMEM, flat int32):
          meta_ref : (3*n_scales,)          [n_rel | scale_len | slab_off] per scale
          clip_ref : (n_scales*max_rel*T,)  clip index per (scale, relation, clip slot)
        Inputs (VMEM blocks):
          x_ref  : (T, BT, D)  f32          clip features for this batch tile
          w1_ref : (n_slabs, D, NB) bf16    tight per-clip W1 slabs (resident, one DMA)
          b1_ref : (n_scales, 1, NB) f32
          w2_ref : (n_scales, NB, C) f32
          b2_ref : (n_scales, 1, C)  f32
        Output:
          o_ref  : (BT, C) f32              sum over all relations (resident accumulator)
        Scratch:
          z_ref  : (max_rel, BT, NB) f32    layer-1 accumulators, one per relation
        """
        sidx = pl.program_id(1)
        n_rel = meta_ref[sidx]
        scale_len = meta_ref[n_scales + sidx]
        slab_off = meta_ref[2 * n_scales + sidx]

        @pl.when(sidx == 0)
        def _():
            o_ref[...] = jnp.zeros_like(o_ref)

        z_ref[...] = jnp.zeros_like(z_ref)

        # Layer 1: z[r] = sum_t relu(x[clip(r, t)]) @ W1_scale[t].
        # Only real (relation, clip) pairs execute — dead dots are skipped at runtime.
        for t in range(T):
            for r_i in range(max_rel):
                @pl.when(jnp.logical_and(t < scale_len, r_i < n_rel))
                def _(t=t, r_i=r_i):
                    c = clip_ref[(sidx * max_rel + r_i) * T + t]
                    xt = jnp.maximum(x_ref[c], 0.0).astype(matmul_dtype)  # fused nn.ReLU()
                    w1 = w1_ref[slab_off + t]                             # (D, NB) bf16 slab
                    z_ref[r_i] += jnp.dot(xt, w1,
                                          preferred_element_type=jnp.float32)

        # Layer 2 (once per scale, exploiting its linearity over relations):
        #   out += (sum_r relu(z_r + b1_s)) @ W2_s + n_rel * b2_s
        # nn.ReLU(); nn.Dropout is identity in eval mode.  (f32 elementwise: v5e VPU has no bf16.)
        b1 = b1_ref[sidx]                                                 # (1, NB) f32
        hsum = jnp.zeros(z_ref.shape[1:], jnp.float32)
        for r_i in range(max_rel):
            live = (r_i < n_rel).astype(jnp.float32)
            hsum = hsum + live * jnp.maximum(z_ref[r_i] + b1, 0.0)
        y = jnp.dot(hsum, w2_ref[sidx], preferred_element_type=jnp.float32)
        o_ref[...] += y + n_rel.astype(jnp.float32) * b2_ref[sidx]

    return kernel


def trn_forward_fused(x_tbd, meta_tbl, clip_tbl,
                      w1_tight, b1_stack, w2_stack, b2_stack,
                      *, max_rel, batch_tile=256):
    """x_tbd: (T, B, D) f32.  Returns (B, C) f32 logits summed over all relations."""
    T, B, D = x_tbd.shape
    n_slabs, _, NB = w1_tight.shape
    n_scales, _, C = w2_stack.shape

    # --- batch tiling: bounded VMEM + megacore-parallel outer axis -----------
    if B <= batch_tile:
        BT, Bp = B, B                       # single tile, full (possibly small) batch
    else:
        BT = batch_tile                     # multiple of 8 sublanes
        assert BT % 8 == 0
        assert D % 128 == 0, "tiled batch requires a lane-aligned feature dim"
        Bp = ((B + BT - 1) // BT) * BT
    x_p = x_tbd if Bp == B else jnp.pad(x_tbd, ((0, 0), (0, Bp - B), (0, 0)))
    nb_tiles = Bp // BT

    kernel = _make_trn_kernel(num_clips=T, n_scales=n_scales, max_rel=max_rel,
                              matmul_dtype=w1_tight.dtype)

    # Explicit VMEM budget (double-buffered inputs + scratch) with headroom,
    # capped below v7x's 64 MiB physical VMEM.
    vmem_bytes = (2 * T * BT * D * 4                                    # x
                  + 2 * n_slabs * D * NB * w1_tight.dtype.itemsize     # W1 (resident)
                  + 2 * n_scales * (NB + NB * C + C) * 4               # b1, w2, b2
                  + 2 * BT * C * 4                                     # out
                  + max_rel * BT * NB * 4)                             # z scratch
    vmem_limit = int(min(max(int(1.3 * vmem_bytes) + (8 << 20), 32 << 20), 60 << 20))

    out = pl.pallas_call(
        kernel,
        out_shape=jax.ShapeDtypeStruct((Bp, C), jnp.float32),
        grid_spec=pltpu.PrefetchScalarGridSpec(
            num_scalar_prefetch=2,
            grid=(nb_tiles, n_scales),
            in_specs=[
                pl.BlockSpec((T, BT, D), lambda b, s, meta, clip: (0, b, 0)),
                pl.BlockSpec((n_slabs, D, NB), lambda b, s, meta, clip: (0, 0, 0)),
                pl.BlockSpec((n_scales, 1, NB), lambda b, s, meta, clip: (0, 0, 0)),
                pl.BlockSpec((n_scales, NB, C), lambda b, s, meta, clip: (0, 0, 0)),
                pl.BlockSpec((n_scales, 1, C), lambda b, s, meta, clip: (0, 0, 0)),
            ],
            out_specs=pl.BlockSpec((BT, C), lambda b, s, meta, clip: (b, 0)),
            scratch_shapes=[pltpu.VMEM((max_rel, BT, NB), jnp.float32)],
        ),
        compiler_params=pltpu.CompilerParams(
            dimension_semantics=("parallel", "arbitrary"),   # batch || , scale = reduction
            vmem_limit_bytes=vmem_limit,
        ),
    )(meta_tbl, clip_tbl, x_p, w1_tight, b1_stack, w2_stack, b2_stack)
    return out[:B] if Bp != B else out


class TRNClassifierPallas:
    def __init__(self, num_bottleneck=256, clip_feature_dim=1024, num_clips=5,
                 num_class=8, dropout=0.5, seed=0, matmul_dtype=jnp.bfloat16):
        self.subsample_num = 3
        self.clip_feature_dim = clip_feature_dim
        self.num_clips = num_clips
        self.num_bottleneck = num_bottleneck
        self.num_class = num_class
        self.scales = [i for i in range(num_clips, 1, -1)]

        self.relations_scales = []
        self.subsample_scales = []
        for scale in self.scales:
            rel = list(itertools.combinations(range(num_clips), scale))
            self.relations_scales.append(rel)
            self.subsample_scales.append(min(self.subsample_num, len(rel)))

        n_scales = len(self.scales)
        T, D, NB, C = num_clips, clip_feature_dim, num_bottleneck, num_class

        # Relations actually used per scale: scale 0 always uses its single full
        # relation (PyTorch forward); scales >= 1 are subsampled.
        self.n_rel_per_scale = [1] + [self.subsample_scales[i] for i in range(1, n_scales)]
        self.max_rel = max(self.n_rel_per_scale)
        self.slab_off = np.cumsum([0] + self.scales[:-1]).astype(np.int32)
        n_slabs = int(sum(self.scales))

        # Deterministic init, mimicking nn.Linear's U(-1/sqrt(fan_in), 1/sqrt(fan_in)).
        key = jax.random.PRNGKey(seed)
        self.params = []                                     # f32 copies for the reference
        w1_tight = np.zeros((n_slabs, D, NB), np.float32)    # tight per-clip slabs, no padding
        b1_stack = np.zeros((n_scales, 1, NB), np.float32)
        w2_stack = np.zeros((n_scales, NB, C), np.float32)
        b2_stack = np.zeros((n_scales, 1, C), np.float32)
        for i, scale in enumerate(self.scales):
            k_in = scale * D
            key, k1, k2, k3, k4 = jax.random.split(key, 5)
            bnd1 = 1.0 / np.sqrt(k_in)
            bnd2 = 1.0 / np.sqrt(NB)
            w1 = jax.random.uniform(k1, (k_in, NB), jnp.float32, -bnd1, bnd1)
            b1 = jax.random.uniform(k2, (NB,), jnp.float32, -bnd1, bnd1)
            w2 = jax.random.uniform(k3, (NB, C), jnp.float32, -bnd2, bnd2)
            b2 = jax.random.uniform(k4, (C,), jnp.float32, -bnd2, bnd2)
            self.params.append((w1, b1, w2, b2))
            w1_np = np.asarray(w1)
            for t in range(scale):
                w1_tight[self.slab_off[i] + t] = w1_np[t * D:(t + 1) * D, :]
            b1_stack[i, 0, :] = np.asarray(b1)
            w2_stack[i, :, :] = np.asarray(w2)
            b2_stack[i, 0, :] = np.asarray(b2)
        # bf16 W1: MXU-native operands, half the HBM traffic / VMEM footprint.
        self.w1_tight = jnp.asarray(w1_tight).astype(matmul_dtype)
        self.b1_stack = jnp.asarray(b1_stack)
        self.w2_stack = jnp.asarray(w2_stack)
        self.b2_stack = jnp.asarray(b2_stack)

        print('Multi-Scale Temporal Relation Network Module in use',
              ['%d-clip relation' % i for i in self.scales])

    def _build_tables(self, rng):
        """Host-side relation subsampling -> flat static-shape SMEM tables."""
        n_scales, T, max_rel = len(self.scales), self.num_clips, self.max_rel
        sel = [[0]]                                      # scale 0: the single full relation
        for sid in range(1, n_scales):
            idx = rng.choice(len(self.relations_scales[sid]),
                             self.subsample_scales[sid], replace=False)
            sel.append([int(i) for i in idx])

        meta = np.zeros((3 * n_scales,), np.int32)       # [n_rel | scale_len | slab_off]
        clip = np.zeros((n_scales * max_rel * T,), np.int32)   # unused slots -> 0 (never read)
        for sid, scale in enumerate(self.scales):
            meta[sid] = len(sel[sid])
            meta[n_scales + sid] = scale
            meta[2 * n_scales + sid] = self.slab_off[sid]
            for r_i, ridx in enumerate(sel[sid]):
                rel = self.relations_scales[sid][ridx]
                for t in range(scale):
                    clip[(sid * max_rel + r_i) * T + t] = rel[t]
        return jnp.asarray(meta), jnp.asarray(clip)

    def forward(self, x, rng_seed=0):
        """x: (B, num_clips, clip_feature_dim) f32. Returns (B, num_class) logits."""
        rng = np.random.RandomState(rng_seed)            # deterministic relation subsampling
        meta_tbl, clip_tbl = self._build_tables(rng)
        x_tbd = jnp.transpose(x, (1, 0, 2))              # (T, B, D): clip axis leading
        return trn_forward_fused(x_tbd, meta_tbl, clip_tbl,
                                 self.w1_tight, self.b1_stack,
                                 self.w2_stack, self.b2_stack,
                                 max_rel=self.max_rel)

    # Pure-JAX f32 reference (mirrors the PyTorch forward) for correctness checking.
    def forward_ref(self, x, rng_seed=0):
        rng = np.random.RandomState(rng_seed)

        def mlp(xr, p):
            w1, b1, w2, b2 = p
            h = jnp.maximum(jnp.maximum(xr, 0.0) @ w1 + b1, 0.0)
            return h @ w2 + b2

        B = x.shape[0]
        rel = self.relations_scales[0][0]
        xr = x[:, list(rel), :].reshape(B, self.scales[0] * self.clip_feature_dim)
        act_all = mlp(xr, self.params[0])
        for sid in range(1, len(self.scales)):
            idx = rng.choice(len(self.relations_scales[sid]),
                             self.subsample_scales[sid], replace=False)
            for i in idx:
                rel = self.relations_scales[sid][i]
                xr = x[:, list(rel), :].reshape(B, self.scales[sid] * self.clip_feature_dim)
                act_all = act_all + mlp(xr, self.params[sid])
        return act_all


if __name__ == "__main__":
    # Small, module-consistent shapes.  NB kept a multiple of 256 (module default)
    # so the v6e/v7x 256-wide MXU N dimension is fully used.
    B, T, D = 4, 5, 128          # batch, num_clips, clip_feature_dim
    NB, C = 256, 8               # num_bottleneck, num_class

    model = TRNClassifierPallas(num_bottleneck=NB, clip_feature_dim=D,
                                num_clips=T, num_class=C, seed=0)

    key = jax.random.PRNGKey(0)
    x = jax.random.normal(key, (B, T, D), dtype=jnp.float32)

    out = jax.block_until_ready(model.forward(x, rng_seed=0))
    ref = jax.block_until_ready(model.forward_ref(x, rng_seed=0))
    # bf16 layer-1 operands + f32 reassociation (per-clip split, layer-2 linearity)
    # -> tolerance looser than the pure-f32 version's 1e-4.
    np.testing.assert_allclose(np.asarray(out), np.asarray(ref), rtol=5e-2, atol=5e-2)

    assert out.shape == (B, C)
    print("KERNEL_OK")
</pallas_src>

<mosaic_0001>
module attributes {stable_mosaic.version = 11 : i64} {
  func.func @kernel(%arg0: i32, %arg1: i32, %arg2: memref<12xi32, #tpu.memory_space<smem>>, %arg3: memref<60xi32, #tpu.memory_space<smem>>, %arg4: memref<5x4x128xf32, #tpu.memory_space<vmem>>, %arg5: memref<14x128x256xbf16, #tpu.memory_space<vmem>>, %arg6: memref<4x1x256xf32, #tpu.memory_space<vmem>>, %arg7: memref<4x256x8xf32, #tpu.memory_space<vmem>>, %arg8: memref<4x1x8xf32, #tpu.memory_space<vmem>>, %arg9: memref<4x8xf32, #tpu.memory_space<vmem>>, %arg10: memref<3x4x256xf32, #tpu.memory_space<vmem>>) attributes {dimension_semantics = [#tpu.dimension_semantics<parallel>, #tpu.dimension_semantics<arbitrary>], iteration_bounds = array<i64: 1, 4>, scalar_prefetch = 2 : i64, scratch_operands = 1 : i64, tpu.core_type = #tpu.core_type<tc>, window_params = [{transform_indices = @transform_0, window_bounds = array<i64: 5, 4, 128>}, {pipeline_mode = #tpu.pipeline_mode<synchronous>, transform_indices = @transform_1, window_bounds = array<i64: 14, 128, 256>}, {pipeline_mode = #tpu.pipeline_mode<synchronous>, transform_indices = @transform_2, window_bounds = array<i64: 4, 1, 256>}, {pipeline_mode = #tpu.pipeline_mode<synchronous>, transform_indices = @transform_3, window_bounds = array<i64: 4, 256, 8>}, {pipeline_mode = #tpu.pipeline_mode<synchronous>, transform_indices = @transform_4, window_bounds = array<i64: 4, 1, 8>}, {transform_indices = @transform_5, window_bounds = array<i64: 4, 8>}]} {
    %0 = arith.index_cast %arg1 : i32 to index
    %1 = memref.load %arg2[%0] : memref<12xi32, #tpu.memory_space<smem>>
    %c4_i32 = arith.constant 4 : i32
    %2 = arith.addi %c4_i32, %arg1 : i32
    %3 = arith.index_cast %2 : i32 to index
    %4 = memref.load %arg2[%3] : memref<12xi32, #tpu.memory_space<smem>>
    %c8_i32 = arith.constant 8 : i32
    %5 = arith.addi %c8_i32, %arg1 : i32
    %6 = arith.index_cast %5 : i32 to index
    %7 = memref.load %arg2[%6] : memref<12xi32, #tpu.memory_space<smem>>
    %c0_i32 = arith.constant 0 : i32
    %8 = arith.cmpi eq, %arg1, %c0_i32 : i32
    %9 = arith.extui %8 : i1 to i32
    %c0_i32_0 = arith.constant 0 : i32
    %10 = arith.cmpi ne, %9, %c0_i32_0 : i32
    scf.if %10 {
      %cst_70 = arith.constant 0.000000e+00 : f32
      %143 = vector.broadcast %cst_70 : f32 to vector<4x8xf32>
      %c0_71 = arith.constant 0 : index
      %c0_72 = arith.constant 0 : index
      %144 = vector.load %arg9[%c0_71, %c0_72] : memref<4x8xf32, #tpu.memory_space<vmem>>, vector<4x8xf32>
      tpu.vector_store %arg9[%c0_71, %c0_72], %143 {strides = array<i32>} : memref<4x8xf32, #tpu.memory_space<vmem>>, vector<4x8xf32>,
    } else {
    }
    %cst = arith.constant 0.000000e+00 : f32
    %11 = vector.broadcast %cst : f32 to vector<3x4x256xf32>
    %c0 = arith.constant 0 : index
    %c0_1 = arith.constant 0 : index
    %c0_2 = arith.constant 0 : index
    %12 = vector.load %arg10[%c0, %c0_1, %c0_2] : memref<3x4x256xf32, #tpu.memory_space<vmem>>, vector<3x4x256xf32>
    tpu.vector_store %arg10[%c0, %c0_1, %c0_2], %11 {strides = array<i32>} : memref<3x4x256xf32, #tpu.memory_space<vmem>>, vector<3x4x256xf32>,
    %c0_i32_3 = arith.constant 0 : i32
    %13 = arith.cmpi sgt, %4, %c0_i32_3 : i32
    %c0_i32_4 = arith.constant 0 : i32
    %14 = arith.cmpi sgt, %1, %c0_i32_4 : i32
    %15 = arith.andi %13, %14 : i1
    %16 = arith.extui %15 : i1 to i32
    %c0_i32_5 = arith.constant 0 : i32
    %17 = arith.cmpi ne, %16, %c0_i32_5 : i32
    scf.if %17 {
      %c3_i32_70 = arith.constant 3 : i32
      %143 = arith.muli %arg1, %c3_i32_70 : i32
      %c0_i32_71 = arith.constant 0 : i32
      %144 = arith.addi %143, %c0_i32_71 : i32
      %c5_i32 = arith.constant 5 : i32
      %145 = arith.muli %144, %c5_i32 : i32
      %c0_i32_72 = arith.constant 0 : i32
      %146 = arith.addi %145, %c0_i32_72 : i32
      %147 = arith.index_cast %146 : i32 to index
      %148 = memref.load %arg3[%147] : memref<60xi32, #tpu.memory_space<smem>>
      %149 = arith.index_cast %148 : i32 to index
      %c0_73 = arith.constant 0 : index
      %c0_74 = arith.constant 0 : index
      %150 = vector.load %arg4[%149, %c0_73, %c0_74] : memref<5x4x128xf32, #tpu.memory_space<vmem>>, vector<1x4x128xf32>
      %151 = vector.shape_cast %150 : vector<1x4x128xf32> to vector<4x128xf32>
      %cst_75 = arith.constant 0.000000e+00 : f32
      %152 = vector.broadcast %cst_75 : f32 to vector<4x128xf32>
      %153 = arith.maximumf %151, %152 : vector<4x128xf32>
      %154 = arith.truncf %153 : vector<4x128xf32> to vector<4x128xbf16>
      %c0_i32_76 = arith.constant 0 : i32
      %155 = arith.addi %7, %c0_i32_76 : i32
      %156 = arith.index_cast %155 : i32 to index
      %c0_77 = arith.constant 0 : index
      %c0_78 = arith.constant 0 : index
      %157 = vector.load %arg5[%156, %c0_77, %c0_78] : memref<14x128x256xbf16, #tpu.memory_space<vmem>>, vector<1x128x256xbf16>
      %158 = vector.shape_cast %157 : vector<1x128x256xbf16> to vector<128x256xbf16>
      %c0_79 = arith.constant 0 : index
      %c0_80 = arith.constant 0 : index
      %c0_81 = arith.constant 0 : index
      %159 = vector.load %arg10[%c0_79, %c0_80, %c0_81] : memref<3x4x256xf32, #tpu.memory_space<vmem>>, vector<1x4x256xf32>
      %160 = vector.shape_cast %159 : vector<1x4x256xf32> to vector<4x256xf32>
      %cst_82 = arith.constant dense<0.000000e+00> : vector<4x256xf32>
      %161 = tpu.matmul %154, %158, %cst_82 {dimension_numbers = #tpu.dot_dimension_numbers<[1], [0], [0], [1], [0, 0, 1, 1], [], []>} : vector<4x128xbf16>, vector<128x256xbf16>, vector<4x256xf32> -> vector<4x256xf32>
      %162 = arith.addf %160, %161 : vector<4x256xf32>
      %c0_83 = arith.constant 0 : index
      %c0_84 = arith.constant 0 : index
      %c0_85 = arith.constant 0 : index
      %163 = vector.load %arg10[%c0_83, %c0_84, %c0_85] : memref<3x4x256xf32, #tpu.memory_space<vmem>>, vector<1x4x256xf32>
      %164 = vector.shape_cast %163 : vector<1x4x256xf32> to vector<4x256xf32>
      %165 = vector.shape_cast %162 : vector<4x256xf32> to vector<1x4x256xf32>
      tpu.vector_store %arg10[%c0_83, %c0_84, %c0_85], %165 {strides = array<i32>} : memref<3x4x256xf32, #tpu.memory_space<vmem>>, vector<1x4x256xf32>,
    } else {
    }
    %c0_i32_6 = arith.constant 0 : i32
    %18 = arith.cmpi sgt, %4, %c0_i32_6 : i32
    %c1_i32 = arith.constant 1 : i32
    %19 = arith.cmpi sgt, %1, %c1_i32 : i32
    %20 = arith.andi %18, %19 : i1
    %21 = arith.extui %20 : i1 to i32
    %c0_i32_7 = arith.constant 0 : i32
    %22 = arith.cmpi ne, %21, %c0_i32_7 : i32
    scf.if %22 {
      %c3_i32_70 = arith.constant 3 : i32
      %143 = arith.muli %arg1, %c3_i32_70 : i32
      %c1_i32_71 = arith.constant 1 : i32
      %144 = arith.addi %143, %c1_i32_71 : i32
      %c5_i32 = arith.constant 5 : i32
      %145 = arith.muli %144, %c5_i32 : i32
      %c0_i32_72 = arith.constant 0 : i32
      %146 = arith.addi %145, %c0_i32_72 : i32
      %147 = arith.index_cast %146 : i32 to index
      %148 = memref.load %arg3[%147] : memref<60xi32, #tpu.memory_space<smem>>
      %149 = arith.index_cast %148 : i32 to index
      %c0_73 = arith.constant 0 : index
      %c0_74 = arith.constant 0 : index
      %150 = vector.load %arg4[%149, %c0_73, %c0_74] : memref<5x4x128xf32, #tpu.memory_space<vmem>>, vector<1x4x128xf32>
      %151 = vector.shape_cast %150 : vector<1x4x128xf32> to vector<4x128xf32>
      %cst_75 = arith.constant 0.000000e+00 : f32
      %152 = vector.broadcast %cst_75 : f32 to vector<4x128xf32>
      %153 = arith.maximumf %151, %152 : vector<4x128xf32>
      %154 = arith.truncf %153 : vector<4x128xf32> to vector<4x128xbf16>
      %c0_i32_76 = arith.constant 0 : i32
      %155 = arith.addi %7, %c0_i32_76 : i32
      %156 = arith.index_cast %155 : i32 to index
      %c0_77 = arith.constant 0 : index
      %c0_78 = arith.constant 0 : index
      %157 = vector.load %arg5[%156, %c0_77, %c0_78] : memref<14x128x256xbf16, #tpu.memory_space<vmem>>, vector<1x128x256xbf16>
      %158 = vector.shape_cast %157 : vector<1x128x256xbf16> to vector<128x256xbf16>
      %c1_79 = arith.constant 1 : index
      %c0_80 = arith.constant 0 : index
      %c0_81 = arith.constant 0 : index
      %159 = vector.load %arg10[%c1_79, %c0_80, %c0_81] : memref<3x4x256xf32, #tpu.memory_space<vmem>>, vector<1x4x256xf32>
      %160 = vector.shape_cast %159 : vector<1x4x256xf32> to vector<4x256xf32>
      %cst_82 = arith.constant dense<0.000000e+00> : vector<4x256xf32>
      %161 = tpu.matmul %154, %158, %cst_82 {dimension_numbers = #tpu.dot_dimension_numbers<[1], [0], [0], [1], [0, 0, 1, 1], [], []>} : vector<4x128xbf16>, vector<128x256xbf16>, vector<4x256xf32> -> vector<4x256xf32>
      %162 = arith.addf %160, %161 : vector<4x256xf32>
      %c1_83 = arith.constant 1 : index
      %c0_84 = arith.constant 0 : index
      %c0_85 = arith.constant 0 : index
      %163 = vector.load %arg10[%c1_83, %c0_84, %c0_85] : memref<3x4x256xf32, #tpu.memory_space<vmem>>, vector<1x4x256xf32>
      %164 = vector.shape_cast %163 : vector<1x4x256xf32> to vector<4x256xf32>
      %165 = vector.shape_cast %162 : vector<4x256xf32> to vector<1x4x256xf32>
      tpu.vector_store %arg10[%c1_83, %c0_84, %c0_85], %165 {strides = array<i32>} : memref<3x4x256xf32, #tpu.memory_space<vmem>>, vector<1x4x256xf32>,
    } else {
    }
    %c0_i32_8 = arith.constant 0 : i32
    %23 = arith.cmpi sgt, %4, %c0_i32_8 : i32
    %c2_i32 = arith.constant 2 : i32
    %24 = arith.cmpi sgt, %1, %c2_i32 : i32
    %25 = arith.andi %23, %24 : i1
    %26 = arith.extui %25 : i1 to i32
    %c0_i32_9 = arith.constant 0 : i32
    %27 = arith.cmpi ne, %26, %c0_i32_9 : i32
    scf.if %27 {
      %c3_i32_70 = arith.constant 3 : i32
      %143 = arith.muli %arg1, %c3_i32_70 : i32
      %c2_i32_71 = arith.constant 2 : i32
      %144 = arith.addi %143, %c2_i32_71 : i32
      %c5_i32 = arith.constant 5 : i32
      %145 = arith.muli %144, %c5_i32 : i32
      %c0_i32_72 = arith.constant 0 : i32
      %146 = arith.addi %145, %c0_i32_72 : i32
      %147 = arith.index_cast %146 : i32 to index
      %148 = memref.load %arg3[%147] : memref<60xi32, #tpu.memory_space<smem>>
      %149 = arith.index_cast %148 : i32 to index
      %c0_73 = arith.constant 0 : index
      %c0_74 = arith.constant 0 : index
      %150 = vector.load %arg4[%149, %c0_73, %c0_74] : memref<5x4x128xf32, #tpu.memory_space<vmem>>, vector<1x4x128xf32>
      %151 = vector.shape_cast %150 : vector<1x4x128xf32> to vector<4x128xf32>
      %cst_75 = arith.constant 0.000000e+00 : f32
      %152 = vector.broadcast %cst_75 : f32 to vector<4x128xf32>
      %153 = arith.maximumf %151, %152 : vector<4x128xf32>
      %154 = arith.truncf %153 : vector<4x128xf32> to vector<4x128xbf16>
      %c0_i32_76 = arith.constant 0 : i32
      %155 = arith.addi %7, %c0_i32_76 : i32
      %156 = arith.index_cast %155 : i32 to index
      %c0_77 = arith.constant 0 : index
      %c0_78 = arith.constant 0 : index
      %157 = vector.load %arg5[%156, %c0_77, %c0_78] : memref<14x128x256xbf16, #tpu.memory_space<vmem>>, vector<1x128x256xbf16>
      %158 = vector.shape_cast %157 : vector<1x128x256xbf16> to vector<128x256xbf16>
      %c2_79 = arith.constant 2 : index
      %c0_80 = arith.constant 0 : index
      %c0_81 = arith.constant 0 : index
      %159 = vector.load %arg10[%c2_79, %c0_80, %c0_81] : memref<3x4x256xf32, #tpu.memory_space<vmem>>, vector<1x4x256xf32>
      %160 = vector.shape_cast %159 : vector<1x4x256xf32> to vector<4x256xf32>
      %cst_82 = arith.constant dense<0.000000e+00> : vector<4x256xf32>
      %161 = tpu.matmul %154, %158, %cst_82 {dimension_numbers = #tpu.dot_dimension_numbers<[1], [0], [0], [1], [0, 0, 1, 1], [], []>} : vector<4x128xbf16>, vector<128x256xbf16>, vector<4x256xf32> -> vector<4x256xf32>
      %162 = arith.addf %160, %161 : vector<4x256xf32>
      %c2_83 = arith.constant 2 : index
      %c0_84 = arith.constant 0 : index
      %c0_85 = arith.constant 0 : index
      %163 = vector.load %arg10[%c2_83, %c0_84, %c0_85] : memref<3x4x256xf32, #tpu.memory_space<vmem>>, vector<1x4x256xf32>
      %164 = vector.shape_cast %163 : vector<1x4x256xf32> to vector<4x256xf32>
      %165 = vector.shape_cast %162 : vector<4x256xf32> to vector<1x4x256xf32>
      tpu.vector_store %arg10[%c2_83, %c0_84, %c0_85], %165 {strides = array<i32>} : memref<3x4x256xf32, #tpu.memory_space<vmem>>, vector<1x4x256xf32>,
    } else {
    }
    %c1_i32_10 = arith.constant 1 : i32
    %28 = arith.cmpi sgt, %4, %c1_i32_10 : i32
    %c0_i32_11 = arith.constant 0 : i32
    %29 = arith.cmpi sgt, %1, %c0_i32_11 : i32
    %30 = arith.andi %28, %29 : i1
    %31 = arith.extui %30 : i1 to i32
    %c0_i32_12 = arith.constant 0 : i32
    %32 = arith.cmpi ne, %31, %c0_i32_12 : i32
    scf.if %32 {
      %c3_i32_70 = arith.constant 3 : i32
      %143 = arith.muli %arg1, %c3_i32_70 : i32
      %c0_i32_71 = arith.constant 0 : i32
      %144 = arith.addi %143, %c0_i32_71 : i32
      %c5_i32 = arith.constant 5 : i32
      %145 = arith.muli %144, %c5_i32 : i32
      %c1_i32_72 = arith.constant 1 : i32
      %146 = arith.addi %145, %c1_i32_72 : i32
      %147 = arith.index_cast %146 : i32 to index
      %148 = memref.load %arg3[%147] : memref<60xi32, #tpu.memory_space<smem>>
      %149 = arith.index_cast %148 : i32 to index
      %c0_73 = arith.constant 0 : index
      %c0_74 = arith.constant 0 : index
      %150 = vector.load %arg4[%149, %c0_73, %c0_74] : memref<5x4x128xf32, #tpu.memory_space<vmem>>, vector<1x4x128xf32>
      %151 = vector.shape_cast %150 : vector<1x4x128xf32> to vector<4x128xf32>
      %cst_75 = arith.constant 0.000000e+00 : f32
      %152 = vector.broadcast %cst_75 : f32 to vector<4x128xf32>
      %153 = arith.maximumf %151, %152 : vector<4x128xf32>
      %154 = arith.truncf %153 : vector<4x128xf32> to vector<4x128xbf16>
      %c1_i32_76 = arith.constant 1 : i32
      %155 = arith.addi %7, %c1_i32_76 : i32
      %156 = arith.index_cast %155 : i32 to index
      %c0_77 = arith.constant 0 : index
      %c0_78 = arith.constant 0 : index
      %157 = vector.load %arg5[%156, %c0_77, %c0_78] : memref<14x128x256xbf16, #tpu.memory_space<vmem>>, vector<1x128x256xbf16>
      %158 = vector.shape_cast %157 : vector<1x128x256xbf16> to vector<128x256xbf16>
      %c0_79 = arith.constant 0 : index
      %c0_80 = arith.constant 0 : index
      %c0_81 = arith.constant 0 : index
      %159 = vector.load %arg10[%c0_79, %c0_80, %c0_81] : memref<3x4x256xf32, #tpu.memory_space<vmem>>, vector<1x4x256xf32>
      %160 = vector.shape_cast %159 : vector<1x4x256xf32> to vector<4x256xf32>
      %cst_82 = arith.constant dense<0.000000e+00> : vector<4x256xf32>
      %161 = tpu.matmul %154, %158, %cst_82 {dimension_numbers = #tpu.dot_dimension_numbers<[1], [0], [0], [1], [0, 0, 1, 1], [], []>} : vector<4x128xbf16>, vector<128x256xbf16>, vector<4x256xf32> -> vector<4x256xf32>
      %162 = arith.addf %160, %161 : vector<4x256xf32>
      %c0_83 = arith.constant 0 : index
      %c0_84 = arith.constant 0 : index
      %c0_85 = arith.constant 0 : index
      %163 = vector.load %arg10[%c0_83, %c0_84, %c0_85] : memref<3x4x256xf32, #tpu.memory_space<vmem>>, vector<1x4x256xf32>
      %164 = vector.shape_cast %163 : vector<1x4x256xf32> to vector<4x256xf32>
      %165 = vector.shape_cast %162 : vector<4x256xf32> to vector<1x4x256xf32>
      tpu.vector_store %arg10[%c0_83, %c0_84, %c0_85], %165 {strides = array<i32>} : memref<3x4x256xf32, #tpu.memory_space<vmem>>, vector<1x4x256xf32>,
    } else {
    }
    %c1_i32_13 = arith.constant 1 : i32
    %33 = arith.cmpi sgt, %4, %c1_i32_13 : i32
    %c1_i32_14 = arith.constant 1 : i32
    %34 = arith.cmpi sgt, %1, %c1_i32_14 : i32
    %35 = arith.andi %33, %34 : i1
    %36 = arith.extui %35 : i1 to i32
    %c0_i32_15 = arith.constant 0 : i32
    %37 = arith.cmpi ne, %36, %c0_i32_15 : i32
    scf.if %37 {
      %c3_i32_70 = arith.constant 3 : i32
      %143 = arith.muli %arg1, %c3_i32_70 : i32
      %c1_i32_71 = arith.constant 1 : i32
      %144 = arith.addi %143, %c1_i32_71 : i32
      %c5_i32 = arith.constant 5 : i32
      %145 = arith.muli %144, %c5_i32 : i32
      %c1_i32_72 = arith.constant 1 : i32
      %146 = arith.addi %145, %c1_i32_72 : i32
      %147 = arith.index_cast %146 : i32 to index
      %148 = memref.load %arg3[%147] : memref<60xi32, #tpu.memory_space<smem>>
      %149 = arith.index_cast %148 : i32 to index
      %c0_73 = arith.constant 0 : index
      %c0_74 = arith.constant 0 : index
      %150 = vector.load %arg4[%149, %c0_73, %c0_74] : memref<5x4x128xf32, #tpu.memory_space<vmem>>, vector<1x4x128xf32>
      %151 = vector.shape_cast %150 : vector<1x4x128xf32> to vector<4x128xf32>
      %cst_75 = arith.constant 0.000000e+00 : f32
      %152 = vector.broadcast %cst_75 : f32 to vector<4x128xf32>
      %153 = arith.maximumf %151, %152 : vector<4x128xf32>
      %154 = arith.truncf %153 : vector<4x128xf32> to vector<4x128xbf16>
      %c1_i32_76 = arith.constant 1 : i32
      %155 = arith.addi %7, %c1_i32_76 : i32
      %156 = arith.index_cast %155 : i32 to index
      %c0_77 = arith.constant 0 : index
      %c0_78 = arith.constant 0 : index
      %157 = vector.load %arg5[%156, %c0_77, %c0_78] : memref<14x128x256xbf16, #tpu.memory_space<vmem>>, vector<1x128x256xbf16>
      %158 = vector.shape_cast %157 : vector<1x128x256xbf16> to vector<128x256xbf16>
      %c1_79 = arith.constant 1 : index
      %c0_80 = arith.constant 0 : index
      %c0_81 = arith.constant 0 : index
      %159 = vector.load %arg10[%c1_79, %c0_80, %c0_81] : memref<3x4x256xf32, #tpu.memory_space<vmem>>, vector<1x4x256xf32>
      %160 = vector.shape_cast %159 : vector<1x4x256xf32> to vector<4x256xf32>
      %cst_82 = arith.constant dense<0.000000e+00> : vector<4x256xf32>
      %161 = tpu.matmul %154, %158, %cst_82 {dimension_numbers = #tpu.dot_dimension_numbers<[1], [0], [0], [1], [0, 0, 1, 1], [], []>} : vector<4x128xbf16>, vector<128x256xbf16>, vector<4x256xf32> -> vector<4x256xf32>
      %162 = arith.addf %160, %161 : vector<4x256xf32>
      %c1_83 = arith.constant 1 : index
      %c0_84 = arith.constant 0 : index
      %c0_85 = arith.constant 0 : index
      %163 = vector.load %arg10[%c1_83, %c0_84, %c0_85] : memref<3x4x256xf32, #tpu.memory_space<vmem>>, vector<1x4x256xf32>
      %164 = vector.shape_cast %163 : vector<1x4x256xf32> to vector<4x256xf32>
      %165 = vector.shape_cast %162 : vector<4x256xf32> to vector<1x4x256xf32>
      tpu.vector_store %arg10[%c1_83, %c0_84, %c0_85], %165 {strides = array<i32>} : memref<3x4x256xf32, #tpu.memory_space<vmem>>, vector<1x4x256xf32>,
    } else {
    }
    %c1_i32_16 = arith.constant 1 : i32
    %38 = arith.cmpi sgt, %4, %c1_i32_16 : i32
    %c2_i32_17 = arith.constant 2 : i32
    %39 = arith.cmpi sgt, %1, %c2_i32_17 : i32
    %40 = arith.andi %38, %39 : i1
    %41 = arith.extui %40 : i1 to i32
    %c0_i32_18 = arith.constant 0 : i32
    %42 = arith.cmpi ne, %41, %c0_i32_18 : i32
    scf.if %42 {
      %c3_i32_70 = arith.constant 3 : i32
      %143 = arith.muli %arg1, %c3_i32_70 : i32
      %c2_i32_71 = arith.constant 2 : i32
      %144 = arith.addi %143, %c2_i32_71 : i32
      %c5_i32 = arith.constant 5 : i32
      %145 = arith.muli %144, %c5_i32 : i32
      %c1_i32_72 = arith.constant 1 : i32
      %146 = arith.addi %145, %c1_i32_72 : i32
      %147 = arith.index_cast %146 : i32 to index
      %148 = memref.load %arg3[%147] : memref<60xi32, #tpu.memory_space<smem>>
      %149 = arith.index_cast %148 : i32 to index
      %c0_73 = arith.constant 0 : index
      %c0_74 = arith.constant 0 : index
      %150 = vector.load %arg4[%149, %c0_73, %c0_74] : memref<5x4x128xf32, #tpu.memory_space<vmem>>, vector<1x4x128xf32>
      %151 = vector.shape_cast %150 : vector<1x4x128xf32> to vector<4x128xf32>
      %cst_75 = arith.constant 0.000000e+00 : f32
      %152 = vector.broadcast %cst_75 : f32 to vector<4x128xf32>
      %153 = arith.maximumf %151, %152 : vector<4x128xf32>
      %154 = arith.truncf %153 : vector<4x128xf32> to vector<4x128xbf16>
      %c1_i32_76 = arith.constant 1 : i32
      %155 = arith.addi %7, %c1_i32_76 : i32
      %156 = arith.index_cast %155 : i32 to index
      %c0_77 = arith.constant 0 : index
      %c0_78 = arith.constant 0 : index
      %157 = vector.load %arg5[%156, %c0_77, %c0_78] : memref<14x128x256xbf16, #tpu.memory_space<vmem>>, vector<1x128x256xbf16>
      %158 = vector.shape_cast %157 : vector<1x128x256xbf16> to vector<128x256xbf16>
      %c2_79 = arith.constant 2 : index
      %c0_80 = arith.constant 0 : index
      %c0_81 = arith.constant 0 : index
      %159 = vector.load %arg10[%c2_79, %c0_80, %c0_81] : memref<3x4x256xf32, #tpu.memory_space<vmem>>, vector<1x4x256xf32>
      %160 = vector.shape_cast %159 : vector<1x4x256xf32> to vector<4x256xf32>
      %cst_82 = arith.constant dense<0.000000e+00> : vector<4x256xf32>
      %161 = tpu.matmul %154, %158, %cst_82 {dimension_numbers = #tpu.dot_dimension_numbers<[1], [0], [0], [1], [0, 0, 1, 1], [], []>} : vector<4x128xbf16>, vector<128x256xbf16>, vector<4x256xf32> -> vector<4x256xf32>
      %162 = arith.addf %160, %161 : vector<4x256xf32>
      %c2_83 = arith.constant 2 : index
      %c0_84 = arith.constant 0 : index
      %c0_85 = arith.constant 0 : index
      %163 = vector.load %arg10[%c2_83, %c0_84, %c0_85] : memref<3x4x256xf32, #tpu.memory_space<vmem>>, vector<1x4x256xf32>
      %164 = vector.shape_cast %163 : vector<1x4x256xf32> to vector<4x256xf32>
      %165 = vector.shape_cast %162 : vector<4x256xf32> to vector<1x4x256xf32>
      tpu.vector_store %arg10[%c2_83, %c0_84, %c0_85], %165 {strides = array<i32>} : memref<3x4x256xf32, #tpu.memory_space<vmem>>, vector<1x4x256xf32>,
    } else {
    }
    %c2_i32_19 = arith.constant 2 : i32
    %43 = arith.cmpi sgt, %4, %c2_i32_19 : i32
    %c0_i32_20 = arith.constant 0 : i32
    %44 = arith.cmpi sgt, %1, %c0_i32_20 : i32
    %45 = arith.andi %43, %44 : i1
    %46 = arith.extui %45 : i1 to i32
    %c0_i32_21 = arith.constant 0 : i32
    %47 = arith.cmpi ne, %46, %c0_i32_21 : i32
    scf.if %47 {
      %c3_i32_70 = arith.constant 3 : i32
      %143 = arith.muli %arg1, %c3_i32_70 : i32
      %c0_i32_71 = arith.constant 0 : i32
      %144 = arith.addi %143, %c0_i32_71 : i32
      %c5_i32 = arith.constant 5 : i32
      %145 = arith.muli %144, %c5_i32 : i32
      %c2_i32_72 = arith.constant 2 : i32
      %146 = arith.addi %145, %c2_i32_72 : i32
      %147 = arith.index_cast %146 : i32 to index
      %148 = memref.load %arg3[%147] : memref<60xi32, #tpu.memory_space<smem>>
      %149 = arith.index_cast %148 : i32 to index
      %c0_73 = arith.constant 0 : index
      %c0_74 = arith.constant 0 : index
      %150 = vector.load %arg4[%149, %c0_73, %c0_74] : memref<5x4x128xf32, #tpu.memory_space<vmem>>, vector<1x4x128xf32>
      %151 = vector.shape_cast %150 : vector<1x4x128xf32> to vector<4x128xf32>
      %cst_75 = arith.constant 0.000000e+00 : f32
      %152 = vector.broadcast %cst_75 : f32 to vector<4x128xf32>
      %153 = arith.maximumf %151, %152 : vector<4x128xf32>
      %154 = arith.truncf %153 : vector<4x128xf32> to vector<4x128xbf16>
      %c2_i32_76 = arith.constant 2 : i32
      %155 = arith.addi %7, %c2_i32_76 : i32
      %156 = arith.index_cast %155 : i32 to index
      %c0_77 = arith.constant 0 : index
      %c0_78 = arith.constant 0 : index
      %157 = vector.load %arg5[%156, %c0_77, %c0_78] : memref<14x128x256xbf16, #tpu.memory_space<vmem>>, vector<1x128x256xbf16>
      %158 = vector.shape_cast %157 : vector<1x128x256xbf16> to vector<128x256xbf16>
      %c0_79 = arith.constant 0 : index
      %c0_80 = arith.constant 0 : index
      %c0_81 = arith.constant 0 : index
      %159 = vector.load %arg10[%c0_79, %c0_80, %c0_81] : memref<3x4x256xf32, #tpu.memory_space<vmem>>, vector<1x4x256xf32>
      %160 = vector.shape_cast %159 : vector<1x4x256xf32> to vector<4x256xf32>
      %cst_82 = arith.constant dense<0.000000e+00> : vector<4x256xf32>
      %161 = tpu.matmul %154, %158, %cst_82 {dimension_numbers = #tpu.dot_dimension_numbers<[1], [0], [0], [1], [0, 0, 1, 1], [], []>} : vector<4x128xbf16>, vector<128x256xbf16>, vector<4x256xf32> -> vector<4x256xf32>
      %162 = arith.addf %160, %161 : vector<4x256xf32>
      %c0_83 = arith.constant 0 : index
      %c0_84 = arith.constant 0 : index
      %c0_85 = arith.constant 0 : index
      %163 = vector.load %arg10[%c0_83, %c0_84, %c0_85] : memref<3x4x256xf32, #tpu.memory_space<vmem>>, vector<1x4x256xf32>
      %164 = vector.shape_cast %163 : vector<1x4x256xf32> to vector<4x256xf32>
      %165 = vector.shape_cast %162 : vector<4x256xf32> to vector<1x4x256xf32>
      tpu.vector_store %arg10[%c0_83, %c0_84, %c0_85], %165 {strides = array<i32>} : memref<3x4x256xf32, #tpu.memory_space<vmem>>, vector<1x4x256xf32>,
    } else {
    }
    %c2_i32_22 = arith.constant 2 : i32
    %48 = arith.cmpi sgt, %4, %c2_i32_22 : i32
    %c1_i32_23 = arith.constant 1 : i32
    %49 = arith.cmpi sgt, %1, %c1_i32_23 : i32
    %50 = arith.andi %48, %49 : i1
    %51 = arith.extui %50 : i1 to i32
    %c0_i32_24 = arith.constant 0 : i32
    %52 = arith.cmpi ne, %51, %c0_i32_24 : i32
    scf.if %52 {
      %c3_i32_70 = arith.constant 3 : i32
      %143 = arith.muli %arg1, %c3_i32_70 : i32
      %c1_i32_71 = arith.constant 1 : i32
      %144 = arith.addi %143, %c1_i32_71 : i32
      %c5_i32 = arith.constant 5 : i32
      %145 = arith.muli %144, %c5_i32 : i32
      %c2_i32_72 = arith.constant 2 : i32
      %146 = arith.addi %145, %c2_i32_72 : i32
      %147 = arith.index_cast %146 : i32 to index
      %148 = memref.load %arg3[%147] : memref<60xi32, #tpu.memory_space<smem>>
      %149 = arith.index_cast %148 : i32 to index
      %c0_73 = arith.constant 0 : index
      %c0_74 = arith.constant 0 : index
      %150 = vector.load %arg4[%149, %c0_73, %c0_74] : memref<5x4x128xf32, #tpu.memory_space<vmem>>, vector<1x4x128xf32>
      %151 = vector.shape_cast %150 : vector<1x4x128xf32> to vector<4x128xf32>
      %cst_75 = arith.constant 0.000000e+00 : f32
      %152 = vector.broadcast %cst_75 : f32 to vector<4x128xf32>
      %153 = arith.maximumf %151, %152 : vector<4x128xf32>
      %154 = arith.truncf %153 : vector<4x128xf32> to vector<4x128xbf16>
      %c2_i32_76 = arith.constant 2 : i32
      %155 = arith.addi %7, %c2_i32_76 : i32
      %156 = arith.index_cast %155 : i32 to index
      %c0_77 = arith.constant 0 : index
      %c0_78 = arith.constant 0 : index
      %157 = vector.load %arg5[%156, %c0_77, %c0_78] : memref<14x128x256xbf16, #tpu.memory_space<vmem>>, vector<1x128x256xbf16>
      %158 = vector.shape_cast %157 : vector<1x128x256xbf16> to vector<128x256xbf16>
      %c1_79 = arith.constant 1 : index
      %c0_80 = arith.constant 0 : index
      %c0_81 = arith.constant 0 : index
      %159 = vector.load %arg10[%c1_79, %c0_80, %c0_81] : memref<3x4x256xf32, #tpu.memory_space<vmem>>, vector<1x4x256xf32>
      %160 = vector.shape_cast %159 : vector<1x4x256xf32> to vector<4x256xf32>
      %cst_82 = arith.constant dense<0.000000e+00> : vector<4x256xf32>
      %161 = tpu.matmul %154, %158, %cst_82 {dimension_numbers = #tpu.dot_dimension_numbers<[1], [0], [0], [1], [0, 0, 1, 1], [], []>} : vector<4x128xbf16>, vector<128x256xbf16>, vector<4x256xf32> -> vector<4x256xf32>
      %162 = arith.addf %160, %161 : vector<4x256xf32>
      %c1_83 = arith.constant 1 : index
      %c0_84 = arith.constant 0 : index
      %c0_85 = arith.constant 0 : index
      %163 = vector.load %arg10[%c1_83, %c0_84, %c0_85] : memref<3x4x256xf32, #tpu.memory_space<vmem>>, vector<1x4x256xf32>
      %164 = vector.shape_cast %163 : vector<1x4x256xf32> to vector<4x256xf32>
      %165 = vector.shape_cast %162 : vector<4x256xf32> to vector<1x4x256xf32>
      tpu.vector_store %arg10[%c1_83, %c0_84, %c0_85], %165 {strides = array<i32>} : memref<3x4x256xf32, #tpu.memory_space<vmem>>, vector<1x4x256xf32>,
    } else {
    }
    %c2_i32_25 = arith.constant 2 : i32
    %53 = arith.cmpi sgt, %4, %c2_i32_25 : i32
    %c2_i32_26 = arith.constant 2 : i32
    %54 = arith.cmpi sgt, %1, %c2_i32_26 : i32
    %55 = arith.andi %53, %54 : i1
    %56 = arith.extui %55 : i1 to i32
    %c0_i32_27 = arith.constant 0 : i32
    %57 = arith.cmpi ne, %56, %c0_i32_27 : i32
    scf.if %57 {
      %c3_i32_70 = arith.constant 3 : i32
      %143 = arith.muli %arg1, %c3_i32_70 : i32
      %c2_i32_71 = arith.constant 2 : i32
      %144 = arith.addi %143, %c2_i32_71 : i32
      %c5_i32 = arith.constant 5 : i32
      %145 = arith.muli %144, %c5_i32 : i32
      %c2_i32_72 = arith.constant 2 : i32
      %146 = arith.addi %145, %c2_i32_72 : i32
      %147 = arith.index_cast %146 : i32 to index
      %148 = memref.load %arg3[%147] : memref<60xi32, #tpu.memory_space<smem>>
      %149 = arith.index_cast %148 : i32 to index
      %c0_73 = arith.constant 0 : index
      %c0_74 = arith.constant 0 : index
      %150 = vector.load %arg4[%149, %c0_73, %c0_74] : memref<5x4x128xf32, #tpu.memory_space<vmem>>, vector<1x4x128xf32>
      %151 = vector.shape_cast %150 : vector<1x4x128xf32> to vector<4x128xf32>
      %cst_75 = arith.constant 0.000000e+00 : f32
      %152 = vector.broadcast %cst_75 : f32 to vector<4x128xf32>
      %153 = arith.maximumf %151, %152 : vector<4x128xf32>
      %154 = arith.truncf %153 : vector<4x128xf32> to vector<4x128xbf16>
      %c2_i32_76 = arith.constant 2 : i32
      %155 = arith.addi %7, %c2_i32_76 : i32
      %156 = arith.index_cast %155 : i32 to index
      %c0_77 = arith.constant 0 : index
      %c0_78 = arith.constant 0 : index
      %157 = vector.load %arg5[%156, %c0_77, %c0_78] : memref<14x128x256xbf16, #tpu.memory_space<vmem>>, vector<1x128x256xbf16>
      %158 = vector.shape_cast %157 : vector<1x128x256xbf16> to vector<128x256xbf16>
      %c2_79 = arith.constant 2 : index
      %c0_80 = arith.constant 0 : index
      %c0_81 = arith.constant 0 : index
      %159 = vector.load %arg10[%c2_79, %c0_80, %c0_81] : memref<3x4x256xf32, #tpu.memory_space<vmem>>, vector<1x4x256xf32>
      %160 = vector.shape_cast %159 : vector<1x4x256xf32> to vector<4x256xf32>
      %cst_82 = arith.constant dense<0.000000e+00> : vector<4x256xf32>
      %161 = tpu.matmul %154, %158, %cst_82 {dimension_numbers = #tpu.dot_dimension_numbers<[1], [0], [0], [1], [0, 0, 1, 1], [], []>} : vector<4x128xbf16>, vector<128x256xbf16>, vector<4x256xf32> -> vector<4x256xf32>
      %162 = arith.addf %160, %161 : vector<4x256xf32>
      %c2_83 = arith.constant 2 : index
      %c0_84 = arith.constant 0 : index
      %c0_85 = arith.constant 0 : index
      %163 = vector.load %arg10[%c2_83, %c0_84, %c0_85] : memref<3x4x256xf32, #tpu.memory_space<vmem>>, vector<1x4x256xf32>
      %164 = vector.shape_cast %163 : vector<1x4x256xf32> to vector<4x256xf32>
      %165 = vector.shape_cast %162 : vector<4x256xf32> to vector<1x4x256xf32>
      tpu.vector_store %arg10[%c2_83, %c0_84, %c0_85], %165 {strides = array<i32>} : memref<3x4x256xf32, #tpu.memory_space<vmem>>, vector<1x4x256xf32>,
    } else {
    }
    %c3_i32 = arith.constant 3 : i32
    %58 = arith.cmpi sgt, %4, %c3_i32 : i32
    %c0_i32_28 = arith.constant 0 : i32
    %59 = arith.cmpi sgt, %1, %c0_i32_28 : i32
    %60 = arith.andi %58, %59 : i1
    %61 = arith.extui %60 : i1 to i32
    %c0_i32_29 = arith.constant 0 : i32
    %62 = arith.cmpi ne, %61, %c0_i32_29 : i32
    scf.if %62 {
      %c3_i32_70 = arith.constant 3 : i32
      %143 = arith.muli %arg1, %c3_i32_70 : i32
      %c0_i32_71 = arith.constant 0 : i32
      %144 = arith.addi %143, %c0_i32_71 : i32
      %c5_i32 = arith.constant 5 : i32
      %145 = arith.muli %144, %c5_i32 : i32
      %c3_i32_72 = arith.constant 3 : i32
      %146 = arith.addi %145, %c3_i32_72 : i32
      %147 = arith.index_cast %146 : i32 to index
      %148 = memref.load %arg3[%147] : memref<60xi32, #tpu.memory_space<smem>>
      %149 = arith.index_cast %148 : i32 to index
      %c0_73 = arith.constant 0 : index
      %c0_74 = arith.constant 0 : index
      %150 = vector.load %arg4[%149, %c0_73, %c0_74] : memref<5x4x128xf32, #tpu.memory_space<vmem>>, vector<1x4x128xf32>
      %151 = vector.shape_cast %150 : vector<1x4x128xf32> to vector<4x128xf32>
      %cst_75 = arith.constant 0.000000e+00 : f32
      %152 = vector.broadcast %cst_75 : f32 to vector<4x128xf32>
      %153 = arith.maximumf %151, %152 : vector<4x128xf32>
      %154 = arith.truncf %153 : vector<4x128xf32> to vector<4x128xbf16>
      %c3_i32_76 = arith.constant 3 : i32
      %155 = arith.addi %7, %c3_i32_76 : i32
      %156 = arith.index_cast %155 : i32 to index
      %c0_77 = arith.constant 0 : index
      %c0_78 = arith.constant 0 : index
      %157 = vector.load %arg5[%156, %c0_77, %c0_78] : memref<14x128x256xbf16, #tpu.memory_space<vmem>>, vector<1x128x256xbf16>
      %158 = vector.shape_cast %157 : vector<1x128x256xbf16> to vector<128x256xbf16>
      %c0_79 = arith.constant 0 : index
      %c0_80 = arith.constant 0 : index
      %c0_81 = arith.constant 0 : index
      %159 = vector.load %arg10[%c0_79, %c0_80, %c0_81] : memref<3x4x256xf32, #tpu.memory_space<vmem>>, vector<1x4x256xf32>
      %160 = vector.shape_cast %159 : vector<1x4x256xf32> to vector<4x256xf32>
      %cst_82 = arith.constant dense<0.000000e+00> : vector<4x256xf32>
      %161 = tpu.matmul %154, %158, %cst_82 {dimension_numbers = #tpu.dot_dimension_numbers<[1], [0], [0], [1], [0, 0, 1, 1], [], []>} : vector<4x128xbf16>, vector<128x256xbf16>, vector<4x256xf32> -> vector<4x256xf32>
      %162 = arith.addf %160, %161 : vector<4x256xf32>
      %c0_83 = arith.constant 0 : index
      %c0_84 = arith.constant 0 : index
      %c0_85 = arith.constant 0 : index
      %163 = vector.load %arg10[%c0_83, %c0_84, %c0_85] : memref<3x4x256xf32, #tpu.memory_space<vmem>>, vector<1x4x256xf32>
      %164 = vector.shape_cast %163 : vector<1x4x256xf32> to vector<4x256xf32>
      %165 = vector.shape_cast %162 : vector<4x256xf32> to vector<1x4x256xf32>
      tpu.vector_store %arg10[%c0_83, %c0_84, %c0_85], %165 {strides = array<i32>} : memref<3x4x256xf32, #tpu.memory_space<vmem>>, vector<1x4x256xf32>,
    } else {
    }
    %c3_i32_30 = arith.constant 3 : i32
    %63 = arith.cmpi sgt, %4, %c3_i32_30 : i32
    %c1_i32_31 = arith.constant 1 : i32
    %64 = arith.cmpi sgt, %1, %c1_i32_31 : i32
    %65 = arith.andi %63, %64 : i1
    %66 = arith.extui %65 : i1 to i32
    %c0_i32_32 = arith.constant 0 : i32
    %67 = arith.cmpi ne, %66, %c0_i32_32 : i32
    scf.if %67 {
      %c3_i32_70 = arith.constant 3 : i32
      %143 = arith.muli %arg1, %c3_i32_70 : i32
      %c1_i32_71 = arith.constant 1 : i32
      %144 = arith.addi %143, %c1_i32_71 : i32
      %c5_i32 = arith.constant 5 : i32
      %145 = arith.muli %144, %c5_i32 : i32
      %c3_i32_72 = arith.constant 3 : i32
      %146 = arith.addi %145, %c3_i32_72 : i32
      %147 = arith.index_cast %146 : i32 to index
      %148 = memref.load %arg3[%147] : memref<60xi32, #tpu.memory_space<smem>>
      %149 = arith.index_cast %148 : i32 to index
      %c0_73 = arith.constant 0 : index
      %c0_74 = arith.constant 0 : index
      %150 = vector.load %arg4[%149, %c0_73, %c0_74] : memref<5x4x128xf32, #tpu.memory_space<vmem>>, vector<1x4x128xf32>
      %151 = vector.shape_cast %150 : vector<1x4x128xf32> to vector<4x128xf32>
      %cst_75 = arith.constant 0.000000e+00 : f32
      %152 = vector.broadcast %cst_75 : f32 to vector<4x128xf32>
      %153 = arith.maximumf %151, %152 : vector<4x128xf32>
      %154 = arith.truncf %153 : vector<4x128xf32> to vector<4x128xbf16>
      %c3_i32_76 = arith.constant 3 : i32
      %155 = arith.addi %7, %c3_i32_76 : i32
      %156 = arith.index_cast %155 : i32 to index
      %c0_77 = arith.constant 0 : index
      %c0_78 = arith.constant 0 : index
      %157 = vector.load %arg5[%156, %c0_77, %c0_78] : memref<14x128x256xbf16, #tpu.memory_space<vmem>>, vector<1x128x256xbf16>
      %158 = vector.shape_cast %157 : vector<1x128x256xbf16> to vector<128x256xbf16>
      %c1_79 = arith.constant 1 : index
      %c0_80 = arith.constant 0 : index
      %c0_81 = arith.constant 0 : index
      %159 = vector.load %arg10[%c1_79, %c0_80, %c0_81] : memref<3x4x256xf32, #tpu.memory_space<vmem>>, vector<1x4x256xf32>
      %160 = vector.shape_cast %159 : vector<1x4x256xf32> to vector<4x256xf32>
      %cst_82 = arith.constant dense<0.000000e+00> : vector<4x256xf32>
      %161 = tpu.matmul %154, %158, %cst_82 {dimension_numbers = #tpu.dot_dimension_numbers<[1], [0], [0], [1], [0, 0, 1, 1], [], []>} : vector<4x128xbf16>, vector<128x256xbf16>, vector<4x256xf32> -> vector<4x256xf32>
      %162 = arith.addf %160, %161 : vector<4x256xf32>
      %c1_83 = arith.constant 1 : index
      %c0_84 = arith.constant 0 : index
      %c0_85 = arith.constant 0 : index
      %163 = vector.load %arg10[%c1_83, %c0_84, %c0_85] : memref<3x4x256xf32, #tpu.memory_space<vmem>>, vector<1x4x256xf32>
      %164 = vector.shape_cast %163 : vector<1x4x256xf32> to vector<4x256xf32>
      %165 = vector.shape_cast %162 : vector<4x256xf32> to vector<1x4x256xf32>
      tpu.vector_store %arg10[%c1_83, %c0_84, %c0_85], %165 {strides = array<i32>} : memref<3x4x256xf32, #tpu.memory_space<vmem>>, vector<1x4x256xf32>,
    } else {
    }
    %c3_i32_33 = arith.constant 3 : i32
    %68 = arith.cmpi sgt, %4, %c3_i32_33 : i32
    %c2_i32_34 = arith.constant 2 : i32
    %69 = arith.cmpi sgt, %1, %c2_i32_34 : i32
    %70 = arith.andi %68, %69 : i1
    %71 = arith.extui %70 : i1 to i32
    %c0_i32_35 = arith.constant 0 : i32
    %72 = arith.cmpi ne, %71, %c0_i32_35 : i32
    scf.if %72 {
      %c3_i32_70 = arith.constant 3 : i32
      %143 = arith.muli %arg1, %c3_i32_70 : i32
      %c2_i32_71 = arith.constant 2 : i32
      %144 = arith.addi %143, %c2_i32_71 : i32
      %c5_i32 = arith.constant 5 : i32
      %145 = arith.muli %144, %c5_i32 : i32
      %c3_i32_72 = arith.constant 3 : i32
      %146 = arith.addi %145, %c3_i32_72 : i32
      %147 = arith.index_cast %146 : i32 to index
      %148 = memref.load %arg3[%147] : memref<60xi32, #tpu.memory_space<smem>>
      %149 = arith.index_cast %148 : i32 to index
      %c0_73 = arith.constant 0 : index
      %c0_74 = arith.constant 0 : index
      %150 = vector.load %arg4[%149, %c0_73, %c0_74] : memref<5x4x128xf32, #tpu.memory_space<vmem>>, vector<1x4x128xf32>
      %151 = vector.shape_cast %150 : vector<1x4x128xf32> to vector<4x128xf32>
      %cst_75 = arith.constant 0.000000e+00 : f32
      %152 = vector.broadcast %cst_75 : f32 to vector<4x128xf32>
      %153 = arith.maximumf %151, %152 : vector<4x128xf32>
      %154 = arith.truncf %153 : vector<4x128xf32> to vector<4x128xbf16>
      %c3_i32_76 = arith.constant 3 : i32
      %155 = arith.addi %7, %c3_i32_76 : i32
      %156 = arith.index_cast %155 : i32 to index
      %c0_77 = arith.constant 0 : index
      %c0_78 = arith.constant 0 : index
      %157 = vector.load %arg5[%156, %c0_77, %c0_78] : memref<14x128x256xbf16, #tpu.memory_space<vmem>>, vector<1x128x256xbf16>
      %158 = vector.shape_cast %157 : vector<1x128x256xbf16> to vector<128x256xbf16>
      %c2_79 = arith.constant 2 : index
      %c0_80 = arith.constant 0 : index
      %c0_81 = arith.constant 0 : index
      %159 = vector.load %arg10[%c2_79, %c0_80, %c0_81] : memref<3x4x256xf32, #tpu.memory_space<vmem>>, vector<1x4x256xf32>
      %160 = vector.shape_cast %159 : vector<1x4x256xf32> to vector<4x256xf32>
      %cst_82 = arith.constant dense<0.000000e+00> : vector<4x256xf32>
      %161 = tpu.matmul %154, %158, %cst_82 {dimension_numbers = #tpu.dot_dimension_numbers<[1], [0], [0], [1], [0, 0, 1, 1], [], []>} : vector<4x128xbf16>, vector<128x256xbf16>, vector<4x256xf32> -> vector<4x256xf32>
      %162 = arith.addf %160, %161 : vector<4x256xf32>
      %c2_83 = arith.constant 2 : index
      %c0_84 = arith.constant 0 : index
      %c0_85 = arith.constant 0 : index
      %163 = vector.load %arg10[%c2_83, %c0_84, %c0_85] : memref<3x4x256xf32, #tpu.memory_space<vmem>>, vector<1x4x256xf32>
      %164 = vector.shape_cast %163 : vector<1x4x256xf32> to vector<4x256xf32>
      %165 = vector.shape_cast %162 : vector<4x256xf32> to vector<1x4x256xf32>
      tpu.vector_store %arg10[%c2_83, %c0_84, %c0_85], %165 {strides = array<i32>} : memref<3x4x256xf32, #tpu.memory_space<vmem>>, vector<1x4x256xf32>,
    } else {
    }
    %c4_i32_36 = arith.constant 4 : i32
    %73 = arith.cmpi sgt, %4, %c4_i32_36 : i32
    %c0_i32_37 = arith.constant 0 : i32
    %74 = arith.cmpi sgt, %1, %c0_i32_37 : i32
    %75 = arith.andi %73, %74 : i1
    %76 = arith.extui %75 : i1 to i32
    %c0_i32_38 = arith.constant 0 : i32
    %77 = arith.cmpi ne, %76, %c0_i32_38 : i32
    scf.if %77 {
      %c3_i32_70 = arith.constant 3 : i32
      %143 = arith.muli %arg1, %c3_i32_70 : i32
      %c0_i32_71 = arith.constant 0 : i32
      %144 = arith.addi %143, %c0_i32_71 : i32
      %c5_i32 = arith.constant 5 : i32
      %145 = arith.muli %144, %c5_i32 : i32
      %c4_i32_72 = arith.constant 4 : i32
      %146 = arith.addi %145, %c4_i32_72 : i32
      %147 = arith.index_cast %146 : i32 to index
      %148 = memref.load %arg3[%147] : memref<60xi32, #tpu.memory_space<smem>>
      %149 = arith.index_cast %148 : i32 to index
      %c0_73 = arith.constant 0 : index
      %c0_74 = arith.constant 0 : index
      %150 = vector.load %arg4[%149, %c0_73, %c0_74] : memref<5x4x128xf32, #tpu.memory_space<vmem>>, vector<1x4x128xf32>
      %151 = vector.shape_cast %150 : vector<1x4x128xf32> to vector<4x128xf32>
      %cst_75 = arith.constant 0.000000e+00 : f32
      %152 = vector.broadcast %cst_75 : f32 to vector<4x128xf32>
      %153 = arith.maximumf %151, %152 : vector<4x128xf32>
      %154 = arith.truncf %153 : vector<4x128xf32> to vector<4x128xbf16>
      %c4_i32_76 = arith.constant 4 : i32
      %155 = arith.addi %7, %c4_i32_76 : i32
      %156 = arith.index_cast %155 : i32 to index
      %c0_77 = arith.constant 0 : index
      %c0_78 = arith.constant 0 : index
      %157 = vector.load %arg5[%156, %c0_77, %c0_78] : memref<14x128x256xbf16, #tpu.memory_space<vmem>>, vector<1x128x256xbf16>
      %158 = vector.shape_cast %157 : vector<1x128x256xbf16> to vector<128x256xbf16>
      %c0_79 = arith.constant 0 : index
      %c0_80 = arith.constant 0 : index
      %c0_81 = arith.constant 0 : index
      %159 = vector.load %arg10[%c0_79, %c0_80, %c0_81] : memref<3x4x256xf32, #tpu.memory_space<vmem>>, vector<1x4x256xf32>
      %160 = vector.shape_cast %159 : vector<1x4x256xf32> to vector<4x256xf32>
      %cst_82 = arith.constant dense<0.000000e+00> : vector<4x256xf32>
      %161 = tpu.matmul %154, %158, %cst_82 {dimension_numbers = #tpu.dot_dimension_numbers<[1], [0], [0], [1], [0, 0, 1, 1], [], []>} : vector<4x128xbf16>, vector<128x256xbf16>, vector<4x256xf32> -> vector<4x256xf32>
      %162 = arith.addf %160, %161 : vector<4x256xf32>
      %c0_83 = arith.constant 0 : index
      %c0_84 = arith.constant 0 : index
      %c0_85 = arith.constant 0 : index
      %163 = vector.load %arg10[%c0_83, %c0_84, %c0_85] : memref<3x4x256xf32, #tpu.memory_space<vmem>>, vector<1x4x256xf32>
      %164 = vector.shape_cast %163 : vector<1x4x256xf32> to vector<4x256xf32>
      %165 = vector.shape_cast %162 : vector<4x256xf32> to vector<1x4x256xf32>
      tpu.vector_store %arg10[%c0_83, %c0_84, %c0_85], %165 {strides = array<i32>} : memref<3x4x256xf32, #tpu.memory_space<vmem>>, vector<1x4x256xf32>,
    } else {
    }
    %c4_i32_39 = arith.constant 4 : i32
    %78 = arith.cmpi sgt, %4, %c4_i32_39 : i32
    %c1_i32_40 = arith.constant 1 : i32
    %79 = arith.cmpi sgt, %1, %c1_i32_40 : i32
    %80 = arith.andi %78, %79 : i1
    %81 = arith.extui %80 : i1 to i32
    %c0_i32_41 = arith.constant 0 : i32
    %82 = arith.cmpi ne, %81, %c0_i32_41 : i32
    scf.if %82 {
      %c3_i32_70 = arith.constant 3 : i32
      %143 = arith.muli %arg1, %c3_i32_70 : i32
      %c1_i32_71 = arith.constant 1 : i32
      %144 = arith.addi %143, %c1_i32_71 : i32
      %c5_i32 = arith.constant 5 : i32
      %145 = arith.muli %144, %c5_i32 : i32
      %c4_i32_72 = arith.constant 4 : i32
      %146 = arith.addi %145, %c4_i32_72 : i32
      %147 = arith.index_cast %146 : i32 to index
      %148 = memref.load %arg3[%147] : memref<60xi32, #tpu.memory_space<smem>>
      %149 = arith.index_cast %148 : i32 to index
      %c0_73 = arith.constant 0 : index
      %c0_74 = arith.constant 0 : index
      %150 = vector.load %arg4[%149, %c0_73, %c0_74] : memref<5x4x128xf32, #tpu.memory_space<vmem>>, vector<1x4x128xf32>
      %151 = vector.shape_cast %150 : vector<1x4x128xf32> to vector<4x128xf32>
      %cst_75 = arith.constant 0.000000e+00 : f32
      %152 = vector.broadcast %cst_75 : f32 to vector<4x128xf32>
      %153 = arith.maximumf %151, %152 : vector<4x128xf32>
      %154 = arith.truncf %153 : vector<4x128xf32> to vector<4x128xbf16>
      %c4_i32_76 = arith.constant 4 : i32
      %155 = arith.addi %7, %c4_i32_76 : i32
      %156 = arith.index_cast %155 : i32 to index
      %c0_77 = arith.constant 0 : index
      %c0_78 = arith.constant 0 : index
      %157 = vector.load %arg5[%156, %c0_77, %c0_78] : memref<14x128x256xbf16, #tpu.memory_space<vmem>>, vector<1x128x256xbf16>
      %158 = vector.shape_cast %157 : vector<1x128x256xbf16> to vector<128x256xbf16>
      %c1_79 = arith.constant 1 : index
      %c0_80 = arith.constant 0 : index
      %c0_81 = arith.constant 0 : index
      %159 = vector.load %arg10[%c1_79, %c0_80, %c0_81] : memref<3x4x256xf32, #tpu.memory_space<vmem>>, vector<1x4x256xf32>
      %160 = vector.shape_cast %159 : vector<1x4x256xf32> to vector<4x256xf32>
      %cst_82 = arith.constant dense<0.000000e+00> : vector<4x256xf32>
      %161 = tpu.matmul %154, %158, %cst_82 {dimension_numbers = #tpu.dot_dimension_numbers<[1], [0], [0], [1], [0, 0, 1, 1], [], []>} : vector<4x128xbf16>, vector<128x256xbf16>, vector<4x256xf32> -> vector<4x256xf32>
      %162 = arith.addf %160, %161 : vector<4x256xf32>
      %c1_83 = arith.constant 1 : index
      %c0_84 = arith.constant 0 : index
      %c0_85 = arith.constant 0 : index
      %163 = vector.load %arg10[%c1_83, %c0_84, %c0_85] : memref<3x4x256xf32, #tpu.memory_space<vmem>>, vector<1x4x256xf32>
      %164 = vector.shape_cast %163 : vector<1x4x256xf32> to vector<4x256xf32>
      %165 = vector.shape_cast %162 : vector<4x256xf32> to vector<1x4x256xf32>
      tpu.vector_store %arg10[%c1_83, %c0_84, %c0_85], %165 {strides = array<i32>} : memref<3x4x256xf32, #tpu.memory_space<vmem>>, vector<1x4x256xf32>,
    } else {
    }
    %c4_i32_42 = arith.constant 4 : i32
    %83 = arith.cmpi sgt, %4, %c4_i32_42 : i32
    %c2_i32_43 = arith.constant 2 : i32
    %84 = arith.cmpi sgt, %1, %c2_i32_43 : i32
    %85 = arith.andi %83, %84 : i1
    %86 = arith.extui %85 : i1 to i32
    %c0_i32_44 = arith.constant 0 : i32
    %87 = arith.cmpi ne, %86, %c0_i32_44 : i32
    scf.if %87 {
      %c3_i32_70 = arith.constant 3 : i32
      %143 = arith.muli %arg1, %c3_i32_70 : i32
      %c2_i32_71 = arith.constant 2 : i32
      %144 = arith.addi %143, %c2_i32_71 : i32
      %c5_i32 = arith.constant 5 : i32
      %145 = arith.muli %144, %c5_i32 : i32
      %c4_i32_72 = arith.constant 4 : i32
      %146 = arith.addi %145, %c4_i32_72 : i32
      %147 = arith.index_cast %146 : i32 to index
      %148 = memref.load %arg3[%147] : memref<60xi32, #tpu.memory_space<smem>>
      %149 = arith.index_cast %148 : i32 to index
      %c0_73 = arith.constant 0 : index
      %c0_74 = arith.constant 0 : index
      %150 = vector.load %arg4[%149, %c0_73, %c0_74] : memref<5x4x128xf32, #tpu.memory_space<vmem>>, vector<1x4x128xf32>
      %151 = vector.shape_cast %150 : vector<1x4x128xf32> to vector<4x128xf32>
      %cst_75 = arith.constant 0.000000e+00 : f32
      %152 = vector.broadcast %cst_75 : f32 to vector<4x128xf32>
      %153 = arith.maximumf %151, %152 : vector<4x128xf32>
      %154 = arith.truncf %153 : vector<4x128xf32> to vector<4x128xbf16>
      %c4_i32_76 = arith.constant 4 : i32
      %155 = arith.addi %7, %c4_i32_76 : i32
      %156 = arith.index_cast %155 : i32 to index
      %c0_77 = arith.constant 0 : index
      %c0_78 = arith.constant 0 : index
      %157 = vector.load %arg5[%156, %c0_77, %c0_78] : memref<14x128x256xbf16, #tpu.memory_space<vmem>>, vector<1x128x256xbf16>
      %158 = vector.shape_cast %157 : vector<1x128x256xbf16> to vector<128x256xbf16>
      %c2_79 = arith.constant 2 : index
      %c0_80 = arith.constant 0 : index
      %c0_81 = arith.constant 0 : index
      %159 = vector.load %arg10[%c2_79, %c0_80, %c0_81] : memref<3x4x256xf32, #tpu.memory_space<vmem>>, vector<1x4x256xf32>
      %160 = vector.shape_cast %159 : vector<1x4x256xf32> to vector<4x256xf32>
      %cst_82 = arith.constant dense<0.000000e+00> : vector<4x256xf32>
      %161 = tpu.matmul %154, %158, %cst_82 {dimension_numbers = #tpu.dot_dimension_numbers<[1], [0], [0], [1], [0, 0, 1, 1], [], []>} : vector<4x128xbf16>, vector<128x256xbf16>, vector<4x256xf32> -> vector<4x256xf32>
      %162 = arith.addf %160, %161 : vector<4x256xf32>
      %c2_83 = arith.constant 2 : index
      %c0_84 = arith.constant 0 : index
      %c0_85 = arith.constant 0 : index
      %163 = vector.load %arg10[%c2_83, %c0_84, %c0_85] : memref<3x4x256xf32, #tpu.memory_space<vmem>>, vector<1x4x256xf32>
      %164 = vector.shape_cast %163 : vector<1x4x256xf32> to vector<4x256xf32>
      %165 = vector.shape_cast %162 : vector<4x256xf32> to vector<1x4x256xf32>
      tpu.vector_store %arg10[%c2_83, %c0_84, %c0_85], %165 {strides = array<i32>} : memref<3x4x256xf32, #tpu.memory_space<vmem>>, vector<1x4x256xf32>,
    } else {
    }
    %88 = arith.index_cast %arg1 : i32 to index
    %c0_45 = arith.constant 0 : index
    %c0_46 = arith.constant 0 : index
    %89 = vector.load %arg6[%88, %c0_45, %c0_46] : memref<4x1x256xf32, #tpu.memory_space<vmem>>, vector<1x1x256xf32>
    %90 = vector.shape_cast %89 : vector<1x1x256xf32> to vector<1x256xf32>
    %cst_47 = arith.constant 0.000000e+00 : f32
    %91 = vector.broadcast %cst_47 : f32 to vector<4x256xf32>
    %c0_i32_48 = arith.constant 0 : i32
    %92 = arith.cmpi sgt, %1, %c0_i32_48 : i32
    %93 = arith.extui %92 : i1 to i32
    %94 = arith.sitofp %93 : i32 to f32
    %c0_49 = arith.constant 0 : index
    %c0_50 = arith.constant 0 : index
    %c0_51 = arith.constant 0 : index
    %95 = vector.load %arg10[%c0_49, %c0_50, %c0_51] : memref<3x4x256xf32, #tpu.memory_space<vmem>>, vector<1x4x256xf32>
    %96 = vector.shape_cast %95 : vector<1x4x256xf32> to vector<4x256xf32>
    %97 = vector.broadcast %90 : vector<1x256xf32> to vector<4x256xf32>
    %98 = arith.addf %96, %97 : vector<4x256xf32>
    %cst_52 = arith.constant 0.000000e+00 : f32
    %99 = vector.broadcast %cst_52 : f32 to vector<4x256xf32>
    %100 = arith.maximumf %98, %99 : vector<4x256xf32>
    %101 = vector.broadcast %94 : f32 to vector<4x256xf32>
    %102 = arith.mulf %101, %100 : vector<4x256xf32>
    %103 = arith.addf %91, %102 : vector<4x256xf32>
    %c1_i32_53 = arith.constant 1 : i32
    %104 = arith.cmpi sgt, %1, %c1_i32_53 : i32
    %105 = arith.extui %104 : i1 to i32
    %106 = arith.sitofp %105 : i32 to f32
    %c1 = arith.constant 1 : index
    %c0_54 = arith.constant 0 : index
    %c0_55 = arith.constant 0 : index
    %107 = vector.load %arg10[%c1, %c0_54, %c0_55] : memref<3x4x256xf32, #tpu.memory_space<vmem>>, vector<1x4x256xf32>
    %108 = vector.shape_cast %107 : vector<1x4x256xf32> to vector<4x256xf32>
    %109 = vector.broadcast %90 : vector<1x256xf32> to vector<4x256xf32>
    %110 = arith.addf %108, %109 : vector<4x256xf32>
    %cst_56 = arith.constant 0.000000e+00 : f32
    %111 = vector.broadcast %cst_56 : f32 to vector<4x256xf32>
    %112 = arith.maximumf %110, %111 : vector<4x256xf32>
    %113 = vector.broadcast %106 : f32 to vector<4x256xf32>
    %114 = arith.mulf %113, %112 : vector<4x256xf32>
    %115 = arith.addf %103, %114 : vector<4x256xf32>
    %c2_i32_57 = arith.constant 2 : i32
    %116 = arith.cmpi sgt, %1, %c2_i32_57 : i32
    %117 = arith.extui %116 : i1 to i32
    %118 = arith.sitofp %117 : i32 to f32
    %c2 = arith.constant 2 : index
    %c0_58 = arith.constant 0 : index
    %c0_59 = arith.constant 0 : index
    %119 = vector.load %arg10[%c2, %c0_58, %c0_59] : memref<3x4x256xf32, #tpu.memory_space<vmem>>, vector<1x4x256xf32>
    %120 = vector.shape_cast %119 : vector<1x4x256xf32> to vector<4x256xf32>
    %121 = vector.broadcast %90 : vector<1x256xf32> to vector<4x256xf32>
    %122 = arith.addf %120, %121 : vector<4x256xf32>
    %cst_60 = arith.constant 0.000000e+00 : f32
    %123 = vector.broadcast %cst_60 : f32 to vector<4x256xf32>
    %124 = arith.maximumf %122, %123 : vector<4x256xf32>
    %125 = vector.broadcast %118 : f32 to vector<4x256xf32>
    %126 = arith.mulf %125, %124 : vector<4x256xf32>
    %127 = arith.addf %115, %126 : vector<4x256xf32>
    %128 = arith.index_cast %arg1 : i32 to index
    %c0_61 = arith.constant 0 : index
    %c0_62 = arith.constant 0 : index
    %129 = vector.load %arg7[%128, %c0_61, %c0_62] : memref<4x256x8xf32, #tpu.memory_space<vmem>>, vector<1x256x8xf32>
    %130 = vector.shape_cast %129 : vector<1x256x8xf32> to vector<256x8xf32>
    %cst_63 = arith.constant dense<0.000000e+00> : vector<4x8xf32>
    %131 = tpu.matmul %127, %130, %cst_63 {dimension_numbers = #tpu.dot_dimension_numbers<[1], [0], [0], [1], [0, 0, 1, 1], [], []>} : vector<4x256xf32>, vector<256x8xf32>, vector<4x8xf32> -> vector<4x8xf32>
    %c0_64 = arith.constant 0 : index
    %c0_65 = arith.constant 0 : index
    %132 = vector.load %arg9[%c0_64, %c0_65] : memref<4x8xf32, #tpu.memory_space<vmem>>, vector<4x8xf32>
    %133 = arith.sitofp %1 : i32 to f32
    %134 = arith.index_cast %arg1 : i32 to index
    %c0_66 = arith.constant 0 : index
    %c0_67 = arith.constant 0 : index
    %135 = vector.load %arg8[%134, %c0_66, %c0_67] : memref<4x1x8xf32, #tpu.memory_space<vmem>>, vector<1x1x8xf32>
    %136 = vector.shape_cast %135 : vector<1x1x8xf32> to vector<1x8xf32>
    %137 = vector.broadcast %133 : f32 to vector<1x8xf32>
    %138 = arith.mulf %137, %136 : vector<1x8xf32>
    %139 = vector.broadcast %138 : vector<1x8xf32> to vector<4x8xf32>
    %140 = arith.addf %131, %139 : vector<4x8xf32>
    %141 = arith.addf %132, %140 : vector<4x8xf32>
    %c0_68 = arith.constant 0 : index
    %c0_69 = arith.constant 0 : index
    %142 = vector.load %arg9[%c0_68, %c0_69] : memref<4x8xf32, #tpu.memory_space<vmem>>, vector<4x8xf32>
    tpu.vector_store %arg9[%c0_68, %c0_69], %141 {strides = array<i32>} : memref<4x8xf32, #tpu.memory_space<vmem>>, vector<4x8xf32>,
    return
  }
  func.func @transform_0(%arg0: i32, %arg1: i32, %arg2: memref<12xi32, #tpu.memory_space<smem>>, %arg3: memref<60xi32, #tpu.memory_space<smem>>) -> (i32, i32, i32) {
    %c0_i32 = arith.constant 0 : i32
    %c0_i32_0 = arith.constant 0 : i32
    %c0_i32_1 = arith.constant 0 : i32
    return %c0_i32, %arg0, %c0_i32_0 : i32, i32, i32
  }
  func.func @transform_1(%arg0: i32, %arg1: i32, %arg2: memref<12xi32, #tpu.memory_space<smem>>, %arg3: memref<60xi32, #tpu.memory_space<smem>>) -> (i32, i32, i32) {
    %c0_i32 = arith.constant 0 : i32
    %c0_i32_0 = arith.constant 0 : i32
    %c0_i32_1 = arith.constant 0 : i32
    %c0_i32_2 = arith.constant 0 : i32
    return %c0_i32, %c0_i32_0, %c0_i32_1 : i32, i32, i32
  }
  func.func @transform_2(%arg0: i32, %arg1: i32, %arg2: memref<12xi32, #tpu.memory_space<smem>>, %arg3: memref<60xi32, #tpu.memory_space<smem>>) -> (i32, i32, i32) {
    %c0_i32 = arith.constant 0 : i32
    %c0_i32_0 = arith.constant 0 : i32
    %c0_i32_1 = arith.constant 0 : i32
    %c0_i32_2 = arith.constant 0 : i32
    return %c0_i32, %c0_i32_0, %c0_i32_1 : i32, i32, i32
  }
  func.func @transform_3(%arg0: i32, %arg1: i32, %arg2: memref<12xi32, #tpu.memory_space<smem>>, %arg3: memref<60xi32, #tpu.memory_space<smem>>) -> (i32, i32, i32) {
    %c0_i32 = arith.constant 0 : i32
    %c0_i32_0 = arith.constant 0 : i32
    %c0_i32_1 = arith.constant 0 : i32
    %c0_i32_2 = arith.constant 0 : i32
    return %c0_i32, %c0_i32_0, %c0_i32_1 : i32, i32, i32
  }
  func.func @transform_4(%arg0: i32, %arg1: i32, %arg2: memref<12xi32, #tpu.memory_space<smem>>, %arg3: memref<60xi32, #tpu.memory_space<smem>>) -> (i32, i32, i32) {
    %c0_i32 = arith.constant 0 : i32
    %c0_i32_0 = arith.constant 0 : i32
    %c0_i32_1 = arith.constant 0 : i32
    %c0_i32_2 = arith.constant 0 : i32
    return %c0_i32, %c0_i32_0, %c0_i32_1 : i32, i32, i32
  }
  func.func @transform_5(%arg0: i32, %arg1: i32, %arg2: memref<12xi32, #tpu.memory_space<smem>>, %arg3: memref<60xi32, #tpu.memory_space<smem>>) -> (i32, i32) {
    %c0_i32 = arith.constant 0 : i32
    %c0_i32_0 = arith.constant 0 : i32
    return %arg0, %c0_i32 : i32, i32
  }
}

</mosaic_0001>

<bundles_post_ra>
// kernel: tpu_custom_call.1
= control target key start
LH: loop header
LB: loop body
LE: loop exit
PB: predicated region body
PF: predicated region fallthrough
CT: control target
= control target key end

     0   :  { %s4394_s30 = smov [#allocation4]   ;;  %s4395_s8 = smov [#allocation5]   ;;  %s5213_s0 = inlined_call_operand.vmem [shape: s32[12], index: 0, kind: input, shape index: {}]   ;;  %s5214_s2 = inlined_call_operand.vmem [shape: f32[5,4,128], index: 2, kind: input, shape index: {}]   ;;  %s5215_s3 = inlined_call_operand.hbm [shape: bf16[14,128,256], index: 3, kind: input, shape index: {}]   ;;  %s5216_s4 = inlined_call_operand.vmem [shape: f32[4,1,256], index: 4, kind: input, shape index: {}]   ;;  %s5217_s5 = inlined_call_operand.vmem [shape: f32[4,256,8], index: 5, kind: input, shape index: {}]   ;;  %s5218_s6 = inlined_call_operand.vmem [shape: f32[4,1,8], index: 6, kind: input, shape index: {}]   ;;  %s5219_s7 = inlined_call_operand.hbm [shape: f32[4,8], index: 7, kind: output, shape index: {}]   ;;  %s5220_s1 = inlined_call_operand.vmem [shape: s32[60], index: 1, kind: input, shape index: {}]  }
   0x1   :  { %s13_s26 = sshll.u32 %s5213_s0, 4  ;;  %s18_s29 = sshll.u32 %s5220_s1, 4  ;;  %s14_s26 = int_to_ptr.vmem [resolvable:$true] %s13_s26  ;;  %s19_s29 = int_to_ptr.vmem [resolvable:$true] %s18_s29 }
   0x2   :  { %16 = dma.vmem_to_smem %s14_s26, 16, %s4394_s30, [#allocation3] }
   0x3   :  { %21 = dma.vmem_to_smem %s19_s29, 16, %s4395_s8, [#allocation3] }
   0x4   :  { %4372 = dma.done.wait [#allocation3], 32 }
   0x5   :  { %4373 = vsyncadd [#allocation3], 4294967264 }
   0x6   :  { %24 = sfence }
   0x7   :  { %25 = vsyncpa [#allocation7], 0 }
   0x8   :  { %26 = vsyncpa [#allocation8], 0  ;;  %s4448_s9 = smov 0   ;;  %s4450_s10 = smov 0  }
   0x9   :  { %s4452_s0 = smov 0  }
   0xa LB: > { %s2789_s1 = sadd.s32 4294967295, %s4392_s0   ;;  %s41_s11 = sadd.s32 1, %s4388_s10  ;;  %s4392_s0 = sphi %s4452_s0, %s32_s0   ;;  %s4388_s10 = sphi %s4450_s10, %s5222_s10   ;;  %s4384_s9 = sphi %s4448_s9, %s5221_s9  }
   0xb   : > { %p42_p0 = scmp.ge.s32.totalorder %s41_s11, 4  ;;  %p2790_p1 = scmp.ge.s32.totalorder %s4392_s0, 1 }
   0xc   : > { %p185_p2 = scmp.lt.s32.totalorder %s4392_s0, 5  ;;  %p4242_p4 = scmp.eq.s32.totalorder %s2789_s1, 0 }
   0xd   : > { %s5224_s11 = smov (%p42_p0, %s41_s11), 0  ;;  %s203_s14 = sshll.u32 %s5215_s3, 4  ;;  %s204_s14 = int_to_ptr.hbm [resolvable:$true] %s203_s14 }
   0xe   : > { %p186_p3 = pnand %p2790_p1, %p185_p2  ;;  %s4396_s15 = smov [#allocation6]  }
   0xf   : > { %s205_s16 = sshll.u32 %s4396_s15, 4  ;;  %s4397_s17 = smov 128   ;;  %s206_s16 = int_to_ptr.vmem [resolvable:$true] %s205_s16 }
  0x10   : > { %p4238_p5 = pneg %p186_p3  ;;  %s4398_s18 = smov 8  }
  0x11   : > { %230 = sbr.rel (%p186_p3) target bundleno = 2857 (0xb29), region = 40 }
  0x12   : > { %p4239_p6 = pnand %p4242_p4, %p4238_p5 }
  0x14   : > { %4241 = dma.hbm_to_vmem [thread:$0]  (!%p4239_p6), %s204_s14, 28672, %s206_s16, [#allocation7], %s4397_s17, %s4397_s17, %s4398_s18  }
  0x16   : > { %4375 = dma.done.wait (%p4242_p4), [#allocation7], 28672  }
  0x17   : > { %4377 = vsyncadd (%p4242_p4), [#allocation7], 4294938624  ;;  %s258_s19 = sadd.s32 4, %s4384_s9  ;;  %s260_s20 = sadd.s32 8, %s4384_s9 }
  0x18   : > { %s4477_s21 = sld [smem:[#allocation4 + %s4384_s9]]  ;;  %p2795_p7 = scmp.ne.s32.totalorder %s4384_s9, 0 }
  0x19   : > { %s4479_s22 = sld [smem:[#allocation4 + %s258_s19]] }
  0x1a   : > { %s4481_s23 = sld [smem:[#allocation4 + %s260_s20]]  ;;  %265 = sbr.rel (%p2795_p7) target bundleno = 33 (0x21), region = 48 }
  0x1f   : > { %vm266_vm0 = vcmask 60416   ;;  %v4399_v0 = vmov 0.0  }
  0x20   : > { %267 = vst.msk [vmem:[#allocation9] sm:$0xf] %vm266_vm0, %v4399_v0 }
  0x21 PF: > { %p271_p8 = scmp.gt.s32.totalorder %s4479_s22, 0  ;;  %p272_p9 = scmp.gt.s32.totalorder %s4477_s21, 0  ;;  %v4400_v1 = vmov 0.0  }
  0x22   : > { %268 = vst [vmem:[#allocation2 + $0x10] sm:$0xff] %v4400_v1 }
  0x23   : > { %269 = vst [vmem:[#allocation2] sm:$0xff] %v4400_v1  ;;  %p273_p10 = pnand %p272_p9, %p271_p8 }
  0x24   : > { %270 = vst [vmem:[#allocation2 + $0x8] sm:$0xff] %v4400_v1  ;;  %s3987_s24 = sshll.u32 (!%p273_p10), %s4481_s23, 7  ;;  %s277_s26 = smul.u32 (!%p273_p10), 15, %s4384_s9 }
  0x25   : > { %276 = sbr.rel (%p273_p10) target bundleno = 211 (0xd3), region = 52  ;;  %s4491_s25 = scalar_lea.vmem (!%p273_p10), [#allocation6], %s3987_s24 }
  0x26   : > { %s278_s27 = sld [smem:[#allocation5 + %s277_s26]] (!%p273_p10) }
  0x2a   : > { %v2857_v2 = vld [vmem:[%s4491_s25 + $0x70] sm:$0xf]  ;;  %v4003_v3 = vld [vmem:[%s4491_s25 + $0x74] sm:$0xf0]  ;;  %v4002_v4 = vld [vmem:[%s4491_s25 + $0x74] sm:$0xf] }
  0x2b   : > { %v2858_v5 = vor.u32 %v4003_v3, %v2857_v2  ;;  %v2859_v6 = vld [vmem:[%s4491_s25 + $0x78] sm:$0xf0]  ;;  %v2849_v7 = vld [vmem:[%s4491_s25 + $0x60] sm:$0xf]  ;;  %v4001_v8 = vld [vmem:[%s4491_s25 + $0x64] sm:$0xf0] }
  0x2c   : > { %v2862_v9 = vor.u32 %v4002_v4, %v2859_v6  ;;  %v4000_v10 = vld [vmem:[%s4491_s25 + $0x64] sm:$0xf]  ;;  %v2851_v11 = vld [vmem:[%s4491_s25 + $0x68] sm:$0xf0]  ;;  %v2850_v12 = vor.u32 %v4001_v8, %v2849_v7  ;;  %v2841_v14 = vld [vmem:[%s4491_s25 + $0x50] sm:$0xf] }
  0x2d   : > { %384 = vmatpush.bf16.msra.mxu0 %v2858_v5  ;;  %v2854_v13 = vor.u32 %v4000_v10, %v2851_v11  ;;  %v3999_v15 = vld [vmem:[%s4491_s25 + $0x54] sm:$0xf0]  ;;  %v3998_v16 = vld [vmem:[%s4491_s25 + $0x54] sm:$0xf]  ;;  %v2843_v17 = vld [vmem:[%s4491_s25 + $0x58] sm:$0xf0] }
  0x2e   : > { %397 = vmatpush.bf16.msra.mxu1 %v2862_v9  ;;  %v2842_v18 = vor.u32 %v3999_v15, %v2841_v14  ;;  %v2846_v19 = vor.u32 %v3998_v16, %v2843_v17  ;;  %v2833_v20 = vld [vmem:[%s4491_s25 + $0x40] sm:$0xf]  ;;  %v3997_v21 = vld [vmem:[%s4491_s25 + $0x44] sm:$0xf0]  ;;  %v3996_v22 = vld [vmem:[%s4491_s25 + $0x44] sm:$0xf] }
  0x2f   : > { %v2835_v23 = vld [vmem:[%s4491_s25 + $0x48] sm:$0xf0]  ;;  %v2834_v24 = vor.u32 %v3997_v21, %v2833_v20  ;;  %v2825_v26 = vld [vmem:[%s4491_s25 + $0x30] sm:$0xf]  ;;  %v3995_v27 = vld [vmem:[%s4491_s25 + $0x34] sm:$0xf0] }
  0x30   : > { %v2838_v25 = vor.u32 %v3996_v22, %v2835_v23  ;;  %v3994_v28 = vld [vmem:[%s4491_s25 + $0x34] sm:$0xf]  ;;  %v2827_v29 = vld [vmem:[%s4491_s25 + $0x38] sm:$0xf0]  ;;  %v2826_v30 = vor.u32 %v3995_v27, %v2825_v26  ;;  %v2817_v32 = vld [vmem:[%s4491_s25 + $0x20] sm:$0xf] }
  0x31   : > { %385 = vmatpush.bf16.msra.mxu0 %v2850_v12  ;;  %v2830_v31 = vor.u32 %v3994_v28, %v2827_v29  ;;  %v3993_v33 = vld [vmem:[%s4491_s25 + $0x24] sm:$0xf0]  ;;  %v3992_v34 = vld [vmem:[%s4491_s25 + $0x24] sm:$0xf]  ;;  %v2819_v35 = vld [vmem:[%s4491_s25 + $0x28] sm:$0xf0] }
  0x32   : > { %398 = vmatpush.bf16.msra.mxu1 %v2854_v13  ;;  %s2796_s28 = sshll.u32 %s278_s27, 2  ;;  %v2818_v36 = vor.u32 %v3993_v33, %v2817_v32  ;;  %v2822_v37 = vor.u32 %v3992_v34, %v2819_v35  ;;  %v2809_v38 = vld [vmem:[%s4491_s25 + $0x10] sm:$0xf]  ;;  %v3991_v39 = vld [vmem:[%s4491_s25 + $0x14] sm:$0xf0]  ;;  %vm413_vm1 = vcmask 1043456  }
  0x33   : > { %s280_s8 = scalar_lea.vmem %s5214_s2, %s2796_s28  ;;  %v3990_v40 = vld [vmem:[%s4491_s25 + $0x14] sm:$0xf]  ;;  %v2811_v41 = vld [vmem:[%s4491_s25 + $0x18] sm:$0xf0]  ;;  %v2810_v42 = vor.u32 %v3991_v39, %v2809_v38  ;;  %v2801_v45 = vld [vmem:[%s4491_s25] sm:$0xf] }
  0x34   : > { %v281_v43 = vld [vmem:[%s280_s8] sm:$0xf]  ;;  %v2814_v44 = vor.u32 %v3990_v40, %v2811_v41  ;;  %v3989_v46 = vld [vmem:[%s4491_s25 + $0x4] sm:$0xf0]  ;;  %v3988_v47 = vld [vmem:[%s4491_s25 + $0x4] sm:$0xf] }
  0x35   : > { %386 = vmatpush.bf16.msra.mxu0 %v2842_v18  ;;  %v2803_v48 = vld [vmem:[%s4491_s25 + $0x8] sm:$0xf0]  ;;  %v282_v49 = vmax.f32 %v281_v43, 0.0  ;;  %v2802_v50 = vor.u32 %v3989_v46, %v2801_v45  ;;  %v303_v55 = vld [vmem:[#allocation2 + $0x10] sm:$0xff] }
  0x36   : > { %399 = vmatpush.bf16.msra.mxu1 %v2846_v19  ;;  %v2806_v51 = vor.u32 %v3988_v47, %v2803_v48 }
  0x37   : > { %v283_v52 = vpack.c.bf16 %v282_v49, %v282_v49 }
  0x39   : > { %387 = vmatpush.bf16.msra.mxu0 %v2834_v24 }
  0x3a   : > { %400 = vmatpush.bf16.msra.mxu1 %v2838_v25 }
  0x3d   : > { %388 = vmatpush.bf16.msra.mxu0 %v2826_v30 }
  0x3e   : > { %401 = vmatpush.bf16.msra.mxu1 %v2830_v31 }
  0x41   : > { %389 = vmatpush.bf16.msra.mxu0 %v2818_v36 }
  0x42   : > { %402 = vmatpush.bf16.msra.mxu1 %v2822_v37 }
  0x45   : > { %390 = vmatpush.bf16.msra.mxu0 %v2810_v42 }
  0x46   : > { %403 = vmatpush.bf16.msra.mxu1 %v2814_v44 }
  0x49   : > { %391 = vmatpush.bf16.msra.mxu0 %v2802_v50 }
  0x4a   : > { %404 = vmatpush.bf16.msra.mxu1 %v2806_v51 }
  0x4c   : > { %392 = vmatmul.bf16.vlgmr.msra.gmra.mxu0 %v283_v52 }
  0x4d   : > { %405 = vmatmul.bf16.vlgmr.msra.gmra.mxu1 %v283_v52 }
  0xc9   : > { %v393_v53 = vpop.f32.mrf.mxu0 }
  0xca   : > { %v406_v54 = vpop.f32.mrf.mxu1 }
  0xcb   : > { %v412_v56 = vrot.slane %v406_v54, 4 }
  0xcd   : > { %v414_v57 = vsel %vm413_vm1, %v393_v53, %v412_v56 }
  0xce   : > { %v416_v58 = vadd.f32 %v414_v57, %v303_v55 }
  0xd0   : > { %417 = vst [vmem:[#allocation2 + $0x10] sm:$0xff] %v416_v58 }
  0xd1   : > { %v395_v59 = vpop.f32.mrf.mxu0 }
  0xd2   : > { %v408_v60 = vpop.f32.mrf.mxu1 }
  0xd3 PF: > { %p418_p11 = scmp.gt.s32.totalorder %s4477_s21, 1 }
  0xd5   : > { %p419_p12 = pnand %p418_p11, %p271_p8 }
  0xd6   : > { %s4004_s12 = sshll.u32 (!%p419_p12), %s4481_s23, 7  ;;  %s423_s14 = smul.u32 (!%p419_p12), 3, %s4384_s9 }
  0xd7   : > { %422 = sbr.rel (%p419_p12) target bundleno = 389 (0x185), region = 56  ;;  %s4535_s13 = scalar_lea.vmem (!%p419_p12), [#allocation6], %s4004_s12 }
  0xd8   : > { %s424_s15 = sadd.s32 (!%p419_p12), 1, %s423_s14 }
  0xd9   : > { %s425_s16 = smul.u32 (!%p419_p12), 5, %s424_s15 }
  0xdb   : > { %s426_s17 = sld [smem:[#allocation5 + %s425_s16]] (!%p419_p12) }
  0xdc   : > { %v2924_v61 = vld [vmem:[%s4535_s13 + $0x70] sm:$0xf]  ;;  %v4020_v62 = vld [vmem:[%s4535_s13 + $0x74] sm:$0xf0]  ;;  %v4019_v63 = vld [vmem:[%s4535_s13 + $0x74] sm:$0xf] }
  0xdd   : > { %v2925_v0 = vor.u32 %v4020_v62, %v2924_v61  ;;  %v2926_v1 = vld [vmem:[%s4535_s13 + $0x78] sm:$0xf0]  ;;  %v2916_v2 = vld [vmem:[%s4535_s13 + $0x60] sm:$0xf]  ;;  %v4018_v3 = vld [vmem:[%s4535_s13 + $0x64] sm:$0xf0] }
  0xde   : > { %v2929_v4 = vor.u32 %v4019_v63, %v2926_v1  ;;  %v4017_v5 = vld [vmem:[%s4535_s13 + $0x64] sm:$0xf]  ;;  %v2918_v6 = vld [vmem:[%s4535_s13 + $0x68] sm:$0xf0]  ;;  %v2917_v7 = vor.u32 %v4018_v3, %v2916_v2  ;;  %v2908_v9 = vld [vmem:[%s4535_s13 + $0x50] sm:$0xf] }
  0xdf   : > { %533 = vmatpush.bf16.msra.mxu0 %v2925_v0  ;;  %v2921_v8 = vor.u32 %v4017_v5, %v2918_v6  ;;  %v4016_v10 = vld [vmem:[%s4535_s13 + $0x54] sm:$0xf0]  ;;  %v4015_v11 = vld [vmem:[%s4535_s13 + $0x54] sm:$0xf]  ;;  %v2910_v12 = vld [vmem:[%s4535_s13 + $0x58] sm:$0xf0] }
  0xe0   : > { %546 = vmatpush.bf16.msra.mxu1 %v2929_v4  ;;  %v2909_v13 = vor.u32 %v4016_v10, %v2908_v9  ;;  %v2913_v14 = vor.u32 %v4015_v11, %v2910_v12  ;;  %v2900_v15 = vld [vmem:[%s4535_s13 + $0x40] sm:$0xf]  ;;  %v4014_v16 = vld [vmem:[%s4535_s13 + $0x44] sm:$0xf0]  ;;  %v4013_v17 = vld [vmem:[%s4535_s13 + $0x44] sm:$0xf] }
  0xe1   : > { %v2902_v18 = vld [vmem:[%s4535_s13 + $0x48] sm:$0xf0]  ;;  %v2901_v19 = vor.u32 %v4014_v16, %v2900_v15  ;;  %v2892_v21 = vld [vmem:[%s4535_s13 + $0x30] sm:$0xf]  ;;  %v4012_v22 = vld [vmem:[%s4535_s13 + $0x34] sm:$0xf0] }
  0xe2   : > { %v2905_v20 = vor.u32 %v4013_v17, %v2902_v18  ;;  %v4011_v23 = vld [vmem:[%s4535_s13 + $0x34] sm:$0xf]  ;;  %v2894_v24 = vld [vmem:[%s4535_s13 + $0x38] sm:$0xf0]  ;;  %v2893_v25 = vor.u32 %v4012_v22, %v2892_v21  ;;  %v2884_v27 = vld [vmem:[%s4535_s13 + $0x20] sm:$0xf] }
  0xe3   : > { %534 = vmatpush.bf16.msra.mxu0 %v2917_v7  ;;  %v2897_v26 = vor.u32 %v4011_v23, %v2894_v24  ;;  %v4010_v28 = vld [vmem:[%s4535_s13 + $0x24] sm:$0xf0]  ;;  %v4009_v29 = vld [vmem:[%s4535_s13 + $0x24] sm:$0xf]  ;;  %v2886_v30 = vld [vmem:[%s4535_s13 + $0x28] sm:$0xf0] }
  0xe4   : > { %547 = vmatpush.bf16.msra.mxu1 %v2921_v8  ;;  %v2885_v31 = vor.u32 %v4010_v28, %v2884_v27  ;;  %s2863_s18 = sshll.u32 %s426_s17, 2  ;;  %v2889_v32 = vor.u32 %v4009_v29, %v2886_v30  ;;  %v2876_v33 = vld [vmem:[%s4535_s13 + $0x10] sm:$0xf]  ;;  %v4008_v34 = vld [vmem:[%s4535_s13 + $0x14] sm:$0xf0]  ;;  %vm562_vm2 = vcmask 1043456  }
  0xe5   : > { %s428_s24 = scalar_lea.vmem %s5214_s2, %s2863_s18  ;;  %v4007_v35 = vld [vmem:[%s4535_s13 + $0x14] sm:$0xf]  ;;  %v2878_v36 = vld [vmem:[%s4535_s13 + $0x18] sm:$0xf0]  ;;  %v2877_v37 = vor.u32 %v4008_v34, %v2876_v33  ;;  %v2868_v40 = vld [vmem:[%s4535_s13] sm:$0xf] }
  0xe6   : > { %v429_v38 = vld [vmem:[%s428_s24] sm:$0xf]  ;;  %v2881_v39 = vor.u32 %v4007_v35, %v2878_v36  ;;  %v4006_v41 = vld [vmem:[%s4535_s13 + $0x4] sm:$0xf0]  ;;  %v4005_v42 = vld [vmem:[%s4535_s13 + $0x4] sm:$0xf] }
  0xe7   : > { %535 = vmatpush.bf16.msra.mxu0 %v2909_v13  ;;  %v2870_v43 = vld [vmem:[%s4535_s13 + $0x8] sm:$0xf0]  ;;  %v430_v44 = vmax.f32 %v429_v38, 0.0  ;;  %v2869_v45 = vor.u32 %v4006_v41, %v2868_v40 }
  0xe8   : > { %548 = vmatpush.bf16.msra.mxu1 %v2913_v14  ;;  %v2873_v46 = vor.u32 %v4005_v42, %v2870_v43  ;;  %v452_v50 = vld [vmem:[#allocation2] sm:$0xff] }
  0xe9   : > { %v431_v47 = vpack.c.bf16 %v430_v44, %v430_v44 }
  0xeb   : > { %536 = vmatpush.bf16.msra.mxu0 %v2901_v19 }
  0xec   : > { %549 = vmatpush.bf16.msra.mxu1 %v2905_v20 }
  0xef   : > { %537 = vmatpush.bf16.msra.mxu0 %v2893_v25 }
  0xf0   : > { %550 = vmatpush.bf16.msra.mxu1 %v2897_v26 }
  0xf3   : > { %538 = vmatpush.bf16.msra.mxu0 %v2885_v31 }
  0xf4   : > { %551 = vmatpush.bf16.msra.mxu1 %v2889_v32 }
  0xf7   : > { %539 = vmatpush.bf16.msra.mxu0 %v2877_v37 }
  0xf8   : > { %552 = vmatpush.bf16.msra.mxu1 %v2881_v39 }
  0xfb   : > { %540 = vmatpush.bf16.msra.mxu0 %v2869_v45 }
  0xfc   : > { %553 = vmatpush.bf16.msra.mxu1 %v2873_v46 }
  0xfe   : > { %541 = vmatmul.bf16.vlgmr.msra.gmra.mxu0 %v431_v47 }
  0xff   : > { %554 = vmatmul.bf16.vlgmr.msra.gmra.mxu1 %v431_v47 }
 0x17b   : > { %v542_v48 = vpop.f32.mrf.mxu0 }
 0x17c   : > { %v555_v49 = vpop.f32.mrf.mxu1 }
 0x17d   : > { %v561_v51 = vrot.slane %v555_v49, 4 }
 0x17f   : > { %v563_v52 = vsel %vm562_vm2, %v542_v48, %v561_v51 }
 0x180   : > { %v565_v53 = vadd.f32 %v563_v52, %v452_v50 }
 0x182   : > { %566 = vst [vmem:[#allocation2] sm:$0xff] %v565_v53 }
 0x183   : > { %v544_v54 = vpop.f32.mrf.mxu0 }
 0x184   : > { %v557_v55 = vpop.f32.mrf.mxu1 }
 0x185 PF: > { %p567_p13 = scmp.gt.s32.totalorder %s4477_s21, 2 }
 0x187   : > { %p568_p0 = pnand %p567_p13, %p271_p8 }
 0x188   : > { %s4021_s25 = sshll.u32 (!%p568_p0), %s4481_s23, 7  ;;  %s572_s27 = smul.u32 (!%p568_p0), 3, %s4384_s9 }
 0x189   : > { %571 = sbr.rel (%p568_p0) target bundleno = 567 (0x237), region = 60  ;;  %s4579_s26 = scalar_lea.vmem (!%p568_p0), [#allocation6], %s4021_s25 }
 0x18a   : > { %s573_s28 = sadd.s32 (!%p568_p0), 2, %s572_s27 }
 0x18b   : > { %s574_s29 = smul.u32 (!%p568_p0), 5, %s573_s28 }
 0x18d   : > { %s575_s30 = sld [smem:[#allocation5 + %s574_s29]] (!%p568_p0) }
 0x18e   : > { %v2991_v56 = vld [vmem:[%s4579_s26 + $0x70] sm:$0xf]  ;;  %v4037_v57 = vld [vmem:[%s4579_s26 + $0x74] sm:$0xf0]  ;;  %v4036_v58 = vld [vmem:[%s4579_s26 + $0x74] sm:$0xf] }
 0x18f   : > { %v2992_v59 = vor.u32 %v4037_v57, %v2991_v56  ;;  %v2993_v60 = vld [vmem:[%s4579_s26 + $0x78] sm:$0xf0]  ;;  %v2983_v61 = vld [vmem:[%s4579_s26 + $0x60] sm:$0xf]  ;;  %v4035_v62 = vld [vmem:[%s4579_s26 + $0x64] sm:$0xf0] }
 0x190   : > { %v2996_v63 = vor.u32 %v4036_v58, %v2993_v60  ;;  %v4034_v0 = vld [vmem:[%s4579_s26 + $0x64] sm:$0xf]  ;;  %v2985_v1 = vld [vmem:[%s4579_s26 + $0x68] sm:$0xf0]  ;;  %v2984_v2 = vor.u32 %v4035_v62, %v2983_v61  ;;  %v2975_v4 = vld [vmem:[%s4579_s26 + $0x50] sm:$0xf] }
 0x191   : > { %682 = vmatpush.bf16.msra.mxu0 %v2992_v59  ;;  %v2988_v3 = vor.u32 %v4034_v0, %v2985_v1  ;;  %v4033_v5 = vld [vmem:[%s4579_s26 + $0x54] sm:$0xf0]  ;;  %v4032_v6 = vld [vmem:[%s4579_s26 + $0x54] sm:$0xf]  ;;  %v2977_v7 = vld [vmem:[%s4579_s26 + $0x58] sm:$0xf0] }
 0x192   : > { %695 = vmatpush.bf16.msra.mxu1 %v2996_v63  ;;  %v2976_v8 = vor.u32 %v4033_v5, %v2975_v4  ;;  %v2980_v9 = vor.u32 %v4032_v6, %v2977_v7  ;;  %v2967_v10 = vld [vmem:[%s4579_s26 + $0x40] sm:$0xf]  ;;  %v4031_v11 = vld [vmem:[%s4579_s26 + $0x44] sm:$0xf0]  ;;  %v4030_v12 = vld [vmem:[%s4579_s26 + $0x44] sm:$0xf] }
 0x193   : > { %v2969_v13 = vld [vmem:[%s4579_s26 + $0x48] sm:$0xf0]  ;;  %v2968_v14 = vor.u32 %v4031_v11, %v2967_v10  ;;  %v2959_v16 = vld [vmem:[%s4579_s26 + $0x30] sm:$0xf]  ;;  %v4029_v17 = vld [vmem:[%s4579_s26 + $0x34] sm:$0xf0] }
 0x194   : > { %v2972_v15 = vor.u32 %v4030_v12, %v2969_v13  ;;  %v4028_v18 = vld [vmem:[%s4579_s26 + $0x34] sm:$0xf]  ;;  %v2961_v19 = vld [vmem:[%s4579_s26 + $0x38] sm:$0xf0]  ;;  %v2960_v20 = vor.u32 %v4029_v17, %v2959_v16  ;;  %v2951_v22 = vld [vmem:[%s4579_s26 + $0x20] sm:$0xf] }
 0x195   : > { %683 = vmatpush.bf16.msra.mxu0 %v2984_v2  ;;  %v2964_v21 = vor.u32 %v4028_v18, %v2961_v19  ;;  %v4027_v23 = vld [vmem:[%s4579_s26 + $0x24] sm:$0xf0]  ;;  %v4026_v24 = vld [vmem:[%s4579_s26 + $0x24] sm:$0xf]  ;;  %v2953_v25 = vld [vmem:[%s4579_s26 + $0x28] sm:$0xf0] }
 0x196   : > { %696 = vmatpush.bf16.msra.mxu1 %v2988_v3  ;;  %v2952_v26 = vor.u32 %v4027_v23, %v2951_v22  ;;  %s2930_s8 = sshll.u32 %s575_s30, 2  ;;  %v2956_v27 = vor.u32 %v4026_v24, %v2953_v25  ;;  %v2943_v28 = vld [vmem:[%s4579_s26 + $0x10] sm:$0xf]  ;;  %v4025_v29 = vld [vmem:[%s4579_s26 + $0x14] sm:$0xf0]  ;;  %vm711_vm3 = vcmask 1043456  }
 0x197   : > { %s577_s14 = scalar_lea.vmem %s5214_s2, %s2930_s8  ;;  %v4024_v30 = vld [vmem:[%s4579_s26 + $0x14] sm:$0xf]  ;;  %v2945_v31 = vld [vmem:[%s4579_s26 + $0x18] sm:$0xf0]  ;;  %v2944_v32 = vor.u32 %v4025_v29, %v2943_v28  ;;  %v2935_v35 = vld [vmem:[%s4579_s26] sm:$0xf] }
 0x198   : > { %v578_v33 = vld [vmem:[%s577_s14] sm:$0xf]  ;;  %v2948_v34 = vor.u32 %v4024_v30, %v2945_v31  ;;  %v4023_v36 = vld [vmem:[%s4579_s26 + $0x4] sm:$0xf0]  ;;  %v4022_v37 = vld [vmem:[%s4579_s26 + $0x4] sm:$0xf] }
 0x199   : > { %684 = vmatpush.bf16.msra.mxu0 %v2976_v8  ;;  %v2937_v38 = vld [vmem:[%s4579_s26 + $0x8] sm:$0xf0]  ;;  %v579_v39 = vmax.f32 %v578_v33, 0.0  ;;  %v2936_v40 = vor.u32 %v4023_v36, %v2935_v35  ;;  %v601_v45 = vld [vmem:[#allocation2 + $0x8] sm:$0xff] }
 0x19a   : > { %697 = vmatpush.bf16.msra.mxu1 %v2980_v9  ;;  %v2940_v41 = vor.u32 %v4022_v37, %v2937_v38 }
 0x19b   : > { %v580_v42 = vpack.c.bf16 %v579_v39, %v579_v39 }
 0x19d   : > { %685 = vmatpush.bf16.msra.mxu0 %v2968_v14 }
 0x19e   : > { %698 = vmatpush.bf16.msra.mxu1 %v2972_v15 }
 0x1a1   : > { %686 = vmatpush.bf16.msra.mxu0 %v2960_v20 }
 0x1a2   : > { %699 = vmatpush.bf16.msra.mxu1 %v2964_v21 }
 0x1a5   : > { %687 = vmatpush.bf16.msra.mxu0 %v2952_v26 }
 0x1a6   : > { %700 = vmatpush.bf16.msra.mxu1 %v2956_v27 }
 0x1a9   : > { %688 = vmatpush.bf16.msra.mxu0 %v2944_v32 }
 0x1aa   : > { %701 = vmatpush.bf16.msra.mxu1 %v2948_v34 }
 0x1ad   : > { %689 = vmatpush.bf16.msra.mxu0 %v2936_v40 }
 0x1ae   : > { %702 = vmatpush.bf16.msra.mxu1 %v2940_v41 }
 0x1b0   : > { %690 = vmatmul.bf16.vlgmr.msra.gmra.mxu0 %v580_v42 }
 0x1b1   : > { %703 = vmatmul.bf16.vlgmr.msra.gmra.mxu1 %v580_v42 }
 0x22d   : > { %v691_v43 = vpop.f32.mrf.mxu0 }
 0x22e   : > { %v704_v44 = vpop.f32.mrf.mxu1 }
 0x22f   : > { %v710_v46 = vrot.slane %v704_v44, 4 }
 0x231   : > { %v712_v47 = vsel %vm711_vm3, %v691_v43, %v710_v46 }
 0x232   : > { %v714_v48 = vadd.f32 %v712_v47, %v601_v45 }
 0x234   : > { %715 = vst [vmem:[#allocation2 + $0x8] sm:$0xff] %v714_v48 }
 0x235   : > { %v693_v49 = vpop.f32.mrf.mxu0 }
 0x236   : > { %v706_v50 = vpop.f32.mrf.mxu1 }
 0x237 PF: > { %p716_p1 = scmp.gt.s32.totalorder %s4479_s22, 1 }
 0x239   : > { %p717_p2 = pnand %p716_p1, %p272_p9 }
 0x23a   : > { %s2998_s15 = sshll.u32 (!%p717_p2), %s4481_s23, 7  ;;  %s721_s17 = smul.u32 (!%p717_p2), 15, %s4384_s9 }
 0x23b   : > { %720 = sbr.rel (%p717_p2) target bundleno = 745 (0x2e9), region = 64  ;;  %s4623_s16 = scalar_lea.vmem (!%p717_p2), [#allocation6], %s2998_s15 }
 0x23c   : > { %s722_s18 = sadd.s32 (!%p717_p2), 1, %s721_s17 }
 0x23d   : > { %s723_s19 = sld [smem:[#allocation5 + %s722_s18]] (!%p717_p2) }
 0x240   : > { %v3073_v51 = vld [vmem:[%s4623_s16 + $0xf0] sm:$0xf]  ;;  %v4053_v52 = vld [vmem:[%s4623_s16 + $0xf4] sm:$0xf0]  ;;  %v4052_v53 = vld [vmem:[%s4623_s16 + $0xf4] sm:$0xf] }
 0x241   : > { %v3074_v54 = vor.u32 %v4053_v52, %v3073_v51  ;;  %v3075_v55 = vld [vmem:[%s4623_s16 + $0xf8] sm:$0xf0]  ;;  %v3065_v56 = vld [vmem:[%s4623_s16 + $0xe0] sm:$0xf]  ;;  %v4051_v57 = vld [vmem:[%s4623_s16 + $0xe4] sm:$0xf0] }
 0x242   : > { %v3078_v58 = vor.u32 %v4052_v53, %v3075_v55  ;;  %v4050_v59 = vld [vmem:[%s4623_s16 + $0xe4] sm:$0xf]  ;;  %v3067_v60 = vld [vmem:[%s4623_s16 + $0xe8] sm:$0xf0]  ;;  %v3066_v61 = vor.u32 %v4051_v57, %v3065_v56  ;;  %v3057_v63 = vld [vmem:[%s4623_s16 + $0xd0] sm:$0xf] }
 0x243   : > { %830 = vmatpush.bf16.msra.mxu0 %v3074_v54  ;;  %v3070_v62 = vor.u32 %v4050_v59, %v3067_v60  ;;  %v4049_v0 = vld [vmem:[%s4623_s16 + $0xd4] sm:$0xf0]  ;;  %v4048_v1 = vld [vmem:[%s4623_s16 + $0xd4] sm:$0xf]  ;;  %v3059_v2 = vld [vmem:[%s4623_s16 + $0xd8] sm:$0xf0] }
 0x244   : > { %843 = vmatpush.bf16.msra.mxu1 %v3078_v58  ;;  %v3058_v3 = vor.u32 %v4049_v0, %v3057_v63  ;;  %v3062_v4 = vor.u32 %v4048_v1, %v3059_v2  ;;  %v3049_v5 = vld [vmem:[%s4623_s16 + $0xc0] sm:$0xf]  ;;  %v4047_v6 = vld [vmem:[%s4623_s16 + $0xc4] sm:$0xf0]  ;;  %v4046_v7 = vld [vmem:[%s4623_s16 + $0xc4] sm:$0xf] }
 0x245   : > { %v3051_v8 = vld [vmem:[%s4623_s16 + $0xc8] sm:$0xf0]  ;;  %v3050_v9 = vor.u32 %v4047_v6, %v3049_v5  ;;  %v3041_v11 = vld [vmem:[%s4623_s16 + $0xb0] sm:$0xf]  ;;  %v4045_v12 = vld [vmem:[%s4623_s16 + $0xb4] sm:$0xf0] }
 0x246   : > { %v3054_v10 = vor.u32 %v4046_v7, %v3051_v8  ;;  %v4044_v13 = vld [vmem:[%s4623_s16 + $0xb4] sm:$0xf]  ;;  %v3043_v14 = vld [vmem:[%s4623_s16 + $0xb8] sm:$0xf0]  ;;  %v3042_v15 = vor.u32 %v4045_v12, %v3041_v11  ;;  %v3033_v17 = vld [vmem:[%s4623_s16 + $0xa0] sm:$0xf] }
 0x247   : > { %831 = vmatpush.bf16.msra.mxu0 %v3066_v61  ;;  %v3046_v16 = vor.u32 %v4044_v13, %v3043_v14  ;;  %v4043_v18 = vld [vmem:[%s4623_s16 + $0xa4] sm:$0xf0]  ;;  %v4042_v19 = vld [vmem:[%s4623_s16 + $0xa4] sm:$0xf]  ;;  %v3035_v20 = vld [vmem:[%s4623_s16 + $0xa8] sm:$0xf0] }
 0x248   : > { %844 = vmatpush.bf16.msra.mxu1 %v3070_v62  ;;  %s2997_s20 = sshll.u32 %s723_s19, 2  ;;  %v3034_v21 = vor.u32 %v4043_v18, %v3033_v17  ;;  %v3038_v22 = vor.u32 %v4042_v19, %v3035_v20  ;;  %v3025_v23 = vld [vmem:[%s4623_s16 + $0x90] sm:$0xf]  ;;  %v4041_v24 = vld [vmem:[%s4623_s16 + $0x94] sm:$0xf0]  ;;  %vm859_vm4 = vcmask 1043456  }
 0x249   : > { %s725_s26 = scalar_lea.vmem %s5214_s2, %s2997_s20  ;;  %v4040_v25 = vld [vmem:[%s4623_s16 + $0x94] sm:$0xf]  ;;  %v3027_v26 = vld [vmem:[%s4623_s16 + $0x98] sm:$0xf0]  ;;  %v3026_v27 = vor.u32 %v4041_v24, %v3025_v23  ;;  %v3017_v30 = vld [vmem:[%s4623_s16 + $0x80] sm:$0xf] }
 0x24a   : > { %v726_v28 = vld [vmem:[%s725_s26] sm:$0xf]  ;;  %v3030_v29 = vor.u32 %v4040_v25, %v3027_v26  ;;  %v4039_v31 = vld [vmem:[%s4623_s16 + $0x84] sm:$0xf0]  ;;  %v4038_v32 = vld [vmem:[%s4623_s16 + $0x84] sm:$0xf] }
 0x24b   : > { %832 = vmatpush.bf16.msra.mxu0 %v3058_v3  ;;  %v3019_v33 = vld [vmem:[%s4623_s16 + $0x88] sm:$0xf0]  ;;  %v727_v34 = vmax.f32 %v726_v28, 0.0  ;;  %v3018_v35 = vor.u32 %v4039_v31, %v3017_v30  ;;  %v749_v40 = vld [vmem:[#allocation2 + $0x10] sm:$0xff] }
 0x24c   : > { %845 = vmatpush.bf16.msra.mxu1 %v3062_v4  ;;  %v3022_v36 = vor.u32 %v4038_v32, %v3019_v33 }
 0x24d   : > { %v728_v37 = vpack.c.bf16 %v727_v34, %v727_v34 }
 0x24f   : > { %833 = vmatpush.bf16.msra.mxu0 %v3050_v9 }
 0x250   : > { %846 = vmatpush.bf16.msra.mxu1 %v3054_v10 }
 0x253   : > { %834 = vmatpush.bf16.msra.mxu0 %v3042_v15 }
 0x254   : > { %847 = vmatpush.bf16.msra.mxu1 %v3046_v16 }
 0x257   : > { %835 = vmatpush.bf16.msra.mxu0 %v3034_v21 }
 0x258   : > { %848 = vmatpush.bf16.msra.mxu1 %v3038_v22 }
 0x25b   : > { %836 = vmatpush.bf16.msra.mxu0 %v3026_v27 }
 0x25c   : > { %849 = vmatpush.bf16.msra.mxu1 %v3030_v29 }
 0x25f   : > { %837 = vmatpush.bf16.msra.mxu0 %v3018_v35 }
 0x260   : > { %850 = vmatpush.bf16.msra.mxu1 %v3022_v36 }
 0x262   : > { %838 = vmatmul.bf16.vlgmr.msra.gmra.mxu0 %v728_v37 }
 0x263   : > { %851 = vmatmul.bf16.vlgmr.msra.gmra.mxu1 %v728_v37 }
 0x2df   : > { %v839_v38 = vpop.f32.mrf.mxu0 }
 0x2e0   : > { %v852_v39 = vpop.f32.mrf.mxu1 }
 0x2e1   : > { %v858_v41 = vrot.slane %v852_v39, 4 }
 0x2e3   : > { %v860_v42 = vsel %vm859_vm4, %v839_v38, %v858_v41 }
 0x2e4   : > { %v862_v43 = vadd.f32 %v860_v42, %v749_v40 }
 0x2e6   : > { %863 = vst [vmem:[#allocation2 + $0x10] sm:$0xff] %v862_v43 }
 0x2e7   : > { %v841_v44 = vpop.f32.mrf.mxu0 }
 0x2e8   : > { %v854_v45 = vpop.f32.mrf.mxu1 }
 0x2e9 PF: > { %p864_p3 = pnand %p716_p1, %p418_p11 }
 0x2ea   : > { %s3080_s27 = sshll.u32 (!%p864_p3), %s4481_s23, 7  ;;  %s868_s29 = smul.u32 (!%p864_p3), 3, %s4384_s9 }
 0x2eb   : > { %867 = sbr.rel (%p864_p3) target bundleno = 921 (0x399), region = 68  ;;  %s4666_s28 = scalar_lea.vmem (!%p864_p3), [#allocation6], %s3080_s27 }
 0x2ec   : > { %s869_s30 = sadd.s32 (!%p864_p3), 1, %s868_s29 }
 0x2ed   : > { %s870_s8 = smul.u32 (!%p864_p3), 5, %s869_s30 }
 0x2ef   : > { %s871_s12 = sadd.s32 (!%p864_p3), 1, %s870_s8 }
 0x2f0   : > { %v3155_v46 = vld [vmem:[%s4666_s28 + $0xf0] sm:$0xf]  ;;  %v4069_v47 = vld [vmem:[%s4666_s28 + $0xf4] sm:$0xf0]  ;;  %v4068_v48 = vld [vmem:[%s4666_s28 + $0xf4] sm:$0xf] }
 0x2f1   : > { %v3156_v49 = vor.u32 %v4069_v47, %v3155_v46  ;;  %v3157_v50 = vld [vmem:[%s4666_s28 + $0xf8] sm:$0xf0]  ;;  %v3147_v51 = vld [vmem:[%s4666_s28 + $0xe0] sm:$0xf]  ;;  %v4067_v52 = vld [vmem:[%s4666_s28 + $0xe4] sm:$0xf0] }
 0x2f2   : > { %v3160_v53 = vor.u32 %v4068_v48, %v3157_v50  ;;  %v4066_v54 = vld [vmem:[%s4666_s28 + $0xe4] sm:$0xf]  ;;  %v3149_v55 = vld [vmem:[%s4666_s28 + $0xe8] sm:$0xf0]  ;;  %v3148_v56 = vor.u32 %v4067_v52, %v3147_v51  ;;  %v3139_v58 = vld [vmem:[%s4666_s28 + $0xd0] sm:$0xf] }
 0x2f3   : > { %980 = vmatpush.bf16.msra.mxu0 %v3156_v49  ;;  %v3152_v57 = vor.u32 %v4066_v54, %v3149_v55  ;;  %v4065_v59 = vld [vmem:[%s4666_s28 + $0xd4] sm:$0xf0]  ;;  %v4064_v60 = vld [vmem:[%s4666_s28 + $0xd4] sm:$0xf]  ;;  %v3141_v61 = vld [vmem:[%s4666_s28 + $0xd8] sm:$0xf0] }
 0x2f4   : > { %993 = vmatpush.bf16.msra.mxu1 %v3160_v53  ;;  %v3140_v62 = vor.u32 %v4065_v59, %v3139_v58  ;;  %v3144_v63 = vor.u32 %v4064_v60, %v3141_v61  ;;  %v3131_v0 = vld [vmem:[%s4666_s28 + $0xc0] sm:$0xf]  ;;  %v4063_v1 = vld [vmem:[%s4666_s28 + $0xc4] sm:$0xf0]  ;;  %v4062_v2 = vld [vmem:[%s4666_s28 + $0xc4] sm:$0xf] }
 0x2f5   : > { %v3133_v3 = vld [vmem:[%s4666_s28 + $0xc8] sm:$0xf0]  ;;  %v3132_v4 = vor.u32 %v4063_v1, %v3131_v0  ;;  %v3123_v6 = vld [vmem:[%s4666_s28 + $0xb0] sm:$0xf]  ;;  %v4061_v7 = vld [vmem:[%s4666_s28 + $0xb4] sm:$0xf0] }
 0x2f6   : > { %v3136_v5 = vor.u32 %v4062_v2, %v3133_v3  ;;  %v4060_v8 = vld [vmem:[%s4666_s28 + $0xb4] sm:$0xf]  ;;  %v3125_v9 = vld [vmem:[%s4666_s28 + $0xb8] sm:$0xf0]  ;;  %s872_s13 = sld [smem:[#allocation5 + %s871_s12]]  ;;  %v3124_v10 = vor.u32 %v4061_v7, %v3123_v6  ;;  %vm1009_vm5 = vcmask 1043456  }
 0x2f7   : > { %981 = vmatpush.bf16.msra.mxu0 %v3148_v56  ;;  %v3128_v11 = vor.u32 %v4060_v8, %v3125_v9  ;;  %v3115_v12 = vld [vmem:[%s4666_s28 + $0xa0] sm:$0xf]  ;;  %v4059_v13 = vld [vmem:[%s4666_s28 + $0xa4] sm:$0xf0]  ;;  %v4058_v14 = vld [vmem:[%s4666_s28 + $0xa4] sm:$0xf] }
 0x2f8   : > { %994 = vmatpush.bf16.msra.mxu1 %v3152_v57  ;;  %v3117_v15 = vld [vmem:[%s4666_s28 + $0xa8] sm:$0xf0]  ;;  %v3116_v16 = vor.u32 %v4059_v13, %v3115_v12  ;;  %v3107_v18 = vld [vmem:[%s4666_s28 + $0x90] sm:$0xf]  ;;  %v4057_v19 = vld [vmem:[%s4666_s28 + $0x94] sm:$0xf0] }
 0x2f9   : > { %v3120_v17 = vor.u32 %v4058_v14, %v3117_v15  ;;  %v4056_v20 = vld [vmem:[%s4666_s28 + $0x94] sm:$0xf]  ;;  %v3109_v21 = vld [vmem:[%s4666_s28 + $0x98] sm:$0xf0]  ;;  %v3108_v22 = vor.u32 %v4057_v19, %v3107_v18  ;;  %v3099_v25 = vld [vmem:[%s4666_s28 + $0x80] sm:$0xf] }
 0x2fa   : > { %v3112_v24 = vor.u32 %v4056_v20, %v3109_v21  ;;  %v4055_v26 = vld [vmem:[%s4666_s28 + $0x84] sm:$0xf0]  ;;  %v4054_v27 = vld [vmem:[%s4666_s28 + $0x84] sm:$0xf]  ;;  %v3101_v28 = vld [vmem:[%s4666_s28 + $0x88] sm:$0xf0] }
 0x2fb   : > { %982 = vmatpush.bf16.msra.mxu0 %v3140_v62  ;;  %v3100_v30 = vor.u32 %v4055_v26, %v3099_v25  ;;  %v3104_v31 = vor.u32 %v4054_v27, %v3101_v28  ;;  %v899_v35 = vld [vmem:[#allocation2] sm:$0xff] }
 0x2fc   : > { %995 = vmatpush.bf16.msra.mxu1 %v3144_v63  ;;  %s3079_s14 = sshll.u32 %s872_s13, 2 }
 0x2fd   : > { %s874_s17 = scalar_lea.vmem %s5214_s2, %s3079_s14 }
 0x2fe   : > { %v875_v23 = vld [vmem:[%s874_s17] sm:$0xf] }
 0x2ff   : > { %983 = vmatpush.bf16.msra.mxu0 %v3132_v4  ;;  %v876_v29 = vmax.f32 %v875_v23, 0.0 }
 0x300   : > { %996 = vmatpush.bf16.msra.mxu1 %v3136_v5 }
 0x301   : > { %v877_v32 = vpack.c.bf16 %v876_v29, %v876_v29 }
 0x303   : > { %984 = vmatpush.bf16.msra.mxu0 %v3124_v10 }
 0x304   : > { %997 = vmatpush.bf16.msra.mxu1 %v3128_v11 }
 0x307   : > { %985 = vmatpush.bf16.msra.mxu0 %v3116_v16 }
 0x308   : > { %998 = vmatpush.bf16.msra.mxu1 %v3120_v17 }
 0x30b   : > { %986 = vmatpush.bf16.msra.mxu0 %v3108_v22 }
 0x30c   : > { %999 = vmatpush.bf16.msra.mxu1 %v3112_v24 }
 0x30f   : > { %987 = vmatpush.bf16.msra.mxu0 %v3100_v30 }
 0x310   : > { %1000 = vmatpush.bf16.msra.mxu1 %v3104_v31 }
 0x312   : > { %988 = vmatmul.bf16.vlgmr.msra.gmra.mxu0 %v877_v32 }
 0x313   : > { %1001 = vmatmul.bf16.vlgmr.msra.gmra.mxu1 %v877_v32 }
 0x38f   : > { %v989_v33 = vpop.f32.mrf.mxu0 }
 0x390   : > { %v1002_v34 = vpop.f32.mrf.mxu1 }
 0x391   : > { %v1008_v36 = vrot.slane %v1002_v34, 4 }
 0x393   : > { %v1010_v37 = vsel %vm1009_vm5, %v989_v33, %v1008_v36 }
 0x394   : > { %v1012_v38 = vadd.f32 %v1010_v37, %v899_v35 }
 0x396   : > { %1013 = vst [vmem:[#allocation2] sm:$0xff] %v1012_v38 }
 0x397   : > { %v991_v39 = vpop.f32.mrf.mxu0 }
 0x398   : > { %v1004_v40 = vpop.f32.mrf.mxu1 }
 0x399 PF: > { %p1014_p4 = pnand %p716_p1, %p567_p13 }
 0x39a   : > { %s3162_s18 = sshll.u32 (!%p1014_p4), %s4481_s23, 7  ;;  %s1018_s20 = smul.u32 (!%p1014_p4), 3, %s4384_s9 }
 0x39b   : > { %1017 = sbr.rel (%p1014_p4) target bundleno = 1097 (0x449), region = 72  ;;  %s4709_s19 = scalar_lea.vmem (!%p1014_p4), [#allocation6], %s3162_s18 }
 0x39c   : > { %s1019_s24 = sadd.s32 (!%p1014_p4), 2, %s1018_s20 }
 0x39d   : > { %s1020_s25 = smul.u32 (!%p1014_p4), 5, %s1019_s24 }
 0x39f   : > { %s1021_s26 = sadd.s32 (!%p1014_p4), 1, %s1020_s25 }
 0x3a0   : > { %v3237_v41 = vld [vmem:[%s4709_s19 + $0xf0] sm:$0xf]  ;;  %v4085_v42 = vld [vmem:[%s4709_s19 + $0xf4] sm:$0xf0]  ;;  %v4084_v43 = vld [vmem:[%s4709_s19 + $0xf4] sm:$0xf] }
 0x3a1   : > { %v3238_v44 = vor.u32 %v4085_v42, %v3237_v41  ;;  %v3239_v45 = vld [vmem:[%s4709_s19 + $0xf8] sm:$0xf0]  ;;  %v3229_v46 = vld [vmem:[%s4709_s19 + $0xe0] sm:$0xf]  ;;  %v4083_v47 = vld [vmem:[%s4709_s19 + $0xe4] sm:$0xf0] }
 0x3a2   : > { %v3242_v48 = vor.u32 %v4084_v43, %v3239_v45  ;;  %v4082_v49 = vld [vmem:[%s4709_s19 + $0xe4] sm:$0xf]  ;;  %v3231_v50 = vld [vmem:[%s4709_s19 + $0xe8] sm:$0xf0]  ;;  %v3230_v51 = vor.u32 %v4083_v47, %v3229_v46  ;;  %v3221_v53 = vld [vmem:[%s4709_s19 + $0xd0] sm:$0xf] }
 0x3a3   : > { %1130 = vmatpush.bf16.msra.mxu0 %v3238_v44  ;;  %v3234_v52 = vor.u32 %v4082_v49, %v3231_v50  ;;  %v4081_v54 = vld [vmem:[%s4709_s19 + $0xd4] sm:$0xf0]  ;;  %v4080_v55 = vld [vmem:[%s4709_s19 + $0xd4] sm:$0xf]  ;;  %v3223_v56 = vld [vmem:[%s4709_s19 + $0xd8] sm:$0xf0] }
 0x3a4   : > { %1143 = vmatpush.bf16.msra.mxu1 %v3242_v48  ;;  %v3222_v57 = vor.u32 %v4081_v54, %v3221_v53  ;;  %v3226_v58 = vor.u32 %v4080_v55, %v3223_v56  ;;  %v3213_v59 = vld [vmem:[%s4709_s19 + $0xc0] sm:$0xf]  ;;  %v4079_v60 = vld [vmem:[%s4709_s19 + $0xc4] sm:$0xf0]  ;;  %v4078_v61 = vld [vmem:[%s4709_s19 + $0xc4] sm:$0xf] }
 0x3a5   : > { %v3215_v62 = vld [vmem:[%s4709_s19 + $0xc8] sm:$0xf0]  ;;  %v3214_v63 = vor.u32 %v4079_v60, %v3213_v59  ;;  %v3205_v1 = vld [vmem:[%s4709_s19 + $0xb0] sm:$0xf]  ;;  %v4077_v2 = vld [vmem:[%s4709_s19 + $0xb4] sm:$0xf0] }
 0x3a6   : > { %v3218_v0 = vor.u32 %v4078_v61, %v3215_v62  ;;  %v4076_v3 = vld [vmem:[%s4709_s19 + $0xb4] sm:$0xf]  ;;  %v3207_v4 = vld [vmem:[%s4709_s19 + $0xb8] sm:$0xf0]  ;;  %s1022_s27 = sld [smem:[#allocation5 + %s1021_s26]]  ;;  %v3206_v5 = vor.u32 %v4077_v2, %v3205_v1  ;;  %vm1159_vm6 = vcmask 1043456  }
 0x3a7   : > { %1131 = vmatpush.bf16.msra.mxu0 %v3230_v51  ;;  %v3210_v6 = vor.u32 %v4076_v3, %v3207_v4  ;;  %v3197_v7 = vld [vmem:[%s4709_s19 + $0xa0] sm:$0xf]  ;;  %v4075_v8 = vld [vmem:[%s4709_s19 + $0xa4] sm:$0xf0]  ;;  %v4074_v9 = vld [vmem:[%s4709_s19 + $0xa4] sm:$0xf] }
 0x3a8   : > { %1144 = vmatpush.bf16.msra.mxu1 %v3234_v52  ;;  %v3199_v10 = vld [vmem:[%s4709_s19 + $0xa8] sm:$0xf0]  ;;  %v3198_v11 = vor.u32 %v4075_v8, %v3197_v7  ;;  %v3189_v13 = vld [vmem:[%s4709_s19 + $0x90] sm:$0xf]  ;;  %v4073_v14 = vld [vmem:[%s4709_s19 + $0x94] sm:$0xf0] }
 0x3a9   : > { %v3202_v12 = vor.u32 %v4074_v9, %v3199_v10  ;;  %v4072_v15 = vld [vmem:[%s4709_s19 + $0x94] sm:$0xf]  ;;  %v3191_v16 = vld [vmem:[%s4709_s19 + $0x98] sm:$0xf0]  ;;  %v3190_v17 = vor.u32 %v4073_v14, %v3189_v13  ;;  %v3181_v20 = vld [vmem:[%s4709_s19 + $0x80] sm:$0xf] }
 0x3aa   : > { %v3194_v19 = vor.u32 %v4072_v15, %v3191_v16  ;;  %v4071_v21 = vld [vmem:[%s4709_s19 + $0x84] sm:$0xf0]  ;;  %v4070_v22 = vld [vmem:[%s4709_s19 + $0x84] sm:$0xf]  ;;  %v3183_v23 = vld [vmem:[%s4709_s19 + $0x88] sm:$0xf0] }
 0x3ab   : > { %1132 = vmatpush.bf16.msra.mxu0 %v3222_v57  ;;  %v3182_v25 = vor.u32 %v4071_v21, %v3181_v20  ;;  %v3186_v26 = vor.u32 %v4070_v22, %v3183_v23  ;;  %v1049_v30 = vld [vmem:[#allocation2 + $0x8] sm:$0xff] }
 0x3ac   : > { %1145 = vmatpush.bf16.msra.mxu1 %v3226_v58  ;;  %s3161_s28 = sshll.u32 %s1022_s27, 2 }
 0x3ad   : > { %s1024_s8 = scalar_lea.vmem %s5214_s2, %s3161_s28 }
 0x3ae   : > { %v1025_v18 = vld [vmem:[%s1024_s8] sm:$0xf] }
 0x3af   : > { %1133 = vmatpush.bf16.msra.mxu0 %v3214_v63  ;;  %v1026_v24 = vmax.f32 %v1025_v18, 0.0 }
 0x3b0   : > { %1146 = vmatpush.bf16.msra.mxu1 %v3218_v0 }
 0x3b1   : > { %v1027_v27 = vpack.c.bf16 %v1026_v24, %v1026_v24 }
 0x3b3   : > { %1134 = vmatpush.bf16.msra.mxu0 %v3206_v5 }
 0x3b4   : > { %1147 = vmatpush.bf16.msra.mxu1 %v3210_v6 }
 0x3b7   : > { %1135 = vmatpush.bf16.msra.mxu0 %v3198_v11 }
 0x3b8   : > { %1148 = vmatpush.bf16.msra.mxu1 %v3202_v12 }
 0x3bb   : > { %1136 = vmatpush.bf16.msra.mxu0 %v3190_v17 }
 0x3bc   : > { %1149 = vmatpush.bf16.msra.mxu1 %v3194_v19 }
 0x3bf   : > { %1137 = vmatpush.bf16.msra.mxu0 %v3182_v25 }
 0x3c0   : > { %1150 = vmatpush.bf16.msra.mxu1 %v3186_v26 }
 0x3c2   : > { %1138 = vmatmul.bf16.vlgmr.msra.gmra.mxu0 %v1027_v27 }
 0x3c3   : > { %1151 = vmatmul.bf16.vlgmr.msra.gmra.mxu1 %v1027_v27 }
 0x43f   : > { %v1139_v28 = vpop.f32.mrf.mxu0 }
 0x440   : > { %v1152_v29 = vpop.f32.mrf.mxu1 }
 0x441   : > { %v1158_v31 = vrot.slane %v1152_v29, 4 }
 0x443   : > { %v1160_v32 = vsel %vm1159_vm6, %v1139_v28, %v1158_v31 }
 0x444   : > { %v1162_v33 = vadd.f32 %v1160_v32, %v1049_v30 }
 0x446   : > { %1163 = vst [vmem:[#allocation2 + $0x8] sm:$0xff] %v1162_v33 }
 0x447   : > { %v1141_v34 = vpop.f32.mrf.mxu0 }
 0x448   : > { %v1154_v35 = vpop.f32.mrf.mxu1 }
 0x449 PF: > { %p1164_p5 = scmp.gt.s32.totalorder %s4479_s22, 2 }
 0x44b   : > { %p1165_p6 = pnand %p1164_p5, %p272_p9 }
 0x44c   : > { %s3244_s12 = sshll.u32 (!%p1165_p6), %s4481_s23, 7  ;;  %s1169_s14 = smul.u32 (!%p1165_p6), 15, %s4384_s9 }
 0x44d   : > { %1168 = sbr.rel (%p1165_p6) target bundleno = 1275 (0x4fb), region = 76  ;;  %s4753_s13 = scalar_lea.vmem (!%p1165_p6), [#allocation6], %s3244_s12 }
 0x44e   : > { %s1170_s15 = sadd.s32 (!%p1165_p6), 2, %s1169_s14 }
 0x44f   : > { %s1171_s16 = sld [smem:[#allocation5 + %s1170_s15]] (!%p1165_p6) }
 0x452   : > { %v3319_v36 = vld [vmem:[%s4753_s13 + $0x170] sm:$0xf]  ;;  %v4101_v37 = vld [vmem:[%s4753_s13 + $0x174] sm:$0xf0]  ;;  %v4100_v38 = vld [vmem:[%s4753_s13 + $0x174] sm:$0xf] }
 0x453   : > { %v3320_v39 = vor.u32 %v4101_v37, %v3319_v36  ;;  %v3321_v40 = vld [vmem:[%s4753_s13 + $0x178] sm:$0xf0]  ;;  %v3311_v41 = vld [vmem:[%s4753_s13 + $0x160] sm:$0xf]  ;;  %v4099_v42 = vld [vmem:[%s4753_s13 + $0x164] sm:$0xf0] }
 0x454   : > { %v3324_v43 = vor.u32 %v4100_v38, %v3321_v40  ;;  %v4098_v44 = vld [vmem:[%s4753_s13 + $0x164] sm:$0xf]  ;;  %v3313_v45 = vld [vmem:[%s4753_s13 + $0x168] sm:$0xf0]  ;;  %v3312_v46 = vor.u32 %v4099_v42, %v3311_v41  ;;  %v3303_v48 = vld [vmem:[%s4753_s13 + $0x150] sm:$0xf] }
 0x455   : > { %1278 = vmatpush.bf16.msra.mxu0 %v3320_v39  ;;  %v3316_v47 = vor.u32 %v4098_v44, %v3313_v45  ;;  %v4097_v49 = vld [vmem:[%s4753_s13 + $0x154] sm:$0xf0]  ;;  %v4096_v50 = vld [vmem:[%s4753_s13 + $0x154] sm:$0xf]  ;;  %v3305_v51 = vld [vmem:[%s4753_s13 + $0x158] sm:$0xf0] }
 0x456   : > { %1291 = vmatpush.bf16.msra.mxu1 %v3324_v43  ;;  %v3304_v52 = vor.u32 %v4097_v49, %v3303_v48  ;;  %v3308_v53 = vor.u32 %v4096_v50, %v3305_v51  ;;  %v3295_v54 = vld [vmem:[%s4753_s13 + $0x140] sm:$0xf]  ;;  %v4095_v55 = vld [vmem:[%s4753_s13 + $0x144] sm:$0xf0]  ;;  %v4094_v56 = vld [vmem:[%s4753_s13 + $0x144] sm:$0xf] }
 0x457   : > { %v3297_v57 = vld [vmem:[%s4753_s13 + $0x148] sm:$0xf0]  ;;  %v3296_v58 = vor.u32 %v4095_v55, %v3295_v54  ;;  %v3287_v60 = vld [vmem:[%s4753_s13 + $0x130] sm:$0xf]  ;;  %v4093_v61 = vld [vmem:[%s4753_s13 + $0x134] sm:$0xf0] }
 0x458   : > { %v3300_v59 = vor.u32 %v4094_v56, %v3297_v57  ;;  %v4092_v62 = vld [vmem:[%s4753_s13 + $0x134] sm:$0xf]  ;;  %v3289_v63 = vld [vmem:[%s4753_s13 + $0x138] sm:$0xf0]  ;;  %v3288_v0 = vor.u32 %v4093_v61, %v3287_v60  ;;  %v3279_v2 = vld [vmem:[%s4753_s13 + $0x120] sm:$0xf] }
 0x459   : > { %1279 = vmatpush.bf16.msra.mxu0 %v3312_v46  ;;  %v3292_v1 = vor.u32 %v4092_v62, %v3289_v63  ;;  %v4091_v3 = vld [vmem:[%s4753_s13 + $0x124] sm:$0xf0]  ;;  %v4090_v4 = vld [vmem:[%s4753_s13 + $0x124] sm:$0xf]  ;;  %v3281_v5 = vld [vmem:[%s4753_s13 + $0x128] sm:$0xf0] }
 0x45a   : > { %1292 = vmatpush.bf16.msra.mxu1 %v3316_v47  ;;  %s3243_s17 = sshll.u32 %s1171_s16, 2  ;;  %v3280_v6 = vor.u32 %v4091_v3, %v3279_v2  ;;  %v3284_v7 = vor.u32 %v4090_v4, %v3281_v5  ;;  %v3271_v8 = vld [vmem:[%s4753_s13 + $0x110] sm:$0xf]  ;;  %v4089_v9 = vld [vmem:[%s4753_s13 + $0x114] sm:$0xf0]  ;;  %vm1307_vm7 = vcmask 1043456  }
 0x45b   : > { %s1173_s20 = scalar_lea.vmem %s5214_s2, %s3243_s17  ;;  %v4088_v10 = vld [vmem:[%s4753_s13 + $0x114] sm:$0xf]  ;;  %v3273_v11 = vld [vmem:[%s4753_s13 + $0x118] sm:$0xf0]  ;;  %v3272_v12 = vor.u32 %v4089_v9, %v3271_v8  ;;  %v3263_v15 = vld [vmem:[%s4753_s13 + $0x100] sm:$0xf] }
 0x45c   : > { %v1174_v13 = vld [vmem:[%s1173_s20] sm:$0xf]  ;;  %v3276_v14 = vor.u32 %v4088_v10, %v3273_v11  ;;  %v4087_v16 = vld [vmem:[%s4753_s13 + $0x104] sm:$0xf0]  ;;  %v4086_v17 = vld [vmem:[%s4753_s13 + $0x104] sm:$0xf] }
 0x45d   : > { %1280 = vmatpush.bf16.msra.mxu0 %v3304_v52  ;;  %v3265_v18 = vld [vmem:[%s4753_s13 + $0x108] sm:$0xf0]  ;;  %v1175_v19 = vmax.f32 %v1174_v13, 0.0  ;;  %v3264_v20 = vor.u32 %v4087_v16, %v3263_v15  ;;  %v1197_v25 = vld [vmem:[#allocation2 + $0x10] sm:$0xff] }
 0x45e   : > { %1293 = vmatpush.bf16.msra.mxu1 %v3308_v53  ;;  %v3268_v21 = vor.u32 %v4086_v17, %v3265_v18 }
 0x45f   : > { %v1176_v22 = vpack.c.bf16 %v1175_v19, %v1175_v19 }
 0x461   : > { %1281 = vmatpush.bf16.msra.mxu0 %v3296_v58 }
 0x462   : > { %1294 = vmatpush.bf16.msra.mxu1 %v3300_v59 }
 0x465   : > { %1282 = vmatpush.bf16.msra.mxu0 %v3288_v0 }
 0x466   : > { %1295 = vmatpush.bf16.msra.mxu1 %v3292_v1 }
 0x469   : > { %1283 = vmatpush.bf16.msra.mxu0 %v3280_v6 }
 0x46a   : > { %1296 = vmatpush.bf16.msra.mxu1 %v3284_v7 }
 0x46d   : > { %1284 = vmatpush.bf16.msra.mxu0 %v3272_v12 }
 0x46e   : > { %1297 = vmatpush.bf16.msra.mxu1 %v3276_v14 }
 0x471   : > { %1285 = vmatpush.bf16.msra.mxu0 %v3264_v20 }
 0x472   : > { %1298 = vmatpush.bf16.msra.mxu1 %v3268_v21 }
 0x474   : > { %1286 = vmatmul.bf16.vlgmr.msra.gmra.mxu0 %v1176_v22 }
 0x475   : > { %1299 = vmatmul.bf16.vlgmr.msra.gmra.mxu1 %v1176_v22 }
 0x4f1   : > { %v1287_v23 = vpop.f32.mrf.mxu0 }
 0x4f2   : > { %v1300_v24 = vpop.f32.mrf.mxu1 }
 0x4f3   : > { %v1306_v26 = vrot.slane %v1300_v24, 4 }
 0x4f5   : > { %v1308_v27 = vsel %vm1307_vm7, %v1287_v23, %v1306_v26 }
 0x4f6   : > { %v1310_v28 = vadd.f32 %v1308_v27, %v1197_v25 }
 0x4f8   : > { %1311 = vst [vmem:[#allocation2 + $0x10] sm:$0xff] %v1310_v28 }
 0x4f9   : > { %v1289_v29 = vpop.f32.mrf.mxu0 }
 0x4fa   : > { %v1302_v30 = vpop.f32.mrf.mxu1 }
 0x4fb PF: > { %p1312_p7 = pnand %p1164_p5, %p418_p11 }
 0x4fc   : > { %s3326_s24 = sshll.u32 (!%p1312_p7), %s4481_s23, 7  ;;  %s1316_s26 = smul.u32 (!%p1312_p7), 3, %s4384_s9 }
 0x4fd   : > { %1315 = sbr.rel (%p1312_p7) target bundleno = 1451 (0x5ab), region = 80  ;;  %s4796_s25 = scalar_lea.vmem (!%p1312_p7), [#allocation6], %s3326_s24 }
 0x4fe   : > { %s1317_s27 = sadd.s32 (!%p1312_p7), 1, %s1316_s26 }
 0x4ff   : > { %s1318_s28 = smul.u32 (!%p1312_p7), 5, %s1317_s27 }
 0x501   : > { %s1319_s29 = sadd.s32 (!%p1312_p7), 2, %s1318_s28 }
 0x502   : > { %v3401_v31 = vld [vmem:[%s4796_s25 + $0x170] sm:$0xf]  ;;  %v4117_v32 = vld [vmem:[%s4796_s25 + $0x174] sm:$0xf0]  ;;  %v4116_v33 = vld [vmem:[%s4796_s25 + $0x174] sm:$0xf] }
 0x503   : > { %v3402_v34 = vor.u32 %v4117_v32, %v3401_v31  ;;  %v3403_v35 = vld [vmem:[%s4796_s25 + $0x178] sm:$0xf0]  ;;  %v3393_v36 = vld [vmem:[%s4796_s25 + $0x160] sm:$0xf]  ;;  %v4115_v37 = vld [vmem:[%s4796_s25 + $0x164] sm:$0xf0] }
 0x504   : > { %v3406_v38 = vor.u32 %v4116_v33, %v3403_v35  ;;  %v4114_v39 = vld [vmem:[%s4796_s25 + $0x164] sm:$0xf]  ;;  %v3395_v40 = vld [vmem:[%s4796_s25 + $0x168] sm:$0xf0]  ;;  %v3394_v41 = vor.u32 %v4115_v37, %v3393_v36  ;;  %v3385_v43 = vld [vmem:[%s4796_s25 + $0x150] sm:$0xf] }
 0x505   : > { %1428 = vmatpush.bf16.msra.mxu0 %v3402_v34  ;;  %v3398_v42 = vor.u32 %v4114_v39, %v3395_v40  ;;  %v4113_v44 = vld [vmem:[%s4796_s25 + $0x154] sm:$0xf0]  ;;  %v4112_v45 = vld [vmem:[%s4796_s25 + $0x154] sm:$0xf]  ;;  %v3387_v46 = vld [vmem:[%s4796_s25 + $0x158] sm:$0xf0] }
 0x506   : > { %1441 = vmatpush.bf16.msra.mxu1 %v3406_v38  ;;  %v3386_v47 = vor.u32 %v4113_v44, %v3385_v43  ;;  %v3390_v48 = vor.u32 %v4112_v45, %v3387_v46  ;;  %v3377_v49 = vld [vmem:[%s4796_s25 + $0x140] sm:$0xf]  ;;  %v4111_v50 = vld [vmem:[%s4796_s25 + $0x144] sm:$0xf0]  ;;  %v4110_v51 = vld [vmem:[%s4796_s25 + $0x144] sm:$0xf] }
 0x507   : > { %v3379_v52 = vld [vmem:[%s4796_s25 + $0x148] sm:$0xf0]  ;;  %v3378_v53 = vor.u32 %v4111_v50, %v3377_v49  ;;  %v3369_v55 = vld [vmem:[%s4796_s25 + $0x130] sm:$0xf]  ;;  %v4109_v56 = vld [vmem:[%s4796_s25 + $0x134] sm:$0xf0] }
 0x508   : > { %v3382_v54 = vor.u32 %v4110_v51, %v3379_v52  ;;  %v4108_v57 = vld [vmem:[%s4796_s25 + $0x134] sm:$0xf]  ;;  %v3371_v58 = vld [vmem:[%s4796_s25 + $0x138] sm:$0xf0]  ;;  %s1320_s30 = sld [smem:[#allocation5 + %s1319_s29]]  ;;  %v3370_v59 = vor.u32 %v4109_v56, %v3369_v55  ;;  %vm1457_vm8 = vcmask 1043456  }
 0x509   : > { %1429 = vmatpush.bf16.msra.mxu0 %v3394_v41  ;;  %v3374_v60 = vor.u32 %v4108_v57, %v3371_v58  ;;  %v3361_v61 = vld [vmem:[%s4796_s25 + $0x120] sm:$0xf]  ;;  %v4107_v62 = vld [vmem:[%s4796_s25 + $0x124] sm:$0xf0]  ;;  %v4106_v63 = vld [vmem:[%s4796_s25 + $0x124] sm:$0xf] }
 0x50a   : > { %1442 = vmatpush.bf16.msra.mxu1 %v3398_v42  ;;  %v3363_v0 = vld [vmem:[%s4796_s25 + $0x128] sm:$0xf0]  ;;  %v3362_v1 = vor.u32 %v4107_v62, %v3361_v61  ;;  %v3353_v3 = vld [vmem:[%s4796_s25 + $0x110] sm:$0xf]  ;;  %v4105_v4 = vld [vmem:[%s4796_s25 + $0x114] sm:$0xf0] }
 0x50b   : > { %v3366_v2 = vor.u32 %v4106_v63, %v3363_v0  ;;  %v4104_v5 = vld [vmem:[%s4796_s25 + $0x114] sm:$0xf]  ;;  %v3355_v6 = vld [vmem:[%s4796_s25 + $0x118] sm:$0xf0]  ;;  %v3354_v7 = vor.u32 %v4105_v4, %v3353_v3  ;;  %v3345_v10 = vld [vmem:[%s4796_s25 + $0x100] sm:$0xf] }
 0x50c   : > { %v3358_v9 = vor.u32 %v4104_v5, %v3355_v6  ;;  %v4103_v11 = vld [vmem:[%s4796_s25 + $0x104] sm:$0xf0]  ;;  %v4102_v12 = vld [vmem:[%s4796_s25 + $0x104] sm:$0xf]  ;;  %v3347_v13 = vld [vmem:[%s4796_s25 + $0x108] sm:$0xf0] }
 0x50d   : > { %1430 = vmatpush.bf16.msra.mxu0 %v3386_v47  ;;  %v3346_v15 = vor.u32 %v4103_v11, %v3345_v10  ;;  %v3350_v16 = vor.u32 %v4102_v12, %v3347_v13  ;;  %v1347_v20 = vld [vmem:[#allocation2] sm:$0xff] }
 0x50e   : > { %1443 = vmatpush.bf16.msra.mxu1 %v3390_v48  ;;  %s3325_s8 = sshll.u32 %s1320_s30, 2 }
 0x50f   : > { %s1322_s14 = scalar_lea.vmem %s5214_s2, %s3325_s8 }
 0x510   : > { %v1323_v8 = vld [vmem:[%s1322_s14] sm:$0xf] }
 0x511   : > { %1431 = vmatpush.bf16.msra.mxu0 %v3378_v53  ;;  %v1324_v14 = vmax.f32 %v1323_v8, 0.0 }
 0x512   : > { %1444 = vmatpush.bf16.msra.mxu1 %v3382_v54 }
 0x513   : > { %v1325_v17 = vpack.c.bf16 %v1324_v14, %v1324_v14 }
 0x515   : > { %1432 = vmatpush.bf16.msra.mxu0 %v3370_v59 }
 0x516   : > { %1445 = vmatpush.bf16.msra.mxu1 %v3374_v60 }
 0x519   : > { %1433 = vmatpush.bf16.msra.mxu0 %v3362_v1 }
 0x51a   : > { %1446 = vmatpush.bf16.msra.mxu1 %v3366_v2 }
 0x51d   : > { %1434 = vmatpush.bf16.msra.mxu0 %v3354_v7 }
 0x51e   : > { %1447 = vmatpush.bf16.msra.mxu1 %v3358_v9 }
 0x521   : > { %1435 = vmatpush.bf16.msra.mxu0 %v3346_v15 }
 0x522   : > { %1448 = vmatpush.bf16.msra.mxu1 %v3350_v16 }
 0x524   : > { %1436 = vmatmul.bf16.vlgmr.msra.gmra.mxu0 %v1325_v17 }
 0x525   : > { %1449 = vmatmul.bf16.vlgmr.msra.gmra.mxu1 %v1325_v17 }
 0x5a1   : > { %v1437_v18 = vpop.f32.mrf.mxu0 }
 0x5a2   : > { %v1450_v19 = vpop.f32.mrf.mxu1 }
 0x5a3   : > { %v1456_v21 = vrot.slane %v1450_v19, 4 }
 0x5a5   : > { %v1458_v22 = vsel %vm1457_vm8, %v1437_v18, %v1456_v21 }
 0x5a6   : > { %v1460_v23 = vadd.f32 %v1458_v22, %v1347_v20 }
 0x5a8   : > { %1461 = vst [vmem:[#allocation2] sm:$0xff] %v1460_v23 }
 0x5a9   : > { %v1439_v24 = vpop.f32.mrf.mxu0 }
 0x5aa   : > { %v1452_v25 = vpop.f32.mrf.mxu1 }
 0x5ab PF: > { %p1462_p8 = pnand %p1164_p5, %p567_p13 }
 0x5ac   : > { %s3408_s15 = sshll.u32 (!%p1462_p8), %s4481_s23, 7  ;;  %s1466_s17 = smul.u32 (!%p1462_p8), 3, %s4384_s9 }
 0x5ad   : > { %1465 = sbr.rel (%p1462_p8) target bundleno = 1627 (0x65b), region = 84  ;;  %s4839_s16 = scalar_lea.vmem (!%p1462_p8), [#allocation6], %s3408_s15 }
 0x5ae   : > { %s1467_s18 = sadd.s32 (!%p1462_p8), 2, %s1466_s17 }
 0x5af   : > { %s1468_s19 = smul.u32 (!%p1462_p8), 5, %s1467_s18 }
 0x5b1   : > { %s1469_s20 = sadd.s32 (!%p1462_p8), 2, %s1468_s19 }
 0x5b2   : > { %v3483_v26 = vld [vmem:[%s4839_s16 + $0x170] sm:$0xf]  ;;  %v4133_v27 = vld [vmem:[%s4839_s16 + $0x174] sm:$0xf0]  ;;  %v4132_v28 = vld [vmem:[%s4839_s16 + $0x174] sm:$0xf] }
 0x5b3   : > { %v3484_v29 = vor.u32 %v4133_v27, %v3483_v26  ;;  %v3485_v30 = vld [vmem:[%s4839_s16 + $0x178] sm:$0xf0]  ;;  %v3475_v31 = vld [vmem:[%s4839_s16 + $0x160] sm:$0xf]  ;;  %v4131_v32 = vld [vmem:[%s4839_s16 + $0x164] sm:$0xf0] }
 0x5b4   : > { %v3488_v33 = vor.u32 %v4132_v28, %v3485_v30  ;;  %v4130_v34 = vld [vmem:[%s4839_s16 + $0x164] sm:$0xf]  ;;  %v3477_v35 = vld [vmem:[%s4839_s16 + $0x168] sm:$0xf0]  ;;  %v3476_v36 = vor.u32 %v4131_v32, %v3475_v31  ;;  %v3467_v38 = vld [vmem:[%s4839_s16 + $0x150] sm:$0xf] }
 0x5b5   : > { %1578 = vmatpush.bf16.msra.mxu0 %v3484_v29  ;;  %v3480_v37 = vor.u32 %v4130_v34, %v3477_v35  ;;  %v4129_v39 = vld [vmem:[%s4839_s16 + $0x154] sm:$0xf0]  ;;  %v4128_v40 = vld [vmem:[%s4839_s16 + $0x154] sm:$0xf]  ;;  %v3469_v41 = vld [vmem:[%s4839_s16 + $0x158] sm:$0xf0] }
 0x5b6   : > { %1591 = vmatpush.bf16.msra.mxu1 %v3488_v33  ;;  %v3468_v42 = vor.u32 %v4129_v39, %v3467_v38  ;;  %v3472_v43 = vor.u32 %v4128_v40, %v3469_v41  ;;  %v3459_v44 = vld [vmem:[%s4839_s16 + $0x140] sm:$0xf]  ;;  %v4127_v45 = vld [vmem:[%s4839_s16 + $0x144] sm:$0xf0]  ;;  %v4126_v46 = vld [vmem:[%s4839_s16 + $0x144] sm:$0xf] }
 0x5b7   : > { %v3461_v47 = vld [vmem:[%s4839_s16 + $0x148] sm:$0xf0]  ;;  %v3460_v48 = vor.u32 %v4127_v45, %v3459_v44  ;;  %v3451_v50 = vld [vmem:[%s4839_s16 + $0x130] sm:$0xf]  ;;  %v4125_v51 = vld [vmem:[%s4839_s16 + $0x134] sm:$0xf0] }
 0x5b8   : > { %v3464_v49 = vor.u32 %v4126_v46, %v3461_v47  ;;  %v4124_v52 = vld [vmem:[%s4839_s16 + $0x134] sm:$0xf]  ;;  %v3453_v53 = vld [vmem:[%s4839_s16 + $0x138] sm:$0xf0]  ;;  %s1470_s24 = sld [smem:[#allocation5 + %s1469_s20]]  ;;  %v3452_v54 = vor.u32 %v4125_v51, %v3451_v50  ;;  %vm1607_vm9 = vcmask 1043456  }
 0x5b9   : > { %1579 = vmatpush.bf16.msra.mxu0 %v3476_v36  ;;  %v3456_v55 = vor.u32 %v4124_v52, %v3453_v53  ;;  %v3443_v56 = vld [vmem:[%s4839_s16 + $0x120] sm:$0xf]  ;;  %v4123_v57 = vld [vmem:[%s4839_s16 + $0x124] sm:$0xf0]  ;;  %v4122_v58 = vld [vmem:[%s4839_s16 + $0x124] sm:$0xf] }
 0x5ba   : > { %1592 = vmatpush.bf16.msra.mxu1 %v3480_v37  ;;  %v3445_v59 = vld [vmem:[%s4839_s16 + $0x128] sm:$0xf0]  ;;  %v3444_v60 = vor.u32 %v4123_v57, %v3443_v56  ;;  %v3435_v62 = vld [vmem:[%s4839_s16 + $0x110] sm:$0xf]  ;;  %v4121_v63 = vld [vmem:[%s4839_s16 + $0x114] sm:$0xf0] }
 0x5bb   : > { %v3448_v61 = vor.u32 %v4122_v58, %v3445_v59  ;;  %v4120_v0 = vld [vmem:[%s4839_s16 + $0x114] sm:$0xf]  ;;  %v3437_v1 = vld [vmem:[%s4839_s16 + $0x118] sm:$0xf0]  ;;  %v3436_v2 = vor.u32 %v4121_v63, %v3435_v62  ;;  %v3427_v5 = vld [vmem:[%s4839_s16 + $0x100] sm:$0xf] }
 0x5bc   : > { %v3440_v4 = vor.u32 %v4120_v0, %v3437_v1  ;;  %v4119_v6 = vld [vmem:[%s4839_s16 + $0x104] sm:$0xf0]  ;;  %v4118_v7 = vld [vmem:[%s4839_s16 + $0x104] sm:$0xf]  ;;  %v3429_v8 = vld [vmem:[%s4839_s16 + $0x108] sm:$0xf0] }
 0x5bd   : > { %1580 = vmatpush.bf16.msra.mxu0 %v3468_v42  ;;  %v3428_v10 = vor.u32 %v4119_v6, %v3427_v5  ;;  %v3432_v11 = vor.u32 %v4118_v7, %v3429_v8  ;;  %v1497_v15 = vld [vmem:[#allocation2 + $0x8] sm:$0xff] }
 0x5be   : > { %1593 = vmatpush.bf16.msra.mxu1 %v3472_v43  ;;  %s3407_s25 = sshll.u32 %s1470_s24, 2 }
 0x5bf   : > { %s1472_s28 = scalar_lea.vmem %s5214_s2, %s3407_s25 }
 0x5c0   : > { %v1473_v3 = vld [vmem:[%s1472_s28] sm:$0xf] }
 0x5c1   : > { %1581 = vmatpush.bf16.msra.mxu0 %v3460_v48  ;;  %v1474_v9 = vmax.f32 %v1473_v3, 0.0 }
 0x5c2   : > { %1594 = vmatpush.bf16.msra.mxu1 %v3464_v49 }
 0x5c3   : > { %v1475_v12 = vpack.c.bf16 %v1474_v9, %v1474_v9 }
 0x5c5   : > { %1582 = vmatpush.bf16.msra.mxu0 %v3452_v54 }
 0x5c6   : > { %1595 = vmatpush.bf16.msra.mxu1 %v3456_v55 }
 0x5c9   : > { %1583 = vmatpush.bf16.msra.mxu0 %v3444_v60 }
 0x5ca   : > { %1596 = vmatpush.bf16.msra.mxu1 %v3448_v61 }
 0x5cd   : > { %1584 = vmatpush.bf16.msra.mxu0 %v3436_v2 }
 0x5ce   : > { %1597 = vmatpush.bf16.msra.mxu1 %v3440_v4 }
 0x5d1   : > { %1585 = vmatpush.bf16.msra.mxu0 %v3428_v10 }
 0x5d2   : > { %1598 = vmatpush.bf16.msra.mxu1 %v3432_v11 }
 0x5d4   : > { %1586 = vmatmul.bf16.vlgmr.msra.gmra.mxu0 %v1475_v12 }
 0x5d5   : > { %1599 = vmatmul.bf16.vlgmr.msra.gmra.mxu1 %v1475_v12 }
 0x651   : > { %v1587_v13 = vpop.f32.mrf.mxu0 }
 0x652   : > { %v1600_v14 = vpop.f32.mrf.mxu1 }
 0x653   : > { %v1606_v16 = vrot.slane %v1600_v14, 4 }
 0x655   : > { %v1608_v17 = vsel %vm1607_vm9, %v1587_v13, %v1606_v16 }
 0x656   : > { %v1610_v18 = vadd.f32 %v1608_v17, %v1497_v15 }
 0x658   : > { %1611 = vst [vmem:[#allocation2 + $0x8] sm:$0xff] %v1610_v18 }
 0x659   : > { %v1589_v19 = vpop.f32.mrf.mxu0 }
 0x65a   : > { %v1602_v20 = vpop.f32.mrf.mxu1 }
 0x65b PF: > { %p1612_p10 = scmp.gt.s32.totalorder %s4479_s22, 3 }
 0x65d   : > { %p1613_p12 = pnand %p1612_p10, %p272_p9 }
 0x65e   : > { %s3490_s29 = sshll.u32 (!%p1613_p12), %s4481_s23, 7  ;;  %s1617_s8 = smul.u32 (!%p1613_p12), 15, %s4384_s9 }
 0x65f   : > { %1616 = sbr.rel (%p1613_p12) target bundleno = 1805 (0x70d), region = 88  ;;  %s4883_s30 = scalar_lea.vmem (!%p1613_p12), [#allocation6], %s3490_s29 }
 0x660   : > { %s1618_s12 = sadd.s32 (!%p1613_p12), 3, %s1617_s8 }
 0x661   : > { %s1619_s13 = sld [smem:[#allocation5 + %s1618_s12]] (!%p1613_p12) }
 0x664   : > { %v3565_v21 = vld [vmem:[%s4883_s30 + $0x1f0] sm:$0xf]  ;;  %v4149_v22 = vld [vmem:[%s4883_s30 + $0x1f4] sm:$0xf0]  ;;  %v4148_v23 = vld [vmem:[%s4883_s30 + $0x1f4] sm:$0xf] }
 0x665   : > { %v3566_v24 = vor.u32 %v4149_v22, %v3565_v21  ;;  %v3567_v25 = vld [vmem:[%s4883_s30 + $0x1f8] sm:$0xf0]  ;;  %v3557_v26 = vld [vmem:[%s4883_s30 + $0x1e0] sm:$0xf]  ;;  %v4147_v27 = vld [vmem:[%s4883_s30 + $0x1e4] sm:$0xf0] }
 0x666   : > { %v3570_v28 = vor.u32 %v4148_v23, %v3567_v25  ;;  %v4146_v29 = vld [vmem:[%s4883_s30 + $0x1e4] sm:$0xf]  ;;  %v3559_v30 = vld [vmem:[%s4883_s30 + $0x1e8] sm:$0xf0]  ;;  %v3558_v31 = vor.u32 %v4147_v27, %v3557_v26  ;;  %v3549_v33 = vld [vmem:[%s4883_s30 + $0x1d0] sm:$0xf] }
 0x667   : > { %1726 = vmatpush.bf16.msra.mxu0 %v3566_v24  ;;  %v3562_v32 = vor.u32 %v4146_v29, %v3559_v30  ;;  %v4145_v34 = vld [vmem:[%s4883_s30 + $0x1d4] sm:$0xf0]  ;;  %v4144_v35 = vld [vmem:[%s4883_s30 + $0x1d4] sm:$0xf]  ;;  %v3551_v36 = vld [vmem:[%s4883_s30 + $0x1d8] sm:$0xf0] }
 0x668   : > { %1739 = vmatpush.bf16.msra.mxu1 %v3570_v28  ;;  %v3550_v37 = vor.u32 %v4145_v34, %v3549_v33  ;;  %v3554_v38 = vor.u32 %v4144_v35, %v3551_v36  ;;  %v3541_v39 = vld [vmem:[%s4883_s30 + $0x1c0] sm:$0xf]  ;;  %v4143_v40 = vld [vmem:[%s4883_s30 + $0x1c4] sm:$0xf0]  ;;  %v4142_v41 = vld [vmem:[%s4883_s30 + $0x1c4] sm:$0xf] }
 0x669   : > { %v3543_v42 = vld [vmem:[%s4883_s30 + $0x1c8] sm:$0xf0]  ;;  %v3542_v43 = vor.u32 %v4143_v40, %v3541_v39  ;;  %v3533_v45 = vld [vmem:[%s4883_s30 + $0x1b0] sm:$0xf]  ;;  %v4141_v46 = vld [vmem:[%s4883_s30 + $0x1b4] sm:$0xf0] }
 0x66a   : > { %v3546_v44 = vor.u32 %v4142_v41, %v3543_v42  ;;  %v4140_v47 = vld [vmem:[%s4883_s30 + $0x1b4] sm:$0xf]  ;;  %v3535_v48 = vld [vmem:[%s4883_s30 + $0x1b8] sm:$0xf0]  ;;  %v3534_v49 = vor.u32 %v4141_v46, %v3533_v45  ;;  %v3525_v51 = vld [vmem:[%s4883_s30 + $0x1a0] sm:$0xf] }
 0x66b   : > { %1727 = vmatpush.bf16.msra.mxu0 %v3558_v31  ;;  %v3538_v50 = vor.u32 %v4140_v47, %v3535_v48  ;;  %v4139_v52 = vld [vmem:[%s4883_s30 + $0x1a4] sm:$0xf0]  ;;  %v4138_v53 = vld [vmem:[%s4883_s30 + $0x1a4] sm:$0xf]  ;;  %v3527_v54 = vld [vmem:[%s4883_s30 + $0x1a8] sm:$0xf0] }
 0x66c   : > { %1740 = vmatpush.bf16.msra.mxu1 %v3562_v32  ;;  %s3489_s14 = sshll.u32 %s1619_s13, 2  ;;  %v3526_v55 = vor.u32 %v4139_v52, %v3525_v51  ;;  %v3530_v56 = vor.u32 %v4138_v53, %v3527_v54  ;;  %v3517_v57 = vld [vmem:[%s4883_s30 + $0x190] sm:$0xf]  ;;  %v4137_v58 = vld [vmem:[%s4883_s30 + $0x194] sm:$0xf0]  ;;  %vm1755_vm10 = vcmask 1043456  }
 0x66d   : > { %s1621_s17 = scalar_lea.vmem %s5214_s2, %s3489_s14  ;;  %v4136_v59 = vld [vmem:[%s4883_s30 + $0x194] sm:$0xf]  ;;  %v3519_v60 = vld [vmem:[%s4883_s30 + $0x198] sm:$0xf0]  ;;  %v3518_v61 = vor.u32 %v4137_v58, %v3517_v57  ;;  %v3509_v0 = vld [vmem:[%s4883_s30 + $0x180] sm:$0xf] }
 0x66e   : > { %v1622_v62 = vld [vmem:[%s1621_s17] sm:$0xf]  ;;  %v3522_v63 = vor.u32 %v4136_v59, %v3519_v60  ;;  %v4135_v1 = vld [vmem:[%s4883_s30 + $0x184] sm:$0xf0]  ;;  %v4134_v2 = vld [vmem:[%s4883_s30 + $0x184] sm:$0xf] }
 0x66f   : > { %1728 = vmatpush.bf16.msra.mxu0 %v3550_v37  ;;  %v3511_v3 = vld [vmem:[%s4883_s30 + $0x188] sm:$0xf0]  ;;  %v1623_v4 = vmax.f32 %v1622_v62, 0.0  ;;  %v3510_v5 = vor.u32 %v4135_v1, %v3509_v0  ;;  %v1645_v10 = vld [vmem:[#allocation2 + $0x10] sm:$0xff] }
 0x670   : > { %1741 = vmatpush.bf16.msra.mxu1 %v3554_v38  ;;  %v3514_v6 = vor.u32 %v4134_v2, %v3511_v3 }
 0x671   : > { %v1624_v7 = vpack.c.bf16 %v1623_v4, %v1623_v4 }
 0x673   : > { %1729 = vmatpush.bf16.msra.mxu0 %v3542_v43 }
 0x674   : > { %1742 = vmatpush.bf16.msra.mxu1 %v3546_v44 }
 0x677   : > { %1730 = vmatpush.bf16.msra.mxu0 %v3534_v49 }
 0x678   : > { %1743 = vmatpush.bf16.msra.mxu1 %v3538_v50 }
 0x67b   : > { %1731 = vmatpush.bf16.msra.mxu0 %v3526_v55 }
 0x67c   : > { %1744 = vmatpush.bf16.msra.mxu1 %v3530_v56 }
 0x67f   : > { %1732 = vmatpush.bf16.msra.mxu0 %v3518_v61 }
 0x680   : > { %1745 = vmatpush.bf16.msra.mxu1 %v3522_v63 }
 0x683   : > { %1733 = vmatpush.bf16.msra.mxu0 %v3510_v5 }
 0x684   : > { %1746 = vmatpush.bf16.msra.mxu1 %v3514_v6 }
 0x686   : > { %1734 = vmatmul.bf16.vlgmr.msra.gmra.mxu0 %v1624_v7 }
 0x687   : > { %1747 = vmatmul.bf16.vlgmr.msra.gmra.mxu1 %v1624_v7 }
 0x703   : > { %v1735_v8 = vpop.f32.mrf.mxu0 }
 0x704   : > { %v1748_v9 = vpop.f32.mrf.mxu1 }
 0x705   : > { %v1754_v11 = vrot.slane %v1748_v9, 4 }
 0x707   : > { %v1756_v12 = vsel %vm1755_vm10, %v1735_v8, %v1754_v11 }
 0x708   : > { %v1758_v13 = vadd.f32 %v1756_v12, %v1645_v10 }
 0x70a   : > { %1759 = vst [vmem:[#allocation2 + $0x10] sm:$0xff] %v1758_v13 }
 0x70b   : > { %v1737_v14 = vpop.f32.mrf.mxu0 }
 0x70c   : > { %v1750_v15 = vpop.f32.mrf.mxu1 }
 0x70d PF: > { %p1760_p0 = pnand %p1612_p10, %p418_p11 }
 0x70e   : > { %s3572_s18 = sshll.u32 (!%p1760_p0), %s4481_s23, 7  ;;  %s1764_s20 = smul.u32 (!%p1760_p0), 3, %s4384_s9 }
 0x70f   : > { %1763 = sbr.rel (%p1760_p0) target bundleno = 1981 (0x7bd), region = 92  ;;  %s4926_s19 = scalar_lea.vmem (!%p1760_p0), [#allocation6], %s3572_s18 }
 0x710   : > { %s1765_s24 = sadd.s32 (!%p1760_p0), 1, %s1764_s20 }
 0x711   : > { %s1766_s25 = smul.u32 (!%p1760_p0), 5, %s1765_s24 }
 0x713   : > { %s1767_s26 = sadd.s32 (!%p1760_p0), 3, %s1766_s25 }
 0x714   : > { %v3647_v16 = vld [vmem:[%s4926_s19 + $0x1f0] sm:$0xf]  ;;  %v4165_v17 = vld [vmem:[%s4926_s19 + $0x1f4] sm:$0xf0]  ;;  %v4164_v18 = vld [vmem:[%s4926_s19 + $0x1f4] sm:$0xf] }
 0x715   : > { %v3648_v19 = vor.u32 %v4165_v17, %v3647_v16  ;;  %v3649_v20 = vld [vmem:[%s4926_s19 + $0x1f8] sm:$0xf0]  ;;  %v3639_v21 = vld [vmem:[%s4926_s19 + $0x1e0] sm:$0xf]  ;;  %v4163_v22 = vld [vmem:[%s4926_s19 + $0x1e4] sm:$0xf0] }
 0x716   : > { %v3652_v23 = vor.u32 %v4164_v18, %v3649_v20  ;;  %v4162_v24 = vld [vmem:[%s4926_s19 + $0x1e4] sm:$0xf]  ;;  %v3641_v25 = vld [vmem:[%s4926_s19 + $0x1e8] sm:$0xf0]  ;;  %v3640_v26 = vor.u32 %v4163_v22, %v3639_v21  ;;  %v3631_v28 = vld [vmem:[%s4926_s19 + $0x1d0] sm:$0xf] }
 0x717   : > { %1876 = vmatpush.bf16.msra.mxu0 %v3648_v19  ;;  %v3644_v27 = vor.u32 %v4162_v24, %v3641_v25  ;;  %v4161_v29 = vld [vmem:[%s4926_s19 + $0x1d4] sm:$0xf0]  ;;  %v4160_v30 = vld [vmem:[%s4926_s19 + $0x1d4] sm:$0xf]  ;;  %v3633_v31 = vld [vmem:[%s4926_s19 + $0x1d8] sm:$0xf0] }
 0x718   : > { %1889 = vmatpush.bf16.msra.mxu1 %v3652_v23  ;;  %v3632_v32 = vor.u32 %v4161_v29, %v3631_v28  ;;  %v3636_v33 = vor.u32 %v4160_v30, %v3633_v31  ;;  %v3623_v34 = vld [vmem:[%s4926_s19 + $0x1c0] sm:$0xf]  ;;  %v4159_v35 = vld [vmem:[%s4926_s19 + $0x1c4] sm:$0xf0]  ;;  %v4158_v36 = vld [vmem:[%s4926_s19 + $0x1c4] sm:$0xf] }
 0x719   : > { %v3625_v37 = vld [vmem:[%s4926_s19 + $0x1c8] sm:$0xf0]  ;;  %v3624_v38 = vor.u32 %v4159_v35, %v3623_v34  ;;  %v3615_v40 = vld [vmem:[%s4926_s19 + $0x1b0] sm:$0xf]  ;;  %v4157_v41 = vld [vmem:[%s4926_s19 + $0x1b4] sm:$0xf0] }
 0x71a   : > { %v3628_v39 = vor.u32 %v4158_v36, %v3625_v37  ;;  %v4156_v42 = vld [vmem:[%s4926_s19 + $0x1b4] sm:$0xf]  ;;  %v3617_v43 = vld [vmem:[%s4926_s19 + $0x1b8] sm:$0xf0]  ;;  %s1768_s27 = sld [smem:[#allocation5 + %s1767_s26]]  ;;  %v3616_v44 = vor.u32 %v4157_v41, %v3615_v40  ;;  %vm1905_vm11 = vcmask 1043456  }
 0x71b   : > { %1877 = vmatpush.bf16.msra.mxu0 %v3640_v26  ;;  %v3620_v45 = vor.u32 %v4156_v42, %v3617_v43  ;;  %v3607_v46 = vld [vmem:[%s4926_s19 + $0x1a0] sm:$0xf]  ;;  %v4155_v47 = vld [vmem:[%s4926_s19 + $0x1a4] sm:$0xf0]  ;;  %v4154_v48 = vld [vmem:[%s4926_s19 + $0x1a4] sm:$0xf] }
 0x71c   : > { %1890 = vmatpush.bf16.msra.mxu1 %v3644_v27  ;;  %v3609_v49 = vld [vmem:[%s4926_s19 + $0x1a8] sm:$0xf0]  ;;  %v3608_v50 = vor.u32 %v4155_v47, %v3607_v46  ;;  %v3599_v52 = vld [vmem:[%s4926_s19 + $0x190] sm:$0xf]  ;;  %v4153_v53 = vld [vmem:[%s4926_s19 + $0x194] sm:$0xf0] }
 0x71d   : > { %v3612_v51 = vor.u32 %v4154_v48, %v3609_v49  ;;  %v4152_v54 = vld [vmem:[%s4926_s19 + $0x194] sm:$0xf]  ;;  %v3601_v55 = vld [vmem:[%s4926_s19 + $0x198] sm:$0xf0]  ;;  %v3600_v56 = vor.u32 %v4153_v53, %v3599_v52  ;;  %v3591_v59 = vld [vmem:[%s4926_s19 + $0x180] sm:$0xf] }
 0x71e   : > { %v3604_v58 = vor.u32 %v4152_v54, %v3601_v55  ;;  %v4151_v60 = vld [vmem:[%s4926_s19 + $0x184] sm:$0xf0]  ;;  %v4150_v61 = vld [vmem:[%s4926_s19 + $0x184] sm:$0xf]  ;;  %v3593_v62 = vld [vmem:[%s4926_s19 + $0x188] sm:$0xf0] }
 0x71f   : > { %1878 = vmatpush.bf16.msra.mxu0 %v3632_v32  ;;  %v3592_v0 = vor.u32 %v4151_v60, %v3591_v59  ;;  %v3596_v1 = vor.u32 %v4150_v61, %v3593_v62  ;;  %v1795_v5 = vld [vmem:[#allocation2] sm:$0xff] }
 0x720   : > { %1891 = vmatpush.bf16.msra.mxu1 %v3636_v33  ;;  %s3571_s28 = sshll.u32 %s1768_s27, 2 }
 0x721   : > { %s1770_s8 = scalar_lea.vmem %s5214_s2, %s3571_s28 }
 0x722   : > { %v1771_v57 = vld [vmem:[%s1770_s8] sm:$0xf] }
 0x723   : > { %1879 = vmatpush.bf16.msra.mxu0 %v3624_v38  ;;  %v1772_v63 = vmax.f32 %v1771_v57, 0.0 }
 0x724   : > { %1892 = vmatpush.bf16.msra.mxu1 %v3628_v39 }
 0x725   : > { %v1773_v2 = vpack.c.bf16 %v1772_v63, %v1772_v63 }
 0x727   : > { %1880 = vmatpush.bf16.msra.mxu0 %v3616_v44 }
 0x728   : > { %1893 = vmatpush.bf16.msra.mxu1 %v3620_v45 }
 0x72b   : > { %1881 = vmatpush.bf16.msra.mxu0 %v3608_v50 }
 0x72c   : > { %1894 = vmatpush.bf16.msra.mxu1 %v3612_v51 }
 0x72f   : > { %1882 = vmatpush.bf16.msra.mxu0 %v3600_v56 }
 0x730   : > { %1895 = vmatpush.bf16.msra.mxu1 %v3604_v58 }
 0x733   : > { %1883 = vmatpush.bf16.msra.mxu0 %v3592_v0 }
 0x734   : > { %1896 = vmatpush.bf16.msra.mxu1 %v3596_v1 }
 0x736   : > { %1884 = vmatmul.bf16.vlgmr.msra.gmra.mxu0 %v1773_v2 }
 0x737   : > { %1897 = vmatmul.bf16.vlgmr.msra.gmra.mxu1 %v1773_v2 }
 0x7b3   : > { %v1885_v3 = vpop.f32.mrf.mxu0 }
 0x7b4   : > { %v1898_v4 = vpop.f32.mrf.mxu1 }
 0x7b5   : > { %v1904_v6 = vrot.slane %v1898_v4, 4 }
 0x7b7   : > { %v1906_v7 = vsel %vm1905_vm11, %v1885_v3, %v1904_v6 }
 0x7b8   : > { %v1908_v8 = vadd.f32 %v1906_v7, %v1795_v5 }
 0x7ba   : > { %1909 = vst [vmem:[#allocation2] sm:$0xff] %v1908_v8 }
 0x7bb   : > { %v1887_v9 = vpop.f32.mrf.mxu0 }
 0x7bc   : > { %v1900_v10 = vpop.f32.mrf.mxu1 }
 0x7bd PF: > { %p1910_p1 = pnand %p1612_p10, %p567_p13 }
 0x7be   : > { %s3654_s12 = sshll.u32 (!%p1910_p1), %s4481_s23, 7  ;;  %s1914_s14 = smul.u32 (!%p1910_p1), 3, %s4384_s9 }
 0x7bf   : > { %1913 = sbr.rel (%p1910_p1) target bundleno = 2157 (0x86d), region = 96  ;;  %s4969_s13 = scalar_lea.vmem (!%p1910_p1), [#allocation6], %s3654_s12 }
 0x7c0   : > { %s1915_s15 = sadd.s32 (!%p1910_p1), 2, %s1914_s14 }
 0x7c1   : > { %s1916_s16 = smul.u32 (!%p1910_p1), 5, %s1915_s15 }
 0x7c3   : > { %s1917_s17 = sadd.s32 (!%p1910_p1), 3, %s1916_s16 }
 0x7c4   : > { %v3729_v11 = vld [vmem:[%s4969_s13 + $0x1f0] sm:$0xf]  ;;  %v4181_v12 = vld [vmem:[%s4969_s13 + $0x1f4] sm:$0xf0]  ;;  %v4180_v13 = vld [vmem:[%s4969_s13 + $0x1f4] sm:$0xf] }
 0x7c5   : > { %v3730_v14 = vor.u32 %v4181_v12, %v3729_v11  ;;  %v3731_v15 = vld [vmem:[%s4969_s13 + $0x1f8] sm:$0xf0]  ;;  %v3721_v16 = vld [vmem:[%s4969_s13 + $0x1e0] sm:$0xf]  ;;  %v4179_v17 = vld [vmem:[%s4969_s13 + $0x1e4] sm:$0xf0] }
 0x7c6   : > { %v3734_v18 = vor.u32 %v4180_v13, %v3731_v15  ;;  %v4178_v19 = vld [vmem:[%s4969_s13 + $0x1e4] sm:$0xf]  ;;  %v3723_v20 = vld [vmem:[%s4969_s13 + $0x1e8] sm:$0xf0]  ;;  %v3722_v21 = vor.u32 %v4179_v17, %v3721_v16  ;;  %v3713_v23 = vld [vmem:[%s4969_s13 + $0x1d0] sm:$0xf] }
 0x7c7   : > { %2026 = vmatpush.bf16.msra.mxu0 %v3730_v14  ;;  %v3726_v22 = vor.u32 %v4178_v19, %v3723_v20  ;;  %v4177_v24 = vld [vmem:[%s4969_s13 + $0x1d4] sm:$0xf0]  ;;  %v4176_v25 = vld [vmem:[%s4969_s13 + $0x1d4] sm:$0xf]  ;;  %v3715_v26 = vld [vmem:[%s4969_s13 + $0x1d8] sm:$0xf0] }
 0x7c8   : > { %2039 = vmatpush.bf16.msra.mxu1 %v3734_v18  ;;  %v3714_v27 = vor.u32 %v4177_v24, %v3713_v23  ;;  %v3718_v28 = vor.u32 %v4176_v25, %v3715_v26  ;;  %v3705_v29 = vld [vmem:[%s4969_s13 + $0x1c0] sm:$0xf]  ;;  %v4175_v30 = vld [vmem:[%s4969_s13 + $0x1c4] sm:$0xf0]  ;;  %v4174_v31 = vld [vmem:[%s4969_s13 + $0x1c4] sm:$0xf] }
 0x7c9   : > { %v3707_v32 = vld [vmem:[%s4969_s13 + $0x1c8] sm:$0xf0]  ;;  %v3706_v33 = vor.u32 %v4175_v30, %v3705_v29  ;;  %v3697_v35 = vld [vmem:[%s4969_s13 + $0x1b0] sm:$0xf]  ;;  %v4173_v36 = vld [vmem:[%s4969_s13 + $0x1b4] sm:$0xf0] }
 0x7ca   : > { %v3710_v34 = vor.u32 %v4174_v31, %v3707_v32  ;;  %v4172_v37 = vld [vmem:[%s4969_s13 + $0x1b4] sm:$0xf]  ;;  %v3699_v38 = vld [vmem:[%s4969_s13 + $0x1b8] sm:$0xf0]  ;;  %s1918_s18 = sld [smem:[#allocation5 + %s1917_s17]]  ;;  %v3698_v39 = vor.u32 %v4173_v36, %v3697_v35  ;;  %vm2055_vm12 = vcmask 1043456  }
 0x7cb   : > { %2027 = vmatpush.bf16.msra.mxu0 %v3722_v21  ;;  %v3702_v40 = vor.u32 %v4172_v37, %v3699_v38  ;;  %v3689_v41 = vld [vmem:[%s4969_s13 + $0x1a0] sm:$0xf]  ;;  %v4171_v42 = vld [vmem:[%s4969_s13 + $0x1a4] sm:$0xf0]  ;;  %v4170_v43 = vld [vmem:[%s4969_s13 + $0x1a4] sm:$0xf] }
 0x7cc   : > { %2040 = vmatpush.bf16.msra.mxu1 %v3726_v22  ;;  %v3691_v44 = vld [vmem:[%s4969_s13 + $0x1a8] sm:$0xf0]  ;;  %v3690_v45 = vor.u32 %v4171_v42, %v3689_v41  ;;  %v3681_v47 = vld [vmem:[%s4969_s13 + $0x190] sm:$0xf]  ;;  %v4169_v48 = vld [vmem:[%s4969_s13 + $0x194] sm:$0xf0] }
 0x7cd   : > { %v3694_v46 = vor.u32 %v4170_v43, %v3691_v44  ;;  %v4168_v49 = vld [vmem:[%s4969_s13 + $0x194] sm:$0xf]  ;;  %v3683_v50 = vld [vmem:[%s4969_s13 + $0x198] sm:$0xf0]  ;;  %v3682_v51 = vor.u32 %v4169_v48, %v3681_v47  ;;  %v3673_v54 = vld [vmem:[%s4969_s13 + $0x180] sm:$0xf] }
 0x7ce   : > { %v3686_v53 = vor.u32 %v4168_v49, %v3683_v50  ;;  %v4167_v55 = vld [vmem:[%s4969_s13 + $0x184] sm:$0xf0]  ;;  %v4166_v56 = vld [vmem:[%s4969_s13 + $0x184] sm:$0xf]  ;;  %v3675_v57 = vld [vmem:[%s4969_s13 + $0x188] sm:$0xf0] }
 0x7cf   : > { %2028 = vmatpush.bf16.msra.mxu0 %v3714_v27  ;;  %v3674_v59 = vor.u32 %v4167_v55, %v3673_v54  ;;  %v3678_v60 = vor.u32 %v4166_v56, %v3675_v57  ;;  %v1945_v0 = vld [vmem:[#allocation2 + $0x8] sm:$0xff] }
 0x7d0   : > { %2041 = vmatpush.bf16.msra.mxu1 %v3718_v28  ;;  %s3653_s19 = sshll.u32 %s1918_s18, 2 }
 0x7d1   : > { %s1920_s25 = scalar_lea.vmem %s5214_s2, %s3653_s19 }
 0x7d2   : > { %v1921_v52 = vld [vmem:[%s1920_s25] sm:$0xf] }
 0x7d3   : > { %2029 = vmatpush.bf16.msra.mxu0 %v3706_v33  ;;  %v1922_v58 = vmax.f32 %v1921_v52, 0.0 }
 0x7d4   : > { %2042 = vmatpush.bf16.msra.mxu1 %v3710_v34 }
 0x7d5   : > { %v1923_v61 = vpack.c.bf16 %v1922_v58, %v1922_v58 }
 0x7d7   : > { %2030 = vmatpush.bf16.msra.mxu0 %v3698_v39 }
 0x7d8   : > { %2043 = vmatpush.bf16.msra.mxu1 %v3702_v40 }
 0x7db   : > { %2031 = vmatpush.bf16.msra.mxu0 %v3690_v45 }
 0x7dc   : > { %2044 = vmatpush.bf16.msra.mxu1 %v3694_v46 }
 0x7df   : > { %2032 = vmatpush.bf16.msra.mxu0 %v3682_v51 }
 0x7e0   : > { %2045 = vmatpush.bf16.msra.mxu1 %v3686_v53 }
 0x7e3   : > { %2033 = vmatpush.bf16.msra.mxu0 %v3674_v59 }
 0x7e4   : > { %2046 = vmatpush.bf16.msra.mxu1 %v3678_v60 }
 0x7e6   : > { %2034 = vmatmul.bf16.vlgmr.msra.gmra.mxu0 %v1923_v61 }
 0x7e7   : > { %2047 = vmatmul.bf16.vlgmr.msra.gmra.mxu1 %v1923_v61 }
 0x863   : > { %v2035_v62 = vpop.f32.mrf.mxu0 }
 0x864   : > { %v2048_v63 = vpop.f32.mrf.mxu1 }
 0x865   : > { %v2054_v1 = vrot.slane %v2048_v63, 4 }
 0x867   : > { %v2056_v2 = vsel %vm2055_vm12, %v2035_v62, %v2054_v1 }
 0x868   : > { %v2058_v3 = vadd.f32 %v2056_v2, %v1945_v0 }
 0x86a   : > { %2059 = vst [vmem:[#allocation2 + $0x8] sm:$0xff] %v2058_v3 }
 0x86b   : > { %v2037_v4 = vpop.f32.mrf.mxu0 }
 0x86c   : > { %v2050_v5 = vpop.f32.mrf.mxu1 }
 0x86d PF: > { %p2060_p2 = scmp.gt.s32.totalorder %s4479_s22, 4 }
 0x86f   : > { %p2061_p3 = pnand %p2060_p2, %p272_p9 }
 0x870   : > { %s3736_s26 = sshll.u32 (!%p2061_p3), %s4481_s23, 7  ;;  %s2065_s28 = smul.u32 (!%p2061_p3), 15, %s4384_s9 }
 0x871   : > { %2064 = sbr.rel (%p2061_p3) target bundleno = 2335 (0x91f), region = 100  ;;  %s5013_s27 = scalar_lea.vmem (!%p2061_p3), [#allocation6], %s3736_s26 }
 0x872   : > { %s2066_s29 = sadd.s32 (!%p2061_p3), 4, %s2065_s28 }
 0x873   : > { %s2067_s30 = sld [smem:[#allocation5 + %s2066_s29]] (!%p2061_p3) }
 0x876   : > { %v3811_v6 = vld [vmem:[%s5013_s27 + $0x270] sm:$0xf]  ;;  %v4197_v7 = vld [vmem:[%s5013_s27 + $0x274] sm:$0xf0]  ;;  %v4196_v8 = vld [vmem:[%s5013_s27 + $0x274] sm:$0xf] }
 0x877   : > { %v3812_v9 = vor.u32 %v4197_v7, %v3811_v6  ;;  %v3813_v10 = vld [vmem:[%s5013_s27 + $0x278] sm:$0xf0]  ;;  %v3803_v11 = vld [vmem:[%s5013_s27 + $0x260] sm:$0xf]  ;;  %v4195_v12 = vld [vmem:[%s5013_s27 + $0x264] sm:$0xf0] }
 0x878   : > { %v3816_v13 = vor.u32 %v4196_v8, %v3813_v10  ;;  %v4194_v14 = vld [vmem:[%s5013_s27 + $0x264] sm:$0xf]  ;;  %v3805_v15 = vld [vmem:[%s5013_s27 + $0x268] sm:$0xf0]  ;;  %v3804_v16 = vor.u32 %v4195_v12, %v3803_v11  ;;  %v3795_v18 = vld [vmem:[%s5013_s27 + $0x250] sm:$0xf] }
 0x879   : > { %2174 = vmatpush.bf16.msra.mxu0 %v3812_v9  ;;  %v3808_v17 = vor.u32 %v4194_v14, %v3805_v15  ;;  %v4193_v19 = vld [vmem:[%s5013_s27 + $0x254] sm:$0xf0]  ;;  %v4192_v20 = vld [vmem:[%s5013_s27 + $0x254] sm:$0xf]  ;;  %v3797_v21 = vld [vmem:[%s5013_s27 + $0x258] sm:$0xf0] }
 0x87a   : > { %2187 = vmatpush.bf16.msra.mxu1 %v3816_v13  ;;  %v3796_v22 = vor.u32 %v4193_v19, %v3795_v18  ;;  %v3800_v23 = vor.u32 %v4192_v20, %v3797_v21  ;;  %v3787_v24 = vld [vmem:[%s5013_s27 + $0x240] sm:$0xf]  ;;  %v4191_v25 = vld [vmem:[%s5013_s27 + $0x244] sm:$0xf0]  ;;  %v4190_v26 = vld [vmem:[%s5013_s27 + $0x244] sm:$0xf] }
 0x87b   : > { %v3789_v27 = vld [vmem:[%s5013_s27 + $0x248] sm:$0xf0]  ;;  %v3788_v28 = vor.u32 %v4191_v25, %v3787_v24  ;;  %v3779_v30 = vld [vmem:[%s5013_s27 + $0x230] sm:$0xf]  ;;  %v4189_v31 = vld [vmem:[%s5013_s27 + $0x234] sm:$0xf0] }
 0x87c   : > { %v3792_v29 = vor.u32 %v4190_v26, %v3789_v27  ;;  %v4188_v32 = vld [vmem:[%s5013_s27 + $0x234] sm:$0xf]  ;;  %v3781_v33 = vld [vmem:[%s5013_s27 + $0x238] sm:$0xf0]  ;;  %v3780_v34 = vor.u32 %v4189_v31, %v3779_v30  ;;  %v3771_v36 = vld [vmem:[%s5013_s27 + $0x220] sm:$0xf] }
 0x87d   : > { %2175 = vmatpush.bf16.msra.mxu0 %v3804_v16  ;;  %v3784_v35 = vor.u32 %v4188_v32, %v3781_v33  ;;  %v4187_v37 = vld [vmem:[%s5013_s27 + $0x224] sm:$0xf0]  ;;  %v4186_v38 = vld [vmem:[%s5013_s27 + $0x224] sm:$0xf]  ;;  %v3773_v39 = vld [vmem:[%s5013_s27 + $0x228] sm:$0xf0] }
 0x87e   : > { %2188 = vmatpush.bf16.msra.mxu1 %v3808_v17  ;;  %s3735_s8 = sshll.u32 %s2067_s30, 2  ;;  %v3772_v40 = vor.u32 %v4187_v37, %v3771_v36  ;;  %v3776_v41 = vor.u32 %v4186_v38, %v3773_v39  ;;  %v3763_v42 = vld [vmem:[%s5013_s27 + $0x210] sm:$0xf]  ;;  %v4185_v43 = vld [vmem:[%s5013_s27 + $0x214] sm:$0xf0]  ;;  %vm2203_vm13 = vcmask 1043456  }
 0x87f   : > { %s2069_s14 = scalar_lea.vmem %s5214_s2, %s3735_s8  ;;  %v4184_v44 = vld [vmem:[%s5013_s27 + $0x214] sm:$0xf]  ;;  %v3765_v45 = vld [vmem:[%s5013_s27 + $0x218] sm:$0xf0]  ;;  %v3764_v46 = vor.u32 %v4185_v43, %v3763_v42  ;;  %v3755_v49 = vld [vmem:[%s5013_s27 + $0x200] sm:$0xf] }
 0x880   : > { %v2070_v47 = vld [vmem:[%s2069_s14] sm:$0xf]  ;;  %v3768_v48 = vor.u32 %v4184_v44, %v3765_v45  ;;  %v4183_v50 = vld [vmem:[%s5013_s27 + $0x204] sm:$0xf0]  ;;  %v4182_v51 = vld [vmem:[%s5013_s27 + $0x204] sm:$0xf] }
 0x881   : > { %2176 = vmatpush.bf16.msra.mxu0 %v3796_v22  ;;  %v3757_v52 = vld [vmem:[%s5013_s27 + $0x208] sm:$0xf0]  ;;  %v2071_v53 = vmax.f32 %v2070_v47, 0.0  ;;  %v3756_v54 = vor.u32 %v4183_v50, %v3755_v49  ;;  %v2093_v59 = vld [vmem:[#allocation2 + $0x10] sm:$0xff] }
 0x882   : > { %2189 = vmatpush.bf16.msra.mxu1 %v3800_v23  ;;  %v3760_v55 = vor.u32 %v4182_v51, %v3757_v52 }
 0x883   : > { %v2072_v56 = vpack.c.bf16 %v2071_v53, %v2071_v53 }
 0x885   : > { %2177 = vmatpush.bf16.msra.mxu0 %v3788_v28 }
 0x886   : > { %2190 = vmatpush.bf16.msra.mxu1 %v3792_v29 }
 0x889   : > { %2178 = vmatpush.bf16.msra.mxu0 %v3780_v34 }
 0x88a   : > { %2191 = vmatpush.bf16.msra.mxu1 %v3784_v35 }
 0x88d   : > { %2179 = vmatpush.bf16.msra.mxu0 %v3772_v40 }
 0x88e   : > { %2192 = vmatpush.bf16.msra.mxu1 %v3776_v41 }
 0x891   : > { %2180 = vmatpush.bf16.msra.mxu0 %v3764_v46 }
 0x892   : > { %2193 = vmatpush.bf16.msra.mxu1 %v3768_v48 }
 0x895   : > { %2181 = vmatpush.bf16.msra.mxu0 %v3756_v54 }
 0x896   : > { %2194 = vmatpush.bf16.msra.mxu1 %v3760_v55 }
 0x898   : > { %2182 = vmatmul.bf16.vlgmr.msra.gmra.mxu0 %v2072_v56 }
 0x899   : > { %2195 = vmatmul.bf16.vlgmr.msra.gmra.mxu1 %v2072_v56 }
 0x915   : > { %v2183_v57 = vpop.f32.mrf.mxu0 }
 0x916   : > { %v2196_v58 = vpop.f32.mrf.mxu1 }
 0x917   : > { %v2202_v60 = vrot.slane %v2196_v58, 4 }
 0x919   : > { %v2204_v61 = vsel %vm2203_vm13, %v2183_v57, %v2202_v60 }
 0x91a   : > { %v2206_v62 = vadd.f32 %v2204_v61, %v2093_v59 }
 0x91c   : > { %2207 = vst [vmem:[#allocation2 + $0x10] sm:$0xff] %v2206_v62 }
 0x91d   : > { %v2185_v63 = vpop.f32.mrf.mxu0 }
 0x91e   : > { %v2198_v0 = vpop.f32.mrf.mxu1 }
 0x91f PF: > { %p2208_p4 = pnand %p2060_p2, %p418_p11 }
 0x920   : > { %s3818_s15 = sshll.u32 (!%p2208_p4), %s4481_s23, 7  ;;  %s2212_s17 = smul.u32 (!%p2208_p4), 3, %s4384_s9 }
 0x921   : > { %2211 = sbr.rel (%p2208_p4) target bundleno = 2511 (0x9cf), region = 104  ;;  %s5056_s16 = scalar_lea.vmem (!%p2208_p4), [#allocation6], %s3818_s15 }
 0x922   : > { %s2213_s18 = sadd.s32 (!%p2208_p4), 1, %s2212_s17 }
 0x923   : > { %s2214_s19 = smul.u32 (!%p2208_p4), 5, %s2213_s18 }
 0x925   : > { %s2215_s20 = sadd.s32 (!%p2208_p4), 4, %s2214_s19 }
 0x926   : > { %v3893_v1 = vld [vmem:[%s5056_s16 + $0x270] sm:$0xf]  ;;  %v4213_v2 = vld [vmem:[%s5056_s16 + $0x274] sm:$0xf0]  ;;  %v4212_v3 = vld [vmem:[%s5056_s16 + $0x274] sm:$0xf] }
 0x927   : > { %v3894_v4 = vor.u32 %v4213_v2, %v3893_v1  ;;  %v3895_v5 = vld [vmem:[%s5056_s16 + $0x278] sm:$0xf0]  ;;  %v3885_v6 = vld [vmem:[%s5056_s16 + $0x260] sm:$0xf]  ;;  %v4211_v7 = vld [vmem:[%s5056_s16 + $0x264] sm:$0xf0] }
 0x928   : > { %v3898_v8 = vor.u32 %v4212_v3, %v3895_v5  ;;  %v4210_v9 = vld [vmem:[%s5056_s16 + $0x264] sm:$0xf]  ;;  %v3887_v10 = vld [vmem:[%s5056_s16 + $0x268] sm:$0xf0]  ;;  %v3886_v11 = vor.u32 %v4211_v7, %v3885_v6  ;;  %v3877_v13 = vld [vmem:[%s5056_s16 + $0x250] sm:$0xf] }
 0x929   : > { %2324 = vmatpush.bf16.msra.mxu0 %v3894_v4  ;;  %v3890_v12 = vor.u32 %v4210_v9, %v3887_v10  ;;  %v4209_v14 = vld [vmem:[%s5056_s16 + $0x254] sm:$0xf0]  ;;  %v4208_v15 = vld [vmem:[%s5056_s16 + $0x254] sm:$0xf]  ;;  %v3879_v16 = vld [vmem:[%s5056_s16 + $0x258] sm:$0xf0] }
 0x92a   : > { %2337 = vmatpush.bf16.msra.mxu1 %v3898_v8  ;;  %v3878_v17 = vor.u32 %v4209_v14, %v3877_v13  ;;  %v3882_v18 = vor.u32 %v4208_v15, %v3879_v16  ;;  %v3869_v19 = vld [vmem:[%s5056_s16 + $0x240] sm:$0xf]  ;;  %v4207_v20 = vld [vmem:[%s5056_s16 + $0x244] sm:$0xf0]  ;;  %v4206_v21 = vld [vmem:[%s5056_s16 + $0x244] sm:$0xf] }
 0x92b   : > { %v3871_v22 = vld [vmem:[%s5056_s16 + $0x248] sm:$0xf0]  ;;  %v3870_v23 = vor.u32 %v4207_v20, %v3869_v19  ;;  %v3861_v25 = vld [vmem:[%s5056_s16 + $0x230] sm:$0xf]  ;;  %v4205_v26 = vld [vmem:[%s5056_s16 + $0x234] sm:$0xf0] }
 0x92c   : > { %v3874_v24 = vor.u32 %v4206_v21, %v3871_v22  ;;  %v4204_v27 = vld [vmem:[%s5056_s16 + $0x234] sm:$0xf]  ;;  %v3863_v28 = vld [vmem:[%s5056_s16 + $0x238] sm:$0xf0]  ;;  %s2216_s24 = sld [smem:[#allocation5 + %s2215_s20]]  ;;  %v3862_v29 = vor.u32 %v4205_v26, %v3861_v25  ;;  %vm2353_vm14 = vcmask 1043456  }
 0x92d   : > { %2325 = vmatpush.bf16.msra.mxu0 %v3886_v11  ;;  %v3866_v30 = vor.u32 %v4204_v27, %v3863_v28  ;;  %v3853_v31 = vld [vmem:[%s5056_s16 + $0x220] sm:$0xf]  ;;  %v4203_v32 = vld [vmem:[%s5056_s16 + $0x224] sm:$0xf0]  ;;  %v4202_v33 = vld [vmem:[%s5056_s16 + $0x224] sm:$0xf] }
 0x92e   : > { %2338 = vmatpush.bf16.msra.mxu1 %v3890_v12  ;;  %v3855_v34 = vld [vmem:[%s5056_s16 + $0x228] sm:$0xf0]  ;;  %v3854_v35 = vor.u32 %v4203_v32, %v3853_v31  ;;  %v3845_v37 = vld [vmem:[%s5056_s16 + $0x210] sm:$0xf]  ;;  %v4201_v38 = vld [vmem:[%s5056_s16 + $0x214] sm:$0xf0] }
 0x92f   : > { %v3858_v36 = vor.u32 %v4202_v33, %v3855_v34  ;;  %v4200_v39 = vld [vmem:[%s5056_s16 + $0x214] sm:$0xf]  ;;  %v3847_v40 = vld [vmem:[%s5056_s16 + $0x218] sm:$0xf0]  ;;  %v3846_v41 = vor.u32 %v4201_v38, %v3845_v37  ;;  %v3837_v44 = vld [vmem:[%s5056_s16 + $0x200] sm:$0xf] }
 0x930   : > { %v3850_v43 = vor.u32 %v4200_v39, %v3847_v40  ;;  %v4199_v45 = vld [vmem:[%s5056_s16 + $0x204] sm:$0xf0]  ;;  %v4198_v46 = vld [vmem:[%s5056_s16 + $0x204] sm:$0xf]  ;;  %v3839_v47 = vld [vmem:[%s5056_s16 + $0x208] sm:$0xf0] }
 0x931   : > { %2326 = vmatpush.bf16.msra.mxu0 %v3878_v17  ;;  %v3838_v49 = vor.u32 %v4199_v45, %v3837_v44  ;;  %v3842_v50 = vor.u32 %v4198_v46, %v3839_v47  ;;  %v2243_v54 = vld [vmem:[#allocation2] sm:$0xff] }
 0x932   : > { %2339 = vmatpush.bf16.msra.mxu1 %v3882_v18  ;;  %s3817_s25 = sshll.u32 %s2216_s24, 2 }
 0x933   : > { %s2218_s28 = scalar_lea.vmem %s5214_s2, %s3817_s25 }
 0x934   : > { %v2219_v42 = vld [vmem:[%s2218_s28] sm:$0xf] }
 0x935   : > { %2327 = vmatpush.bf16.msra.mxu0 %v3870_v23  ;;  %v2220_v48 = vmax.f32 %v2219_v42, 0.0 }
 0x936   : > { %2340 = vmatpush.bf16.msra.mxu1 %v3874_v24 }
 0x937   : > { %v2221_v51 = vpack.c.bf16 %v2220_v48, %v2220_v48 }
 0x939   : > { %2328 = vmatpush.bf16.msra.mxu0 %v3862_v29 }
 0x93a   : > { %2341 = vmatpush.bf16.msra.mxu1 %v3866_v30 }
 0x93d   : > { %2329 = vmatpush.bf16.msra.mxu0 %v3854_v35 }
 0x93e   : > { %2342 = vmatpush.bf16.msra.mxu1 %v3858_v36 }
 0x941   : > { %2330 = vmatpush.bf16.msra.mxu0 %v3846_v41 }
 0x942   : > { %2343 = vmatpush.bf16.msra.mxu1 %v3850_v43 }
 0x945   : > { %2331 = vmatpush.bf16.msra.mxu0 %v3838_v49 }
 0x946   : > { %2344 = vmatpush.bf16.msra.mxu1 %v3842_v50 }
 0x948   : > { %2332 = vmatmul.bf16.vlgmr.msra.gmra.mxu0 %v2221_v51 }
 0x949   : > { %2345 = vmatmul.bf16.vlgmr.msra.gmra.mxu1 %v2221_v51 }
 0x9c5   : > { %v2333_v52 = vpop.f32.mrf.mxu0 }
 0x9c6   : > { %v2346_v53 = vpop.f32.mrf.mxu1 }
 0x9c7   : > { %v2352_v55 = vrot.slane %v2346_v53, 4 }
 0x9c9   : > { %v2354_v56 = vsel %vm2353_vm14, %v2333_v52, %v2352_v55 }
 0x9ca   : > { %v2356_v57 = vadd.f32 %v2354_v56, %v2243_v54 }
 0x9cc   : > { %2357 = vst [vmem:[#allocation2] sm:$0xff] %v2356_v57 }
 0x9cd   : > { %v2335_v58 = vpop.f32.mrf.mxu0 }
 0x9ce   : > { %v2348_v59 = vpop.f32.mrf.mxu1 }
 0x9cf PF: > { %p2358_p5 = pnand %p2060_p2, %p567_p13 }
 0x9d0   : > { %s3900_s29 = sshll.u32 (!%p2358_p5), %s4481_s23, 7  ;;  %s2362_s22 = smul.u32 (!%p2358_p5), 3, %s4384_s9 }
 0x9d1   : > { %2361 = sbr.rel (%p2358_p5) target bundleno = 2687 (0xa7f), region = 108  ;;  %s5099_s30 = scalar_lea.vmem (!%p2358_p5), [#allocation6], %s3900_s29 }
 0x9d2   : > { %s2363_s23 = sadd.s32 (!%p2358_p5), 2, %s2362_s22 }
 0x9d3   : > { %s2364_s8 = smul.u32 (!%p2358_p5), 5, %s2363_s23 }
 0x9d5   : > { %s2365_s12 = sadd.s32 (!%p2358_p5), 4, %s2364_s8 }
 0x9d6   : > { %v3975_v60 = vld [vmem:[%s5099_s30 + $0x270] sm:$0xf]  ;;  %v4229_v61 = vld [vmem:[%s5099_s30 + $0x274] sm:$0xf0]  ;;  %v4228_v62 = vld [vmem:[%s5099_s30 + $0x274] sm:$0xf] }
 0x9d7   : > { %v3976_v63 = vor.u32 %v4229_v61, %v3975_v60  ;;  %v3977_v0 = vld [vmem:[%s5099_s30 + $0x278] sm:$0xf0]  ;;  %v3967_v1 = vld [vmem:[%s5099_s30 + $0x260] sm:$0xf]  ;;  %v4227_v2 = vld [vmem:[%s5099_s30 + $0x264] sm:$0xf0] }
 0x9d8   : > { %v3980_v3 = vor.u32 %v4228_v62, %v3977_v0  ;;  %v4226_v4 = vld [vmem:[%s5099_s30 + $0x264] sm:$0xf]  ;;  %v3969_v5 = vld [vmem:[%s5099_s30 + $0x268] sm:$0xf0]  ;;  %v3968_v6 = vor.u32 %v4227_v2, %v3967_v1  ;;  %v3959_v8 = vld [vmem:[%s5099_s30 + $0x250] sm:$0xf] }
 0x9d9   : > { %2474 = vmatpush.bf16.msra.mxu0 %v3976_v63  ;;  %v3972_v7 = vor.u32 %v4226_v4, %v3969_v5  ;;  %v4225_v9 = vld [vmem:[%s5099_s30 + $0x254] sm:$0xf0]  ;;  %v4224_v10 = vld [vmem:[%s5099_s30 + $0x254] sm:$0xf]  ;;  %v3961_v11 = vld [vmem:[%s5099_s30 + $0x258] sm:$0xf0] }
 0x9da   : > { %2487 = vmatpush.bf16.msra.mxu1 %v3980_v3  ;;  %v3960_v12 = vor.u32 %v4225_v9, %v3959_v8  ;;  %v3964_v13 = vor.u32 %v4224_v10, %v3961_v11  ;;  %v3951_v14 = vld [vmem:[%s5099_s30 + $0x240] sm:$0xf]  ;;  %v4223_v15 = vld [vmem:[%s5099_s30 + $0x244] sm:$0xf0]  ;;  %v4222_v16 = vld [vmem:[%s5099_s30 + $0x244] sm:$0xf] }
 0x9db   : > { %v3953_v17 = vld [vmem:[%s5099_s30 + $0x248] sm:$0xf0]  ;;  %v3952_v18 = vor.u32 %v4223_v15, %v3951_v14  ;;  %v3943_v20 = vld [vmem:[%s5099_s30 + $0x230] sm:$0xf]  ;;  %v4221_v21 = vld [vmem:[%s5099_s30 + $0x234] sm:$0xf0] }
 0x9dc   : > { %v3956_v19 = vor.u32 %v4222_v16, %v3953_v17  ;;  %v4220_v22 = vld [vmem:[%s5099_s30 + $0x234] sm:$0xf]  ;;  %v3945_v23 = vld [vmem:[%s5099_s30 + $0x238] sm:$0xf0]  ;;  %s2366_s13 = sld [smem:[#allocation5 + %s2365_s12]]  ;;  %v3944_v24 = vor.u32 %v4221_v21, %v3943_v20  ;;  %vm2503_vm15 = vcmask 1043456  }
 0x9dd   : > { %2475 = vmatpush.bf16.msra.mxu0 %v3968_v6  ;;  %v3948_v25 = vor.u32 %v4220_v22, %v3945_v23  ;;  %v3935_v26 = vld [vmem:[%s5099_s30 + $0x220] sm:$0xf]  ;;  %v4219_v27 = vld [vmem:[%s5099_s30 + $0x224] sm:$0xf0]  ;;  %v4218_v28 = vld [vmem:[%s5099_s30 + $0x224] sm:$0xf] }
 0x9de   : > { %2488 = vmatpush.bf16.msra.mxu1 %v3972_v7  ;;  %v3937_v29 = vld [vmem:[%s5099_s30 + $0x228] sm:$0xf0]  ;;  %v3936_v30 = vor.u32 %v4219_v27, %v3935_v26  ;;  %v3927_v32 = vld [vmem:[%s5099_s30 + $0x210] sm:$0xf]  ;;  %v4217_v33 = vld [vmem:[%s5099_s30 + $0x214] sm:$0xf0] }
 0x9df   : > { %v3940_v31 = vor.u32 %v4218_v28, %v3937_v29  ;;  %v4216_v34 = vld [vmem:[%s5099_s30 + $0x214] sm:$0xf]  ;;  %v3929_v35 = vld [vmem:[%s5099_s30 + $0x218] sm:$0xf0]  ;;  %v3928_v36 = vor.u32 %v4217_v33, %v3927_v32  ;;  %v3919_v39 = vld [vmem:[%s5099_s30 + $0x200] sm:$0xf] }
 0x9e0   : > { %v3932_v38 = vor.u32 %v4216_v34, %v3929_v35  ;;  %v4215_v40 = vld [vmem:[%s5099_s30 + $0x204] sm:$0xf0]  ;;  %v4214_v41 = vld [vmem:[%s5099_s30 + $0x204] sm:$0xf]  ;;  %v3921_v42 = vld [vmem:[%s5099_s30 + $0x208] sm:$0xf0] }
 0x9e1   : > { %2476 = vmatpush.bf16.msra.mxu0 %v3960_v12  ;;  %v3920_v44 = vor.u32 %v4215_v40, %v3919_v39  ;;  %v3924_v45 = vor.u32 %v4214_v41, %v3921_v42  ;;  %v2393_v49 = vld [vmem:[#allocation2 + $0x8] sm:$0xff] }
 0x9e2   : > { %2489 = vmatpush.bf16.msra.mxu1 %v3964_v13  ;;  %s3899_s14 = sshll.u32 %s2366_s13, 2 }
 0x9e3   : > { %s2368_s17 = scalar_lea.vmem %s5214_s2, %s3899_s14 }
 0x9e4   : > { %v2369_v37 = vld [vmem:[%s2368_s17] sm:$0xf] }
 0x9e5   : > { %2477 = vmatpush.bf16.msra.mxu0 %v3952_v18  ;;  %v2370_v43 = vmax.f32 %v2369_v37, 0.0 }
 0x9e6   : > { %2490 = vmatpush.bf16.msra.mxu1 %v3956_v19 }
 0x9e7   : > { %v2371_v46 = vpack.c.bf16 %v2370_v43, %v2370_v43 }
 0x9e9   : > { %2478 = vmatpush.bf16.msra.mxu0 %v3944_v24 }
 0x9ea   : > { %2491 = vmatpush.bf16.msra.mxu1 %v3948_v25 }
 0x9ed   : > { %2479 = vmatpush.bf16.msra.mxu0 %v3936_v30 }
 0x9ee   : > { %2492 = vmatpush.bf16.msra.mxu1 %v3940_v31 }
 0x9f1   : > { %2480 = vmatpush.bf16.msra.mxu0 %v3928_v36 }
 0x9f2   : > { %2493 = vmatpush.bf16.msra.mxu1 %v3932_v38 }
 0x9f5   : > { %2481 = vmatpush.bf16.msra.mxu0 %v3920_v44 }
 0x9f6   : > { %2494 = vmatpush.bf16.msra.mxu1 %v3924_v45 }
 0x9f8   : > { %2482 = vmatmul.bf16.vlgmr.msra.gmra.mxu0 %v2371_v46 }
 0x9f9   : > { %2495 = vmatmul.bf16.vlgmr.msra.gmra.mxu1 %v2371_v46 }
 0xa75   : > { %v2483_v47 = vpop.f32.mrf.mxu0 }
 0xa76   : > { %v2496_v48 = vpop.f32.mrf.mxu1 }
 0xa77   : > { %v2502_v50 = vrot.slane %v2496_v48, 4 }
 0xa79   : > { %v2504_v51 = vsel %vm2503_vm15, %v2483_v47, %v2502_v50 }
 0xa7a   : > { %v2506_v52 = vadd.f32 %v2504_v51, %v2393_v49 }
 0xa7c   : > { %2507 = vst [vmem:[#allocation2 + $0x8] sm:$0xff] %v2506_v52 }
 0xa7d   : > { %v2485_v53 = vpop.f32.mrf.mxu0 }
 0xa7e   : > { %v2498_v54 = vpop.f32.mrf.mxu1 }
 0xa7f PF: > { %s3982_s18 = sshll.u32 %s4384_s9, 8  ;;  %s3981_s25 = sshll.u32 %s4384_s9, 1  ;;  %vm2518_vm0 = vcmask 1043456   ;;  %v2513_v10 = vld [vmem:[#allocation2 + $0x10] sm:$0xff]  ;;  %v2529_v12 = vld [vmem:[#allocation2] sm:$0xff]  ;;  %vm2634_vm1 = vcmask 60416  }
 0xa80   : > { %s5141_s24 = scalar_lea.vmem %s5217_s5, %s3982_s18  ;;  %s2509_s28 = scalar_lea.vmem %s5216_s4, %s3981_s25  ;;  %v2578_v54 = vld [vmem:[#allocation9] sm:$0xf] }
 0xa81   : > { %v2561_v55 = vld [vmem:[%s5141_s24 + $0x78] sm:$0xff]  ;;  %v2560_v56 = vld [vmem:[%s5141_s24 + $0x70] sm:$0xff]  ;;  %v2559_v59 = vld [vmem:[%s5141_s24 + $0x68] sm:$0xff]  ;;  %s5159_s29 = scalar_select %p272_p9, 1, 0 }
 0xa82   : > { %v2577_v57 = vld [vmem:[%s5141_s24 + $0xf8] sm:$0xff]  ;;  %2593 = vmatpush.msra.mxu0 %v2561_v55  ;;  %v2576_v58 = vld [vmem:[%s5141_s24 + $0xf0] sm:$0xff]  ;;  %v2575_v60 = vld [vmem:[%s5141_s24 + $0xe8] sm:$0xff]  ;;  %s5165_s30 = scalar_select %p418_p11, 1, 0 }
 0xa83   : > { %2613 = vmatpush.msra.mxu1 %v2577_v57  ;;  %v2558_v61 = vld [vmem:[%s5141_s24 + $0x60] sm:$0xff]  ;;  %v2557_v63 = vld [vmem:[%s5141_s24 + $0x58] sm:$0xff]  ;;  %v2556_v1 = vld [vmem:[%s5141_s24 + $0x50] sm:$0xff]  ;;  %s5169_s22 = scalar_select %p567_p13, 1, 0 }
 0xa84   : > { %2594 = vmatpush.msra.mxu0 %v2560_v56  ;;  %v2574_v62 = vld [vmem:[%s5141_s24 + $0xe0] sm:$0xff]  ;;  %v2573_v0 = vld [vmem:[%s5141_s24 + $0xd8] sm:$0xff]  ;;  %v2572_v2 = vld [vmem:[%s5141_s24 + $0xd0] sm:$0xff]  ;;  %s2512_s23 = scvt.s32.f32 %s5159_s29  ;;  %s2527_s8 = scvt.s32.f32 %s5165_s30 }
 0xa85   : > { %2614 = vmatpush.msra.mxu1 %v2576_v58  ;;  %v2555_v3 = vld [vmem:[%s5141_s24 + $0x48] sm:$0xff]  ;;  %v2510_v5 = vld [vmem:[%s2509_s28] sm:$0x3]  ;;  %s2536_s12 = scvt.s32.f32 %s5169_s22  ;;  %v2538_v13 = vld [vmem:[#allocation2 + $0x8] sm:$0xff]  ;;  %s2579_s13 = scvt.s32.f32 %s4477_s21 }
 0xa86   : > { %2595 = vmatpush.msra.mxu0 %v2559_v59  ;;  %v2571_v4 = vld [vmem:[%s5141_s24 + $0xc8] sm:$0xff]  ;;  %v2515_v6 = vperm.slane %v2510_v5, 0  ;;  %v2516_v7 = vperm.slane %v2510_v5, 1  ;;  %v2554_v8 = vld [vmem:[%s5141_s24 + $0x40] sm:$0xff]  ;;  %v2553_v14 = vld [vmem:[%s5141_s24 + $0x38] sm:$0xff]  ;;  %v2523_v22 = vstv %s2512_s23  ;;  %s2580_s16 = scalar_lea.vmem %s5218_s6, %s4384_s9  ;;  %s4401_s17 = smov [#allocation9]  }
 0xa87   : > { %2615 = vmatpush.msra.mxu1 %v2575_v60  ;;  %v2570_v9 = vld [vmem:[%s5141_s24 + $0xc0] sm:$0xff]  ;;  %v2569_v15 = vld [vmem:[%s5141_s24 + $0xb8] sm:$0xff]  ;;  %v2552_v17 = vld [vmem:[%s5141_s24 + $0x30] sm:$0xff]  ;;  %v2532_v23 = vstv %s2527_s8  ;;  %s2644_s18 = sshll.u32 %s4401_s17, 4  ;;  %p4244_p9 = scmp.eq.s32.totalorder %s2789_s1, 3  ;;  %s2645_s18 = int_to_ptr.vmem [resolvable:$true] %s2644_s18 }
 0xa88   : > { %2596 = vmatpush.msra.mxu0 %v2558_v61  ;;  %v2517_v11 = vrot.slane %v2516_v7, 4  ;;  %v2568_v18 = vld [vmem:[%s5141_s24 + $0xb0] sm:$0xff]  ;;  %v2541_v24 = vstv %s2536_s12  ;;  %v2551_v25 = vld [vmem:[%s5141_s24 + $0x28] sm:$0xff]  ;;  %v2550_v30 = vld [vmem:[%s5141_s24 + $0x20] sm:$0xff] }
 0xa89   : > { %2616 = vmatpush.msra.mxu1 %v2574_v62  ;;  %v2567_v26 = vld [vmem:[%s5141_s24 + $0xa8] sm:$0xff]  ;;  %v2566_v31 = vld [vmem:[%s5141_s24 + $0xa0] sm:$0xff]  ;;  %v2549_v35 = vld [vmem:[%s5141_s24 + $0x18] sm:$0xff]  ;;  %v2582_v48 = vstv %s2579_s13 }
 0xa8a   : > { %2597 = vmatpush.msra.mxu0 %v2557_v63  ;;  %v2519_v16 = vsel %vm2518_vm0, %v2515_v6, %v2517_v11  ;;  %v2565_v36 = vld [vmem:[%s5141_s24 + $0x98] sm:$0xff]  ;;  %v2548_v38 = vld [vmem:[%s5141_s24 + $0x10] sm:$0xff]  ;;  %v2547_v41 = vld [vmem:[%s5141_s24 + $0x8] sm:$0xff] }
 0xa8b   : > { %2617 = vmatpush.msra.mxu1 %v2573_v0  ;;  %v2521_v19 = vadd.f32 %v2519_v16, %v2513_v10  ;;  %v2530_v20 = vadd.f32 %v2529_v12, %v2519_v16  ;;  %v2539_v21 = vadd.f32 %v2538_v13, %v2519_v16  ;;  %v2564_v39 = vld [vmem:[%s5141_s24 + $0x90] sm:$0xff]  ;;  %v2563_v42 = vld [vmem:[%s5141_s24 + $0x88] sm:$0xff]  ;;  %v2546_v43 = vld [vmem:[%s5141_s24] sm:$0xff] }
 0xa8c   : > { %2598 = vmatpush.msra.mxu0 %v2556_v1  ;;  %v2562_v44 = vld [vmem:[%s5141_s24 + $0x80] sm:$0xff]  ;;  %s2646_s24 = sshll.u32 %s5219_s7, 4  ;;  %s2647_s24 = int_to_ptr.hbm [resolvable:$true] %s2646_s24 }
 0xa8d   : > { %2618 = vmatpush.msra.mxu1 %v2572_v2  ;;  %v2522_v27 = vmax.f32 %v2521_v19, 0.0  ;;  %v2531_v28 = vmax.f32 %v2530_v20, 0.0  ;;  %v2540_v29 = vmax.f32 %v2539_v21, 0.0  ;;  %v2581_v47 = vld [vmem:[%s2580_s16] sm:$0x1] }
 0xa8e   : > { %2599 = vmatpush.msra.mxu0 %v2555_v3  ;;  %v2583_v49 = vmul.f32 %v2582_v48, %v2581_v47 }
 0xa8f   : > { %2619 = vmatpush.msra.mxu1 %v2571_v4  ;;  %v2524_v32 = vmul.f32 %v2523_v22, %v2522_v27  ;;  %v2533_v33 = vmul.f32 %v2532_v23, %v2531_v28  ;;  %v2542_v34 = vmul.f32 %v2541_v24, %v2540_v29 }
 0xa90   : > { %2600 = vmatpush.msra.mxu0 %v2554_v8  ;;  %v2585_v50 = vperm.slane %v2583_v49, 0 }
 0xa91   : > { %2620 = vmatpush.msra.mxu1 %v2570_v9  ;;  %v2534_v37 = vadd.f32 %v2533_v33, %v2524_v32 }
 0xa92   : > { %2601 = vmatpush.msra.mxu0 %v2553_v14 }
 0xa93   : > { %2621 = vmatpush.msra.mxu1 %v2569_v15  ;;  %v2543_v40 = vadd.f32 %v2542_v34, %v2534_v37 }
 0xa94   : > { %2602 = vmatpush.msra.mxu0 %v2552_v17 }
 0xa95   : > { %2622 = vmatpush.msra.mxu1 %v2568_v18  ;;  %2588 = vst [vmem:[#allocation1] ss:$2 sm:$0xff] %v2543_v40 }
 0xa96   : > { %2603 = vmatpush.msra.mxu0 %v2551_v25 }
 0xa97   : > { %2623 = vmatpush.msra.mxu1 %v2567_v26 }
 0xa98   : > { %2604 = vmatpush.msra.mxu0 %v2550_v30 }
 0xa99   : > { %2624 = vmatpush.msra.mxu1 %v2566_v31 }
 0xa9a   : > { %2605 = vmatpush.msra.mxu0 %v2549_v35 }
 0xa9b   : > { %2625 = vmatpush.msra.mxu1 %v2565_v36 }
 0xa9c   : > { %2606 = vmatpush.msra.mxu0 %v2548_v38  ;;  %v2589_v45 = vld.sshfl [vmem:[#allocation1] sm:$0xff pattern:$0x75316420]  ;;  %v2590_v46 = vld.sshfl [vmem:[#allocation1 + $0x8] sm:$0xff pattern:$0x75316420] }
 0xa9d   : > { %2626 = vmatpush.msra.mxu1 %v2564_v39 }
 0xa9e   : > { %2607 = vmatpush.msra.mxu0 %v2547_v41 }
 0xa9f   : > { %2627 = vmatpush.msra.mxu1 %v2563_v42 }
 0xaa0   : > { %2608 = vmatpush.msra.mxu0 %v2546_v43 }
 0xaa1   : > { %2628 = vmatpush.msra.mxu1 %v2562_v44  ;;  %2609 = vmatmul.f32.vlgmr.msra.gmra.mxu0 %v2589_v45 }
 0xaa2   : > { %2629 = vmatmul.f32.vlgmr.msra.gmra.mxu1 %v2590_v46 }
 0xb1e   : > { %v2610_v51 = vpop.f32.mrf.mxu0 }
 0xb1f   : > { %v2630_v52 = vpop.f32.mrf.mxu1  ;;  %v2611_v53 = vadd.f32 %v2610_v51, %v2585_v50 }
 0xb21   : > { %v2631_v55 = vadd.f32 %v2630_v52, %v2611_v53 }
 0xb23   : > { %v2633_v56 = vadd.f32 %v2631_v55, %v2578_v54 }
 0xb25   : > { %2635 = vst.msk [vmem:[#allocation9] sm:$0xf] %vm2634_vm1, %v2633_v56 }
 0xb26   : > { %4235 = dma.vmem_to_hbm [thread:$0]  (%p4244_p9), %s2645_s18, 64, %s2647_s24, [#allocation8]  }
 0xb27   : > { %4379 = dma.done.wait (%p4244_p9), [#allocation8], 64  }
 0xb28   : > { %4381 = vsyncadd (%p4244_p9), [#allocation8], 4294967232 }
 0xb29 PF: > { %s32_s0 = sadd.s32 1, %s4392_s0   ;;  %s5221_s9 = smov %s4388_s10 }
 0xb2a   : > { %p29_p11 = scmp.ge.s32.totalorder %s32_s0, 6   ;;  %s5222_s10 = smov %s5224_s11 }
 0xb2c   :  { %31 = sbr.rel (!%p29_p11) target bundleno = 10 (0xa), region = 182 }
 0xb31   :  { %2660 = vsyncpa [#allocation7], 1 }
 0xb32   :  { %2662 = vsyncpa [#allocation7 + $0x1], 1 }
 0xb33   :  { %2663 = vsyncpa [#allocation8], 1 }
 0xb34   :  { %2665 = vsyncpa [#allocation8 + $0x1], 1 }

</bundles_post_ra>
